<compile_context>
chip_gen: v7x
topology: tpu7x:2x2x1
jax: 0.10.0
libtpu: 0.0.40
codegen_flags: <defaults>
</compile_context>

<pallas_src>
import functools

import jax
import jax.numpy as jnp
from jax.experimental import pallas as pl
from jax.experimental.pallas import tpu as pltpu


# ---------------------------------------------------------------------------
# Fused kernel: B batch elements per grid step, everything VMEM-resident.
# ---------------------------------------------------------------------------
def _fused_kernel(x_ref, w1_ref, b1_ref, w2_ref, b2_ref, w3_ref, b3_ref,
                  u1_ref, c1_ref, u2_ref, c2_ref, u3_ref, c3_ref,
                  m6_ref, b6_ref, o_ref, scr_ref, *, seq_len):
    f32 = jnp.float32
    L = seq_len                               # per-element sequence length

    def shift_down(v, lc):
        # y[p] = v[p-1]; zero at per-element position 0 (rows with p % lc == 0)
        rows = jax.lax.broadcasted_iota(jnp.int32, (v.shape[0], 1), 0)
        return jnp.where(rows % lc == 0, 0.0, pltpu.roll(v, 1, axis=0))

    def shift_up(v, lc):
        # y[p] = v[p+1]; zero at per-element position lc-1
        rows = jax.lax.broadcasted_iota(jnp.int32, (v.shape[0], 1), 0)
        return jnp.where(rows % lc == lc - 1, 0.0,
                         pltpu.roll(v, v.shape[0] - 1, axis=0))

    def pool2(val):
        # MaxPool1d(2,2) over positions: scratch write + even/odd strided
        # reads + one VPU max.  Position pairs never straddle batch elements
        # because each element occupies an even number of consecutive rows.
        n = val.shape[0]
        scr_ref[pl.ds(0, n), :] = val
        ev = scr_ref[pl.ds(0, n // 2, 2), :]
        od = scr_ref[pl.ds(1, n // 2, 2), :]
        return jnp.maximum(ev, od)

    def conv3_relu(val, lc, wcat_ref, b_ref):
        # 'same' conv k=3 as one (n, 3*Cin) @ (3*Cin, Cout) MXU matmul.
        xc = jnp.concatenate(
            [shift_down(val, lc), val, shift_up(val, lc)], axis=1)
        y = jnp.dot(xc, wcat_ref[...], preferred_element_type=f32) + b_ref[...]
        return jnp.maximum(y, 0.0)

    # ------------------------------ encoder ------------------------------
    x = x_ref[...]                                            # (B*L, 1)
    # conv1 (Cin=1): pure VPU broadcast-FMA, never touches the MXU.
    h = (shift_down(x, L) * w1_ref[0:1, :] + x * w1_ref[1:2, :]
         + shift_up(x, L) * w1_ref[2:3, :] + b1_ref[...])
    h = jnp.maximum(h, 0.0)                                   # (B*L, ch)
    h = pool2(h)                                              # (B*L/2, ch)
    h = conv3_relu(h, L // 2, w2_ref, b2_ref)
    h = pool2(h)                                              # (B*L/4, ch)
    h = conv3_relu(h, L // 4, w3_ref, b3_ref)
    h = pool2(h)                                              # (B*L/8, ch)

    # ------------------- decoder (factored column form) -------------------
    # y[l, r*ch:(r+1)*ch] == decoder activation at position 8*l + r.
    y = jnp.dot(h, u1_ref[...], preferred_element_type=f32) + c1_ref[...]
    y = jnp.dot(y, u2_ref[...], preferred_element_type=f32) + c2_ref[...]
    y = jnp.dot(y, u3_ref[...], preferred_element_type=f32) + c3_ref[...]

    # --------------- conv6 (one fused matmul) + sigmoid ---------------
    # m6 columns 0..7 carry all in-block taps; column 8 is w6[:,0].y[.,pos 7]
    # (feeds lane 0 of the NEXT block row); column 9 is w6[:,2].y[.,pos 0]
    # (feeds lane 7 of the PREVIOUS block row).
    lb = L // 8
    s = jnp.dot(y, m6_ref[...], preferred_element_type=f32)   # (R, 10)
    n_r = s.shape[0]
    row = jax.lax.broadcasted_iota(jnp.int32, (n_r, 1), 0)
    c0 = jnp.where(row % lb == 0, 0.0,
                   pltpu.roll(s[:, 8:9], 1, axis=0))
    c7 = jnp.where(row % lb == lb - 1, 0.0,
                   pltpu.roll(s[:, 9:10], n_r - 1, axis=0))
    lane = jax.lax.broadcasted_iota(jnp.int32, (n_r, 8), 1)
    corr = jnp.where(lane == 0, c0, jnp.where(lane == 7, c7, 0.0))
    o_ref[...] = jax.nn.sigmoid(
        s[:, 0:8] + corr + b6_ref[...]).astype(o_ref.dtype)


# ---------------------------------------------------------------------------
# One-time weight re-layout (run eagerly, OUTSIDE jit).
# ---------------------------------------------------------------------------
def prepare_params(p):
    ch = p["w1"].shape[0]
    dt = p["w1"].dtype

    w1r = jnp.transpose(p["w1"][:, 0, :], (1, 0))                 # (3, ch)

    def conv_cat(w):   # (ch, ch, 3) -> (3*ch, ch), taps stacked on rows
        return jnp.concatenate([w[:, :, 0].T, w[:, :, 1].T, w[:, :, 2].T],
                               axis=0)

    def up_pair(w):    # (ch, ch, 2) -> (ch, 2*ch)  [W0 | W1]
        return jnp.concatenate([w[:, :, 0], w[:, :, 1]], axis=1)

    # conv6 fused matrix (8*ch, 10)
    w6 = p["w6"][0]                                               # (ch, 3)
    d_mid = jnp.eye(8, dtype=dt)          # tap k=1 -> same column
    d_lo = jnp.eye(8, k=1, dtype=dt)      # tap k=0 -> feeds column r+1
    d_hi = jnp.eye(8, k=-1, dtype=dt)     # tap k=2 -> feeds column r-1
    m_main = (jnp.einsum("c,rq->rcq", w6[:, 1], d_mid)
              + jnp.einsum("c,rq->rcq", w6[:, 0], d_lo)
              + jnp.einsum("c,rq->rcq", w6[:, 2], d_hi)).reshape(8 * ch, 8)
    e_last = jnp.zeros((8,), dt).at[7].set(1.0)
    e_first = jnp.zeros((8,), dt).at[0].set(1.0)
    cvec0 = jnp.einsum("c,r->rc", w6[:, 0], e_last).reshape(8 * ch, 1)
    cvec7 = jnp.einsum("c,r->rc", w6[:, 2], e_first).reshape(8 * ch, 1)
    m6 = jnp.concatenate([m_main, cvec0, cvec7], axis=1)          # (8*ch, 10)

    return dict(
        w1r=w1r, b1=p["b1"].reshape(1, ch),
        w2c=conv_cat(p["w2"]), b2=p["b2"].reshape(1, ch),
        w3c=conv_cat(p["w3"]), b3=p["b3"].reshape(1, ch),
        u1=up_pair(p["u1w"]), c1=jnp.tile(p["u1b"].reshape(1, ch), (1, 2)),
        u2=jnp.kron(jnp.eye(2, dtype=dt), up_pair(p["u2w"])),
        c2=jnp.tile(p["u2b"].reshape(1, ch), (1, 4)),
        u3=jnp.kron(jnp.eye(4, dtype=dt), up_pair(p["u3w"])),
        c3=jnp.tile(p["u3b"].reshape(1, ch), (1, 8)),
        m6=m6, b6=p["b6"].reshape(1, 1),
    )


# ---------------------------------------------------------------------------
# Wrapper: batched single pallas_call.
# ---------------------------------------------------------------------------
def convautoencoder_forward(x_ncl, prep, max_block_batch=32):
    """x_ncl: (N, 1, L) float32, PyTorch NCL layout. Returns (N, 1, L)."""
    N, cin, L = x_ncl.shape
    ch = prep["w1r"].shape[1]
    assert cin == 1 and L % 8 == 0

    # Batch tile: largest divisor of N that still leaves >= 2 grid steps
    # (v7x has 2 TensorCores); row counts must stay 8-sublane aligned.
    bb = None
    if N >= 2:
        for cand in range(1, min(max_block_batch, N // 2) + 1):
            if N % cand == 0 and (cand * L) % 64 == 0:
                bb = cand
    if bb is None:
        bb = N                         # single step: blocks == full arrays
    steps = N // bb
    rows = bb * L                      # positions handled per grid step

    x_flat = x_ncl.reshape(N * L, 1)   # free bitcast

    kernel = functools.partial(_fused_kernel, seq_len=L)
    const = lambda i: (0, 0)

    out = pl.pallas_call(
        kernel,
        out_shape=jax.ShapeDtypeStruct((N * L // 8, 8), jnp.float32),
        grid=(steps,),
        in_specs=[
            pl.BlockSpec((rows, 1), lambda i: (i, 0)),            # x
            pl.BlockSpec((3, ch), const),                         # w1 taps
            pl.BlockSpec((1, ch), const),                         # b1
            pl.BlockSpec((3 * ch, ch), const),                    # w2 (im2col)
            pl.BlockSpec((1, ch), const),                         # b2
            pl.BlockSpec((3 * ch, ch), const),                    # w3 (im2col)
            pl.BlockSpec((1, ch), const),                         # b3
            pl.BlockSpec((ch, 2 * ch), const),                    # up1
            pl.BlockSpec((1, 2 * ch), const),                     # up1 bias
            pl.BlockSpec((2 * ch, 4 * ch), const),                # up2 block
            pl.BlockSpec((1, 4 * ch), const),                     # up2 bias
            pl.BlockSpec((4 * ch, 8 * ch), const),                # up3 block
            pl.BlockSpec((1, 8 * ch), const),                     # up3 bias
            pl.BlockSpec((8 * ch, 10), const),                    # conv6 fused
            pl.BlockSpec((1, 1), const),                          # conv6 bias
        ],
        out_specs=pl.BlockSpec((rows // 8, 8), lambda i: (i, 0)),
        scratch_shapes=[pltpu.VMEM((rows, ch), jnp.float32)],
        compiler_params=pltpu.CompilerParams(
            dimension_semantics=("parallel",)),
    )(x_flat, prep["w1r"], prep["b1"], prep["w2c"], prep["b2"],
      prep["w3c"], prep["b3"], prep["u1"], prep["c1"], prep["u2"],
      prep["c2"], prep["u3"], prep["c3"], prep["m6"], prep["b6"])

    # (N*L//8, 8) and (N, 1, L) are the same bytes row-major -> free reshape.
    return out.reshape(N, 1, L)


# ---------------------------------------------------------------------------
# Pure-JAX reference (independent of the Pallas kernel) for verification
# ---------------------------------------------------------------------------
def _ref_forward(x_ncl, p):
    x = jnp.transpose(x_ncl, (0, 2, 1))                      # (N, L, Cin)

    def conv(x, w, b, act):
        K, L = w.shape[2], x.shape[1]
        xp = jnp.pad(x, ((0, 0), (1, 1), (0, 0)))
        y = sum(jnp.einsum("nlc,oc->nlo", xp[:, k:k + L], w[:, :, k])
                for k in range(K)) + b
        return jnp.maximum(y, 0.0) if act == "relu" else jax.nn.sigmoid(y)

    def pool(x):
        N, L, C = x.shape
        return jnp.max(x.reshape(N, L // 2, 2, C), axis=2)

    def convtr(x, w, b):
        ys = [jnp.einsum("nlc,cd->nld", x, w[:, :, k]) + b for k in range(2)]
        N, L, C = ys[0].shape
        return jnp.stack(ys, axis=2).reshape(N, 2 * L, C)

    x = pool(conv(x, p["w1"], p["b1"], "relu"))
    x = pool(conv(x, p["w2"], p["b2"], "relu"))
    x = pool(conv(x, p["w3"], p["b3"], "relu"))
    x = convtr(x, p["u1w"], p["u1b"])
    x = convtr(x, p["u2w"], p["u2b"])
    x = convtr(x, p["u3w"], p["u3b"])
    x = conv(x, p["w6"], p["b6"], "sigmoid")
    return jnp.transpose(x, (0, 2, 1))


# ---------------------------------------------------------------------------
if __name__ == "__main__":
    key = jax.random.PRNGKey(0)
    ch, N, L = 32, 8, 64                 # L divisible by 8 (three pool-2s)
    ks = jax.random.split(key, 15)

    def nrm(k, shape, scale=0.1):
        return scale * jax.random.normal(k, shape, dtype=jnp.float32)

    # PyTorch layouts: Conv1d weight (Cout, Cin, K); ConvTranspose1d (Cin, Cout, K)
    params = {
        "w1": nrm(ks[0], (ch, 1, 3)),   "b1": nrm(ks[1], (ch,)),
        "w2": nrm(ks[2], (ch, ch, 3)),  "b2": nrm(ks[3], (ch,)),
        "w3": nrm(ks[4], (ch, ch, 3)),  "b3": nrm(ks[5], (ch,)),
        "u1w": nrm(ks[6], (ch, ch, 2)), "u1b": nrm(ks[7], (ch,)),
        "u2w": nrm(ks[8], (ch, ch, 2)), "u2b": nrm(ks[9], (ch,)),
        "u3w": nrm(ks[10], (ch, ch, 2)), "u3b": nrm(ks[11], (ch,)),
        "w6": nrm(ks[12], (1, ch, 3)),  "b6": nrm(ks[13], (1,)),
    }
    x = jax.random.normal(ks[14], (N, 1, L), dtype=jnp.float32)   # NCL input

    prep = prepare_params(params)                 # one-time, outside jit
    fwd = jax.jit(lambda xx: convautoencoder_forward(xx, prep))
    out = jax.block_until_ready(fwd(x))

    ref = _ref_forward(x, params)
    assert out.shape == (N, 1, L), out.shape
    err = float(jnp.max(jnp.abs(out - ref)))
    assert err < 5e-5, err
    print("KERNEL_OK")
</pallas_src>

<mosaic_0001>
module attributes {stable_mosaic.version = 11 : i64} {
  func.func @_fused_kernel(%arg0: i32, %arg1: memref<256x1xf32, #tpu.memory_space<vmem>>, %arg2: memref<3x32xf32, #tpu.memory_space<vmem>>, %arg3: memref<1x32xf32, #tpu.memory_space<vmem>>, %arg4: memref<96x32xf32, #tpu.memory_space<vmem>>, %arg5: memref<1x32xf32, #tpu.memory_space<vmem>>, %arg6: memref<96x32xf32, #tpu.memory_space<vmem>>, %arg7: memref<1x32xf32, #tpu.memory_space<vmem>>, %arg8: memref<32x64xf32, #tpu.memory_space<vmem>>, %arg9: memref<1x64xf32, #tpu.memory_space<vmem>>, %arg10: memref<64x128xf32, #tpu.memory_space<vmem>>, %arg11: memref<1x128xf32, #tpu.memory_space<vmem>>, %arg12: memref<128x256xf32, #tpu.memory_space<vmem>>, %arg13: memref<1x256xf32, #tpu.memory_space<vmem>>, %arg14: memref<256x10xf32, #tpu.memory_space<vmem>>, %arg15: memref<1x1xf32, #tpu.memory_space<vmem>>, %arg16: memref<32x8xf32, #tpu.memory_space<vmem>>, %arg17: memref<256x32xf32, #tpu.memory_space<vmem>>) attributes {dimension_semantics = [#tpu.dimension_semantics<parallel>], iteration_bounds = array<i64: 2>, scalar_prefetch = 0 : i64, scratch_operands = 1 : i64, tpu.core_type = #tpu.core_type<tc>, window_params = [{transform_indices = @transform_0, window_bounds = array<i64: 256, 1>}, {pipeline_mode = #tpu.pipeline_mode<synchronous>, transform_indices = @transform_1, window_bounds = array<i64: 3, 32>}, {pipeline_mode = #tpu.pipeline_mode<synchronous>, transform_indices = @transform_2, window_bounds = array<i64: 1, 32>}, {pipeline_mode = #tpu.pipeline_mode<synchronous>, transform_indices = @transform_3, window_bounds = array<i64: 96, 32>}, {pipeline_mode = #tpu.pipeline_mode<synchronous>, transform_indices = @transform_4, window_bounds = array<i64: 1, 32>}, {pipeline_mode = #tpu.pipeline_mode<synchronous>, transform_indices = @transform_5, window_bounds = array<i64: 96, 32>}, {pipeline_mode = #tpu.pipeline_mode<synchronous>, transform_indices = @transform_6, window_bounds = array<i64: 1, 32>}, {pipeline_mode = #tpu.pipeline_mode<synchronous>, transform_indices = @transform_7, window_bounds = array<i64: 32, 64>}, {pipeline_mode = #tpu.pipeline_mode<synchronous>, transform_indices = @transform_8, window_bounds = array<i64: 1, 64>}, {pipeline_mode = #tpu.pipeline_mode<synchronous>, transform_indices = @transform_9, window_bounds = array<i64: 64, 128>}, {pipeline_mode = #tpu.pipeline_mode<synchronous>, transform_indices = @transform_10, window_bounds = array<i64: 1, 128>}, {pipeline_mode = #tpu.pipeline_mode<synchronous>, transform_indices = @transform_11, window_bounds = array<i64: 128, 256>}, {pipeline_mode = #tpu.pipeline_mode<synchronous>, transform_indices = @transform_12, window_bounds = array<i64: 1, 256>}, {pipeline_mode = #tpu.pipeline_mode<synchronous>, transform_indices = @transform_13, window_bounds = array<i64: 256, 10>}, {pipeline_mode = #tpu.pipeline_mode<synchronous>, transform_indices = @transform_14, window_bounds = array<i64: 1, 1>}, {transform_indices = @transform_15, window_bounds = array<i64: 32, 8>}]} {
    %c0 = arith.constant 0 : index
    %c0_0 = arith.constant 0 : index
    %0 = vector.load %arg1[%c0, %c0_0] : memref<256x1xf32, #tpu.memory_space<vmem>>, vector<256x1xf32>
    %1 = tpu.iota {dimensions = array<i32: 0>} : vector<256x1xi32>
    %c64_i32 = arith.constant 64 : i32
    %c0_i32 = arith.constant 0 : i32
    %2 = arith.cmpi eq, %c64_i32, %c0_i32 : i32
    %c1_i32 = arith.constant 1 : i32
    %3 = arith.select %2, %c1_i32, %c64_i32 : i32
    %4 = vector.broadcast %3 : i32 to vector<256x1xi32>
    %5 = arith.remsi %1, %4 : vector<256x1xi32>
    %c0_i32_1 = arith.constant 0 : i32
    %6 = vector.broadcast %c0_i32_1 : i32 to vector<256x1xi32>
    %7 = arith.cmpi ne, %5, %6 : vector<256x1xi32>
    %c0_i32_2 = arith.constant 0 : i32
    %8 = vector.broadcast %c0_i32_2 : i32 to vector<256x1xi32>
    %9 = arith.cmpi slt, %5, %8 : vector<256x1xi32>
    %c0_i32_3 = arith.constant 0 : i32
    %10 = arith.cmpi slt, %3, %c0_i32_3 : i32
    %11 = vector.broadcast %10 : i1 to vector<256x1xi1>
    %12 = vector.broadcast %11 : vector<256x1xi1> to vector<256x1xi1>
    %13 = arith.xori %9, %12 : vector<256x1xi1>
    %14 = arith.andi %13, %7 : vector<256x1xi1>
    %15 = vector.broadcast %3 : i32 to vector<256x1xi32>
    %16 = arith.addi %5, %15 : vector<256x1xi32>
    %17 = arith.select %14, %16, %5 : vector<256x1xi1>, vector<256x1xi32>
    %c0_i32_4 = arith.constant 0 : i32
    %18 = vector.broadcast %c0_i32_4 : i32 to vector<256x1xi32>
    %19 = arith.cmpi eq, %17, %18 : vector<256x1xi32>
    %c1_i32_5 = arith.constant 1 : i32
    %20 = tpu.dynamic_rotate %0 by %c1_i32_5 dim 0 : vector<256x1xf32>, i32 -> vector<256x1xf32>
    %cst = arith.constant 0.000000e+00 : f32
    %21 = vector.broadcast %cst : f32 to vector<256x1xf32>
    %22 = arith.select %19, %21, %20 : vector<256x1xi1>, vector<256x1xf32>
    %c0_6 = arith.constant 0 : index
    %c0_7 = arith.constant 0 : index
    %23 = vector.load %arg2[%c0_6, %c0_7] : memref<3x32xf32, #tpu.memory_space<vmem>>, vector<1x32xf32>
    %24 = vector.broadcast %22 : vector<256x1xf32> to vector<256x32xf32>
    %25 = vector.broadcast %23 : vector<1x32xf32> to vector<256x32xf32>
    %26 = arith.mulf %24, %25 : vector<256x32xf32>
    %c1 = arith.constant 1 : index
    %c0_8 = arith.constant 0 : index
    %27 = vector.load %arg2[%c1, %c0_8] : memref<3x32xf32, #tpu.memory_space<vmem>>, vector<1x32xf32>
    %28 = vector.broadcast %0 : vector<256x1xf32> to vector<256x32xf32>
    %29 = vector.broadcast %27 : vector<1x32xf32> to vector<256x32xf32>
    %30 = arith.mulf %28, %29 : vector<256x32xf32>
    %31 = arith.addf %26, %30 : vector<256x32xf32>
    %32 = tpu.iota {dimensions = array<i32: 0>} : vector<256x1xi32>
    %c64_i32_9 = arith.constant 64 : i32
    %c0_i32_10 = arith.constant 0 : i32
    %33 = arith.cmpi eq, %c64_i32_9, %c0_i32_10 : i32
    %c1_i32_11 = arith.constant 1 : i32
    %34 = arith.select %33, %c1_i32_11, %c64_i32_9 : i32
    %35 = vector.broadcast %34 : i32 to vector<256x1xi32>
    %36 = arith.remsi %32, %35 : vector<256x1xi32>
    %c0_i32_12 = arith.constant 0 : i32
    %37 = vector.broadcast %c0_i32_12 : i32 to vector<256x1xi32>
    %38 = arith.cmpi ne, %36, %37 : vector<256x1xi32>
    %c0_i32_13 = arith.constant 0 : i32
    %39 = vector.broadcast %c0_i32_13 : i32 to vector<256x1xi32>
    %40 = arith.cmpi slt, %36, %39 : vector<256x1xi32>
    %c0_i32_14 = arith.constant 0 : i32
    %41 = arith.cmpi slt, %34, %c0_i32_14 : i32
    %42 = vector.broadcast %41 : i1 to vector<256x1xi1>
    %43 = vector.broadcast %42 : vector<256x1xi1> to vector<256x1xi1>
    %44 = arith.xori %40, %43 : vector<256x1xi1>
    %45 = arith.andi %44, %38 : vector<256x1xi1>
    %46 = vector.broadcast %34 : i32 to vector<256x1xi32>
    %47 = arith.addi %36, %46 : vector<256x1xi32>
    %48 = arith.select %45, %47, %36 : vector<256x1xi1>, vector<256x1xi32>
    %c63_i32 = arith.constant 63 : i32
    %49 = vector.broadcast %c63_i32 : i32 to vector<256x1xi32>
    %50 = arith.cmpi eq, %48, %49 : vector<256x1xi32>
    %c255_i32 = arith.constant 255 : i32
    %51 = tpu.dynamic_rotate %0 by %c255_i32 dim 0 : vector<256x1xf32>, i32 -> vector<256x1xf32>
    %cst_15 = arith.constant 0.000000e+00 : f32
    %52 = vector.broadcast %cst_15 : f32 to vector<256x1xf32>
    %53 = arith.select %50, %52, %51 : vector<256x1xi1>, vector<256x1xf32>
    %c2 = arith.constant 2 : index
    %c0_16 = arith.constant 0 : index
    %54 = vector.load %arg2[%c2, %c0_16] : memref<3x32xf32, #tpu.memory_space<vmem>>, vector<1x32xf32>
    %55 = vector.broadcast %53 : vector<256x1xf32> to vector<256x32xf32>
    %56 = vector.broadcast %54 : vector<1x32xf32> to vector<256x32xf32>
    %57 = arith.mulf %55, %56 : vector<256x32xf32>
    %58 = arith.addf %31, %57 : vector<256x32xf32>
    %c0_17 = arith.constant 0 : index
    %c0_18 = arith.constant 0 : index
    %59 = vector.load %arg3[%c0_17, %c0_18] : memref<1x32xf32, #tpu.memory_space<vmem>>, vector<1x32xf32>
    %60 = vector.broadcast %59 : vector<1x32xf32> to vector<256x32xf32>
    %61 = arith.addf %58, %60 : vector<256x32xf32>
    %cst_19 = arith.constant 0.000000e+00 : f32
    %62 = vector.broadcast %cst_19 : f32 to vector<256x32xf32>
    %63 = arith.maximumf %61, %62 : vector<256x32xf32>
    %c0_20 = arith.constant 0 : index
    %c0_21 = arith.constant 0 : index
    %64 = vector.load %arg17[%c0_20, %c0_21] : memref<256x32xf32, #tpu.memory_space<vmem>>, vector<256x32xf32>
    tpu.vector_store %arg17[%c0_20, %c0_21], %63 {strides = array<i32>} : memref<256x32xf32, #tpu.memory_space<vmem>>, vector<256x32xf32>,
    %c0_22 = arith.constant 0 : index
    %c0_23 = arith.constant 0 : index
    %65 = tpu.strided_load %arg17[%c0_22, %c0_23] {strides = array<i32: 2, 1>} : memref<256x32xf32, #tpu.memory_space<vmem>>, vector<128x32xf32>
    %c1_24 = arith.constant 1 : index
    %c0_25 = arith.constant 0 : index
    %66 = tpu.strided_load %arg17[%c1_24, %c0_25] {strides = array<i32: 2, 1>} : memref<256x32xf32, #tpu.memory_space<vmem>>, vector<128x32xf32>
    %67 = arith.maximumf %65, %66 : vector<128x32xf32>
    %68 = tpu.iota {dimensions = array<i32: 0>} : vector<128x1xi32>
    %c32_i32 = arith.constant 32 : i32
    %c0_i32_26 = arith.constant 0 : i32
    %69 = arith.cmpi eq, %c32_i32, %c0_i32_26 : i32
    %c1_i32_27 = arith.constant 1 : i32
    %70 = arith.select %69, %c1_i32_27, %c32_i32 : i32
    %71 = vector.broadcast %70 : i32 to vector<128x1xi32>
    %72 = arith.remsi %68, %71 : vector<128x1xi32>
    %c0_i32_28 = arith.constant 0 : i32
    %73 = vector.broadcast %c0_i32_28 : i32 to vector<128x1xi32>
    %74 = arith.cmpi ne, %72, %73 : vector<128x1xi32>
    %c0_i32_29 = arith.constant 0 : i32
    %75 = vector.broadcast %c0_i32_29 : i32 to vector<128x1xi32>
    %76 = arith.cmpi slt, %72, %75 : vector<128x1xi32>
    %c0_i32_30 = arith.constant 0 : i32
    %77 = arith.cmpi slt, %70, %c0_i32_30 : i32
    %78 = vector.broadcast %77 : i1 to vector<128x1xi1>
    %79 = vector.broadcast %78 : vector<128x1xi1> to vector<128x1xi1>
    %80 = arith.xori %76, %79 : vector<128x1xi1>
    %81 = arith.andi %80, %74 : vector<128x1xi1>
    %82 = vector.broadcast %70 : i32 to vector<128x1xi32>
    %83 = arith.addi %72, %82 : vector<128x1xi32>
    %84 = arith.select %81, %83, %72 : vector<128x1xi1>, vector<128x1xi32>
    %c0_i32_31 = arith.constant 0 : i32
    %85 = vector.broadcast %c0_i32_31 : i32 to vector<128x1xi32>
    %86 = arith.cmpi eq, %84, %85 : vector<128x1xi32>
    %c1_i32_32 = arith.constant 1 : i32
    %87 = tpu.dynamic_rotate %67 by %c1_i32_32 dim 0 : vector<128x32xf32>, i32 -> vector<128x32xf32>
    %cst_33 = arith.constant 0.000000e+00 : f32
    %88 = vector.shape_cast %86 : vector<128x1xi1> to vector<128x1xi1>
    %89 = vector.broadcast %88 : vector<128x1xi1> to vector<128x32xi1>
    %90 = vector.broadcast %cst_33 : f32 to vector<128x32xf32>
    %91 = arith.select %89, %90, %87 : vector<128x32xi1>, vector<128x32xf32>
    %92 = tpu.iota {dimensions = array<i32: 0>} : vector<128x1xi32>
    %c32_i32_34 = arith.constant 32 : i32
    %c0_i32_35 = arith.constant 0 : i32
    %93 = arith.cmpi eq, %c32_i32_34, %c0_i32_35 : i32
    %c1_i32_36 = arith.constant 1 : i32
    %94 = arith.select %93, %c1_i32_36, %c32_i32_34 : i32
    %95 = vector.broadcast %94 : i32 to vector<128x1xi32>
    %96 = arith.remsi %92, %95 : vector<128x1xi32>
    %c0_i32_37 = arith.constant 0 : i32
    %97 = vector.broadcast %c0_i32_37 : i32 to vector<128x1xi32>
    %98 = arith.cmpi ne, %96, %97 : vector<128x1xi32>
    %c0_i32_38 = arith.constant 0 : i32
    %99 = vector.broadcast %c0_i32_38 : i32 to vector<128x1xi32>
    %100 = arith.cmpi slt, %96, %99 : vector<128x1xi32>
    %c0_i32_39 = arith.constant 0 : i32
    %101 = arith.cmpi slt, %94, %c0_i32_39 : i32
    %102 = vector.broadcast %101 : i1 to vector<128x1xi1>
    %103 = vector.broadcast %102 : vector<128x1xi1> to vector<128x1xi1>
    %104 = arith.xori %100, %103 : vector<128x1xi1>
    %105 = arith.andi %104, %98 : vector<128x1xi1>
    %106 = vector.broadcast %94 : i32 to vector<128x1xi32>
    %107 = arith.addi %96, %106 : vector<128x1xi32>
    %108 = arith.select %105, %107, %96 : vector<128x1xi1>, vector<128x1xi32>
    %c31_i32 = arith.constant 31 : i32
    %109 = vector.broadcast %c31_i32 : i32 to vector<128x1xi32>
    %110 = arith.cmpi eq, %108, %109 : vector<128x1xi32>
    %c127_i32 = arith.constant 127 : i32
    %111 = tpu.dynamic_rotate %67 by %c127_i32 dim 0 : vector<128x32xf32>, i32 -> vector<128x32xf32>
    %cst_40 = arith.constant 0.000000e+00 : f32
    %112 = vector.shape_cast %110 : vector<128x1xi1> to vector<128x1xi1>
    %113 = vector.broadcast %112 : vector<128x1xi1> to vector<128x32xi1>
    %114 = vector.broadcast %cst_40 : f32 to vector<128x32xf32>
    %115 = arith.select %113, %114, %111 : vector<128x32xi1>, vector<128x32xf32>
    %116 = tpu.concatenate %91, %67, %115 in 1 : vector<128x32xf32>, vector<128x32xf32>, vector<128x32xf32> -> vector<128x96xf32>
    %c0_41 = arith.constant 0 : index
    %c0_42 = arith.constant 0 : index
    %117 = vector.load %arg4[%c0_41, %c0_42] : memref<96x32xf32, #tpu.memory_space<vmem>>, vector<96x32xf32>
    %cst_43 = arith.constant dense<0.000000e+00> : vector<128x32xf32>
    %118 = tpu.matmul %116, %117, %cst_43 {dimension_numbers = #tpu.dot_dimension_numbers<[1], [0], [0], [1], [0, 0, 1, 1], [], []>} : vector<128x96xf32>, vector<96x32xf32>, vector<128x32xf32> -> vector<128x32xf32>
    %c0_44 = arith.constant 0 : index
    %c0_45 = arith.constant 0 : index
    %119 = vector.load %arg5[%c0_44, %c0_45] : memref<1x32xf32, #tpu.memory_space<vmem>>, vector<1x32xf32>
    %120 = vector.broadcast %119 : vector<1x32xf32> to vector<128x32xf32>
    %121 = arith.addf %118, %120 : vector<128x32xf32>
    %cst_46 = arith.constant 0.000000e+00 : f32
    %122 = vector.broadcast %cst_46 : f32 to vector<128x32xf32>
    %123 = arith.maximumf %121, %122 : vector<128x32xf32>
    %c0_47 = arith.constant 0 : index
    %c0_48 = arith.constant 0 : index
    %124 = vector.load %arg17[%c0_47, %c0_48] : memref<256x32xf32, #tpu.memory_space<vmem>>, vector<128x32xf32>
    tpu.vector_store %arg17[%c0_47, %c0_48], %123 {strides = array<i32>} : memref<256x32xf32, #tpu.memory_space<vmem>>, vector<128x32xf32>,
    %c0_49 = arith.constant 0 : index
    %c0_50 = arith.constant 0 : index
    %125 = tpu.strided_load %arg17[%c0_49, %c0_50] {strides = array<i32: 2, 1>} : memref<256x32xf32, #tpu.memory_space<vmem>>, vector<64x32xf32>
    %c1_51 = arith.constant 1 : index
    %c0_52 = arith.constant 0 : index
    %126 = tpu.strided_load %arg17[%c1_51, %c0_52] {strides = array<i32: 2, 1>} : memref<256x32xf32, #tpu.memory_space<vmem>>, vector<64x32xf32>
    %127 = arith.maximumf %125, %126 : vector<64x32xf32>
    %128 = tpu.iota {dimensions = array<i32: 0>} : vector<64x1xi32>
    %c16_i32 = arith.constant 16 : i32
    %c0_i32_53 = arith.constant 0 : i32
    %129 = arith.cmpi eq, %c16_i32, %c0_i32_53 : i32
    %c1_i32_54 = arith.constant 1 : i32
    %130 = arith.select %129, %c1_i32_54, %c16_i32 : i32
    %131 = vector.broadcast %130 : i32 to vector<64x1xi32>
    %132 = arith.remsi %128, %131 : vector<64x1xi32>
    %c0_i32_55 = arith.constant 0 : i32
    %133 = vector.broadcast %c0_i32_55 : i32 to vector<64x1xi32>
    %134 = arith.cmpi ne, %132, %133 : vector<64x1xi32>
    %c0_i32_56 = arith.constant 0 : i32
    %135 = vector.broadcast %c0_i32_56 : i32 to vector<64x1xi32>
    %136 = arith.cmpi slt, %132, %135 : vector<64x1xi32>
    %c0_i32_57 = arith.constant 0 : i32
    %137 = arith.cmpi slt, %130, %c0_i32_57 : i32
    %138 = vector.broadcast %137 : i1 to vector<64x1xi1>
    %139 = vector.broadcast %138 : vector<64x1xi1> to vector<64x1xi1>
    %140 = arith.xori %136, %139 : vector<64x1xi1>
    %141 = arith.andi %140, %134 : vector<64x1xi1>
    %142 = vector.broadcast %130 : i32 to vector<64x1xi32>
    %143 = arith.addi %132, %142 : vector<64x1xi32>
    %144 = arith.select %141, %143, %132 : vector<64x1xi1>, vector<64x1xi32>
    %c0_i32_58 = arith.constant 0 : i32
    %145 = vector.broadcast %c0_i32_58 : i32 to vector<64x1xi32>
    %146 = arith.cmpi eq, %144, %145 : vector<64x1xi32>
    %c1_i32_59 = arith.constant 1 : i32
    %147 = tpu.dynamic_rotate %127 by %c1_i32_59 dim 0 : vector<64x32xf32>, i32 -> vector<64x32xf32>
    %cst_60 = arith.constant 0.000000e+00 : f32
    %148 = vector.shape_cast %146 : vector<64x1xi1> to vector<64x1xi1>
    %149 = vector.broadcast %148 : vector<64x1xi1> to vector<64x32xi1>
    %150 = vector.broadcast %cst_60 : f32 to vector<64x32xf32>
    %151 = arith.select %149, %150, %147 : vector<64x32xi1>, vector<64x32xf32>
    %152 = tpu.iota {dimensions = array<i32: 0>} : vector<64x1xi32>
    %c16_i32_61 = arith.constant 16 : i32
    %c0_i32_62 = arith.constant 0 : i32
    %153 = arith.cmpi eq, %c16_i32_61, %c0_i32_62 : i32
    %c1_i32_63 = arith.constant 1 : i32
    %154 = arith.select %153, %c1_i32_63, %c16_i32_61 : i32
    %155 = vector.broadcast %154 : i32 to vector<64x1xi32>
    %156 = arith.remsi %152, %155 : vector<64x1xi32>
    %c0_i32_64 = arith.constant 0 : i32
    %157 = vector.broadcast %c0_i32_64 : i32 to vector<64x1xi32>
    %158 = arith.cmpi ne, %156, %157 : vector<64x1xi32>
    %c0_i32_65 = arith.constant 0 : i32
    %159 = vector.broadcast %c0_i32_65 : i32 to vector<64x1xi32>
    %160 = arith.cmpi slt, %156, %159 : vector<64x1xi32>
    %c0_i32_66 = arith.constant 0 : i32
    %161 = arith.cmpi slt, %154, %c0_i32_66 : i32
    %162 = vector.broadcast %161 : i1 to vector<64x1xi1>
    %163 = vector.broadcast %162 : vector<64x1xi1> to vector<64x1xi1>
    %164 = arith.xori %160, %163 : vector<64x1xi1>
    %165 = arith.andi %164, %158 : vector<64x1xi1>
    %166 = vector.broadcast %154 : i32 to vector<64x1xi32>
    %167 = arith.addi %156, %166 : vector<64x1xi32>
    %168 = arith.select %165, %167, %156 : vector<64x1xi1>, vector<64x1xi32>
    %c15_i32 = arith.constant 15 : i32
    %169 = vector.broadcast %c15_i32 : i32 to vector<64x1xi32>
    %170 = arith.cmpi eq, %168, %169 : vector<64x1xi32>
    %c63_i32_67 = arith.constant 63 : i32
    %171 = tpu.dynamic_rotate %127 by %c63_i32_67 dim 0 : vector<64x32xf32>, i32 -> vector<64x32xf32>
    %cst_68 = arith.constant 0.000000e+00 : f32
    %172 = vector.shape_cast %170 : vector<64x1xi1> to vector<64x1xi1>
    %173 = vector.broadcast %172 : vector<64x1xi1> to vector<64x32xi1>
    %174 = vector.broadcast %cst_68 : f32 to vector<64x32xf32>
    %175 = arith.select %173, %174, %171 : vector<64x32xi1>, vector<64x32xf32>
    %176 = tpu.concatenate %151, %127, %175 in 1 : vector<64x32xf32>, vector<64x32xf32>, vector<64x32xf32> -> vector<64x96xf32>
    %c0_69 = arith.constant 0 : index
    %c0_70 = arith.constant 0 : index
    %177 = vector.load %arg6[%c0_69, %c0_70] : memref<96x32xf32, #tpu.memory_space<vmem>>, vector<96x32xf32>
    %cst_71 = arith.constant dense<0.000000e+00> : vector<64x32xf32>
    %178 = tpu.matmul %176, %177, %cst_71 {dimension_numbers = #tpu.dot_dimension_numbers<[1], [0], [0], [1], [0, 0, 1, 1], [], []>} : vector<64x96xf32>, vector<96x32xf32>, vector<64x32xf32> -> vector<64x32xf32>
    %c0_72 = arith.constant 0 : index
    %c0_73 = arith.constant 0 : index
    %179 = vector.load %arg7[%c0_72, %c0_73] : memref<1x32xf32, #tpu.memory_space<vmem>>, vector<1x32xf32>
    %180 = vector.broadcast %179 : vector<1x32xf32> to vector<64x32xf32>
    %181 = arith.addf %178, %180 : vector<64x32xf32>
    %cst_74 = arith.constant 0.000000e+00 : f32
    %182 = vector.broadcast %cst_74 : f32 to vector<64x32xf32>
    %183 = arith.maximumf %181, %182 : vector<64x32xf32>
    %c0_75 = arith.constant 0 : index
    %c0_76 = arith.constant 0 : index
    %184 = vector.load %arg17[%c0_75, %c0_76] : memref<256x32xf32, #tpu.memory_space<vmem>>, vector<64x32xf32>
    tpu.vector_store %arg17[%c0_75, %c0_76], %183 {strides = array<i32>} : memref<256x32xf32, #tpu.memory_space<vmem>>, vector<64x32xf32>,
    %c0_77 = arith.constant 0 : index
    %c0_78 = arith.constant 0 : index
    %185 = tpu.strided_load %arg17[%c0_77, %c0_78] {strides = array<i32: 2, 1>} : memref<256x32xf32, #tpu.memory_space<vmem>>, vector<32x32xf32>
    %c1_79 = arith.constant 1 : index
    %c0_80 = arith.constant 0 : index
    %186 = tpu.strided_load %arg17[%c1_79, %c0_80] {strides = array<i32: 2, 1>} : memref<256x32xf32, #tpu.memory_space<vmem>>, vector<32x32xf32>
    %187 = arith.maximumf %185, %186 : vector<32x32xf32>
    %c0_81 = arith.constant 0 : index
    %c0_82 = arith.constant 0 : index
    %188 = vector.load %arg8[%c0_81, %c0_82] : memref<32x64xf32, #tpu.memory_space<vmem>>, vector<32x64xf32>
    %cst_83 = arith.constant dense<0.000000e+00> : vector<32x64xf32>
    %189 = tpu.matmul %187, %188, %cst_83 {dimension_numbers = #tpu.dot_dimension_numbers<[1], [0], [0], [1], [0, 0, 1, 1], [], []>} : vector<32x32xf32>, vector<32x64xf32>, vector<32x64xf32> -> vector<32x64xf32>
    %c0_84 = arith.constant 0 : index
    %c0_85 = arith.constant 0 : index
    %190 = vector.load %arg9[%c0_84, %c0_85] : memref<1x64xf32, #tpu.memory_space<vmem>>, vector<1x64xf32>
    %191 = vector.broadcast %190 : vector<1x64xf32> to vector<32x64xf32>
    %192 = arith.addf %189, %191 : vector<32x64xf32>
    %c0_86 = arith.constant 0 : index
    %c0_87 = arith.constant 0 : index
    %193 = vector.load %arg10[%c0_86, %c0_87] : memref<64x128xf32, #tpu.memory_space<vmem>>, vector<64x128xf32>
    %cst_88 = arith.constant dense<0.000000e+00> : vector<32x128xf32>
    %194 = tpu.matmul %192, %193, %cst_88 {dimension_numbers = #tpu.dot_dimension_numbers<[1], [0], [0], [1], [0, 0, 1, 1], [], []>} : vector<32x64xf32>, vector<64x128xf32>, vector<32x128xf32> -> vector<32x128xf32>
    %c0_89 = arith.constant 0 : index
    %c0_90 = arith.constant 0 : index
    %195 = vector.load %arg11[%c0_89, %c0_90] : memref<1x128xf32, #tpu.memory_space<vmem>>, vector<1x128xf32>
    %196 = vector.broadcast %195 : vector<1x128xf32> to vector<32x128xf32>
    %197 = arith.addf %194, %196 : vector<32x128xf32>
    %c0_91 = arith.constant 0 : index
    %c0_92 = arith.constant 0 : index
    %198 = vector.load %arg12[%c0_91, %c0_92] : memref<128x256xf32, #tpu.memory_space<vmem>>, vector<128x256xf32>
    %cst_93 = arith.constant dense<0.000000e+00> : vector<32x256xf32>
    %199 = tpu.matmul %197, %198, %cst_93 {dimension_numbers = #tpu.dot_dimension_numbers<[1], [0], [0], [1], [0, 0, 1, 1], [], []>} : vector<32x128xf32>, vector<128x256xf32>, vector<32x256xf32> -> vector<32x256xf32>
    %c0_94 = arith.constant 0 : index
    %c0_95 = arith.constant 0 : index
    %200 = vector.load %arg13[%c0_94, %c0_95] : memref<1x256xf32, #tpu.memory_space<vmem>>, vector<1x256xf32>
    %201 = vector.broadcast %200 : vector<1x256xf32> to vector<32x256xf32>
    %202 = arith.addf %199, %201 : vector<32x256xf32>
    %c0_96 = arith.constant 0 : index
    %c0_97 = arith.constant 0 : index
    %203 = vector.load %arg14[%c0_96, %c0_97] : memref<256x10xf32, #tpu.memory_space<vmem>>, vector<256x10xf32>
    %cst_98 = arith.constant dense<0.000000e+00> : vector<32x10xf32>
    %204 = tpu.matmul %202, %203, %cst_98 {dimension_numbers = #tpu.dot_dimension_numbers<[1], [0], [0], [1], [0, 0, 1, 1], [], []>} : vector<32x256xf32>, vector<256x10xf32>, vector<32x10xf32> -> vector<32x10xf32>
    %205 = tpu.iota {dimensions = array<i32: 0>} : vector<32x1xi32>
    %c8_i32 = arith.constant 8 : i32
    %c0_i32_99 = arith.constant 0 : i32
    %206 = arith.cmpi eq, %c8_i32, %c0_i32_99 : i32
    %c1_i32_100 = arith.constant 1 : i32
    %207 = arith.select %206, %c1_i32_100, %c8_i32 : i32
    %208 = vector.broadcast %207 : i32 to vector<32x1xi32>
    %209 = arith.remsi %205, %208 : vector<32x1xi32>
    %c0_i32_101 = arith.constant 0 : i32
    %210 = vector.broadcast %c0_i32_101 : i32 to vector<32x1xi32>
    %211 = arith.cmpi ne, %209, %210 : vector<32x1xi32>
    %c0_i32_102 = arith.constant 0 : i32
    %212 = vector.broadcast %c0_i32_102 : i32 to vector<32x1xi32>
    %213 = arith.cmpi slt, %209, %212 : vector<32x1xi32>
    %c0_i32_103 = arith.constant 0 : i32
    %214 = arith.cmpi slt, %207, %c0_i32_103 : i32
    %215 = vector.broadcast %214 : i1 to vector<32x1xi1>
    %216 = vector.broadcast %215 : vector<32x1xi1> to vector<32x1xi1>
    %217 = arith.xori %213, %216 : vector<32x1xi1>
    %218 = arith.andi %217, %211 : vector<32x1xi1>
    %219 = vector.broadcast %207 : i32 to vector<32x1xi32>
    %220 = arith.addi %209, %219 : vector<32x1xi32>
    %221 = arith.select %218, %220, %209 : vector<32x1xi1>, vector<32x1xi32>
    %c0_i32_104 = arith.constant 0 : i32
    %222 = vector.broadcast %c0_i32_104 : i32 to vector<32x1xi32>
    %223 = arith.cmpi eq, %221, %222 : vector<32x1xi32>
    %224 = vector.extract_strided_slice %204 {offsets = [0, 8], sizes = [32, 1], strides = [1, 1]} : vector<32x10xf32> to vector<32x1xf32>
    %c1_i32_105 = arith.constant 1 : i32
    %225 = tpu.dynamic_rotate %224 by %c1_i32_105 dim 0 : vector<32x1xf32>, i32 -> vector<32x1xf32>
    %cst_106 = arith.constant 0.000000e+00 : f32
    %226 = vector.broadcast %cst_106 : f32 to vector<32x1xf32>
    %227 = arith.select %223, %226, %225 : vector<32x1xi1>, vector<32x1xf32>
    %c8_i32_107 = arith.constant 8 : i32
    %c0_i32_108 = arith.constant 0 : i32
    %228 = arith.cmpi eq, %c8_i32_107, %c0_i32_108 : i32
    %c1_i32_109 = arith.constant 1 : i32
    %229 = arith.select %228, %c1_i32_109, %c8_i32_107 : i32
    %230 = vector.broadcast %229 : i32 to vector<32x1xi32>
    %231 = arith.remsi %205, %230 : vector<32x1xi32>
    %c0_i32_110 = arith.constant 0 : i32
    %232 = vector.broadcast %c0_i32_110 : i32 to vector<32x1xi32>
    %233 = arith.cmpi ne, %231, %232 : vector<32x1xi32>
    %c0_i32_111 = arith.constant 0 : i32
    %234 = vector.broadcast %c0_i32_111 : i32 to vector<32x1xi32>
    %235 = arith.cmpi slt, %231, %234 : vector<32x1xi32>
    %c0_i32_112 = arith.constant 0 : i32
    %236 = arith.cmpi slt, %229, %c0_i32_112 : i32
    %237 = vector.broadcast %236 : i1 to vector<32x1xi1>
    %238 = vector.broadcast %237 : vector<32x1xi1> to vector<32x1xi1>
    %239 = arith.xori %235, %238 : vector<32x1xi1>
    %240 = arith.andi %239, %233 : vector<32x1xi1>
    %241 = vector.broadcast %229 : i32 to vector<32x1xi32>
    %242 = arith.addi %231, %241 : vector<32x1xi32>
    %243 = arith.select %240, %242, %231 : vector<32x1xi1>, vector<32x1xi32>
    %c7_i32 = arith.constant 7 : i32
    %244 = vector.broadcast %c7_i32 : i32 to vector<32x1xi32>
    %245 = arith.cmpi eq, %243, %244 : vector<32x1xi32>
    %246 = vector.extract_strided_slice %204 {offsets = [0, 9], sizes = [32, 1], strides = [1, 1]} : vector<32x10xf32> to vector<32x1xf32>
    %c31_i32_113 = arith.constant 31 : i32
    %247 = tpu.dynamic_rotate %246 by %c31_i32_113 dim 0 : vector<32x1xf32>, i32 -> vector<32x1xf32>
    %cst_114 = arith.constant 0.000000e+00 : f32
    %248 = vector.broadcast %cst_114 : f32 to vector<32x1xf32>
    %249 = arith.select %245, %248, %247 : vector<32x1xi1>, vector<32x1xf32>
    %250 = tpu.iota {dimensions = array<i32: 1>} : vector<32x8xi32>
    %c0_i32_115 = arith.constant 0 : i32
    %251 = vector.broadcast %c0_i32_115 : i32 to vector<32x8xi32>
    %252 = arith.cmpi eq, %250, %251 : vector<32x8xi32>
    %c7_i32_116 = arith.constant 7 : i32
    %253 = vector.broadcast %c7_i32_116 : i32 to vector<32x8xi32>
    %254 = arith.cmpi eq, %250, %253 : vector<32x8xi32>
    %cst_117 = arith.constant 0.000000e+00 : f32
    %255 = vector.shape_cast %249 : vector<32x1xf32> to vector<32x1xf32>
    %256 = vector.broadcast %255 : vector<32x1xf32> to vector<32x8xf32>
    %257 = vector.broadcast %cst_117 : f32 to vector<32x8xf32>
    %258 = arith.select %254, %256, %257 : vector<32x8xi1>, vector<32x8xf32>
    %259 = vector.shape_cast %227 : vector<32x1xf32> to vector<32x1xf32>
    %260 = vector.broadcast %259 : vector<32x1xf32> to vector<32x8xf32>
    %261 = arith.select %252, %260, %258 : vector<32x8xi1>, vector<32x8xf32>
    %262 = vector.extract_strided_slice %204 {offsets = [0, 0], sizes = [32, 8], strides = [1, 1]} : vector<32x10xf32> to vector<32x8xf32>
    %263 = arith.addf %262, %261 : vector<32x8xf32>
    %c0_118 = arith.constant 0 : index
    %c0_119 = arith.constant 0 : index
    %264 = vector.load %arg15[%c0_118, %c0_119] : memref<1x1xf32, #tpu.memory_space<vmem>>, vector<1x1xf32>
    %265 = vector.broadcast %264 : vector<1x1xf32> to vector<32x8xf32>
    %266 = arith.addf %263, %265 : vector<32x8xf32>
    %267 = arith.negf %266 : vector<32x8xf32>
    %268 = math.exp %267 : vector<32x8xf32>
    %cst_120 = arith.constant 1.000000e+00 : f32
    %269 = vector.broadcast %cst_120 : f32 to vector<32x8xf32>
    %270 = arith.addf %269, %268 : vector<32x8xf32>
    %271 = arith.divf %269, %270 : vector<32x8xf32>
    %c0_121 = arith.constant 0 : index
    %c0_122 = arith.constant 0 : index
    %272 = vector.load %arg16[%c0_121, %c0_122] : memref<32x8xf32, #tpu.memory_space<vmem>>, vector<32x8xf32>
    tpu.vector_store %arg16[%c0_121, %c0_122], %271 {strides = array<i32>} : memref<32x8xf32, #tpu.memory_space<vmem>>, vector<32x8xf32>,
    return
  }
  func.func @transform_0(%arg0: i32) -> (i32, i32) {
    %c0_i32 = arith.constant 0 : i32
    %c0_i32_0 = arith.constant 0 : i32
    return %arg0, %c0_i32 : i32, i32
  }
  func.func @transform_1(%arg0: i32) -> (i32, i32) {
    %c0_i32 = arith.constant 0 : i32
    %c0_i32_0 = arith.constant 0 : i32
    %c0_i32_1 = arith.constant 0 : i32
    return %c0_i32, %c0_i32_0 : i32, i32
  }
  func.func @transform_2(%arg0: i32) -> (i32, i32) {
    %c0_i32 = arith.constant 0 : i32
    %c0_i32_0 = arith.constant 0 : i32
    %c0_i32_1 = arith.constant 0 : i32
    return %c0_i32, %c0_i32_0 : i32, i32
  }
  func.func @transform_3(%arg0: i32) -> (i32, i32) {
    %c0_i32 = arith.constant 0 : i32
    %c0_i32_0 = arith.constant 0 : i32
    %c0_i32_1 = arith.constant 0 : i32
    return %c0_i32, %c0_i32_0 : i32, i32
  }
  func.func @transform_4(%arg0: i32) -> (i32, i32) {
    %c0_i32 = arith.constant 0 : i32
    %c0_i32_0 = arith.constant 0 : i32
    %c0_i32_1 = arith.constant 0 : i32
    return %c0_i32, %c0_i32_0 : i32, i32
  }
  func.func @transform_5(%arg0: i32) -> (i32, i32) {
    %c0_i32 = arith.constant 0 : i32
    %c0_i32_0 = arith.constant 0 : i32
    %c0_i32_1 = arith.constant 0 : i32
    return %c0_i32, %c0_i32_0 : i32, i32
  }
  func.func @transform_6(%arg0: i32) -> (i32, i32) {
    %c0_i32 = arith.constant 0 : i32
    %c0_i32_0 = arith.constant 0 : i32
    %c0_i32_1 = arith.constant 0 : i32
    return %c0_i32, %c0_i32_0 : i32, i32
  }
  func.func @transform_7(%arg0: i32) -> (i32, i32) {
    %c0_i32 = arith.constant 0 : i32
    %c0_i32_0 = arith.constant 0 : i32
    %c0_i32_1 = arith.constant 0 : i32
    return %c0_i32, %c0_i32_0 : i32, i32
  }
  func.func @transform_8(%arg0: i32) -> (i32, i32) {
    %c0_i32 = arith.constant 0 : i32
    %c0_i32_0 = arith.constant 0 : i32
    %c0_i32_1 = arith.constant 0 : i32
    return %c0_i32, %c0_i32_0 : i32, i32
  }
  func.func @transform_9(%arg0: i32) -> (i32, i32) {
    %c0_i32 = arith.constant 0 : i32
    %c0_i32_0 = arith.constant 0 : i32
    %c0_i32_1 = arith.constant 0 : i32
    return %c0_i32, %c0_i32_0 : i32, i32
  }
  func.func @transform_10(%arg0: i32) -> (i32, i32) {
    %c0_i32 = arith.constant 0 : i32
    %c0_i32_0 = arith.constant 0 : i32
    %c0_i32_1 = arith.constant 0 : i32
    return %c0_i32, %c0_i32_0 : i32, i32
  }
  func.func @transform_11(%arg0: i32) -> (i32, i32) {
    %c0_i32 = arith.constant 0 : i32
    %c0_i32_0 = arith.constant 0 : i32
    %c0_i32_1 = arith.constant 0 : i32
    return %c0_i32, %c0_i32_0 : i32, i32
  }
  func.func @transform_12(%arg0: i32) -> (i32, i32) {
    %c0_i32 = arith.constant 0 : i32
    %c0_i32_0 = arith.constant 0 : i32
    %c0_i32_1 = arith.constant 0 : i32
    return %c0_i32, %c0_i32_0 : i32, i32
  }
  func.func @transform_13(%arg0: i32) -> (i32, i32) {
    %c0_i32 = arith.constant 0 : i32
    %c0_i32_0 = arith.constant 0 : i32
    %c0_i32_1 = arith.constant 0 : i32
    return %c0_i32, %c0_i32_0 : i32, i32
  }
  func.func @transform_14(%arg0: i32) -> (i32, i32) {
    %c0_i32 = arith.constant 0 : i32
    %c0_i32_0 = arith.constant 0 : i32
    %c0_i32_1 = arith.constant 0 : i32
    return %c0_i32, %c0_i32_0 : i32, i32
  }
  func.func @transform_15(%arg0: i32) -> (i32, i32) {
    %c0_i32 = arith.constant 0 : i32
    %c0_i32_0 = arith.constant 0 : i32
    return %arg0, %c0_i32 : i32, i32
  }
}

</mosaic_0001>

<bundles_post_ra>
// kernel: _lambda_.1
= control target key start
LH: loop header
LB: loop body
LE: loop exit
PB: predicated region body
PF: predicated region fallthrough
CT: control target
= control target key end

     0   :  { %s6276_s0 = inlined_call_operand.vmem [shape: f32[512,1], index: 0, kind: input, shape index: {}]   ;;  %s6277_s1 = inlined_call_operand.hbm [shape: f32[3,32], index: 1, kind: input, shape index: {}]   ;;  %s6278_s2 = inlined_call_operand.hbm [shape: f32[1,32], index: 2, kind: input, shape index: {}]   ;;  %s6279_s3 = inlined_call_operand.hbm [shape: f32[96,32], index: 3, kind: input, shape index: {}]   ;;  %s6280_s4 = inlined_call_operand.vmem [shape: f32[1,32], index: 4, kind: input, shape index: {}]   ;;  %s6281_s5 = inlined_call_operand.hbm [shape: f32[96,32], index: 5, kind: input, shape index: {}]   ;;  %s6282_s6 = inlined_call_operand.vmem [shape: f32[1,32], index: 6, kind: input, shape index: {}]   ;;  %s6283_s7 = inlined_call_operand.vmem [shape: f32[32,64], index: 7, kind: input, shape index: {}]   ;;  %s6284_s8 = inlined_call_operand.vmem [shape: f32[1,64], index: 8, kind: input, shape index: {}]   ;;  %s6285_s9 = inlined_call_operand.hbm [shape: f32[64,128], index: 9, kind: input, shape index: {}]   ;;  %s6286_s10 = inlined_call_operand.vmem [shape: f32[1,128], index: 10, kind: input, shape index: {}]   ;;  %s6287_s11 = inlined_call_operand.vmem [shape: f32[128,256], index: 11, kind: input, shape index: {}]   ;;  %s6288_s12 = inlined_call_operand.vmem [shape: f32[1,256], index: 12, kind: input, shape index: {}]   ;;  %s6289_s13 = inlined_call_operand.vmem [shape: f32[256,10], index: 13, kind: input, shape index: {}]   ;;  %s6290_s14 = inlined_call_operand.<no memory space> [shape: f32[1,1], index: 14, kind: input, shape index: {}]   ;;  %s6291_s15 = inlined_call_operand.vmem [shape: f32[64,8], index: 15, kind: output, shape index: {}]  }
   0x1   :  { %6295 = sst [smem:[#allocation16_spill]] %s6278_s2  ;;  %v20_v0 = vstv %s6290_s14 }
   0x2   :  { %6296 = sst [smem:[#allocation17_spill]] %s6291_s15  ;;  %21 = vst [vmem:[#allocation3] sm:$0x1] %v20_v0 }
   0x3   :  { %22 = vsyncpa [#allocation5], 0 }
   0x4   :  { %23 = vsyncpa [#allocation7], 0 }
   0x5   :  { %24 = vsyncpa [#allocation10], 0  ;;  %s4938_s20 = smov 0  }
   0x6 LB: > { %6297 = sst [smem:[#allocation15_spill]] %s4840_s20  ;;  %s4842_s21 = smov [#allocation6]   ;;  %s4840_s20 = sphi %s4938_s20, %s30_s20  }
   0x7   : > { %s405_s22 = sshll.u32 %s4842_s21, 4  ;;  %s4944_s23 = sadd.s32 4294967295, %s4840_s20   ;;  %s4949_s22 = int_to_ptr.vmem [resolvable:$true] %s405_s22 }
   0x8   : > { %p4161_p0 = scmp.ge.s32.totalorder %s4840_s20, 1  ;;  %p381_p1 = scmp.lt.s32.totalorder %s4840_s20, 3 }
   0x9   : > { %p6293_p2 = scmp.eq.s32.totalorder %s4944_s23, 0  ;;  %s4843_s24 = smov [#allocation9]  }
   0xa   : > { %p4951_p3 = pnand %p4161_p0, %p381_p1  ;;  %s431_s25 = sshll.u32 %s4843_s24, 4  ;;  %s4957_s25 = int_to_ptr.vmem [resolvable:$true] %s431_s25 }
   0xb   : > { %s4844_s27 = smov [#allocation4]   ;;  %s4845_s29 = smov [#allocation8]  }
   0xc   : > { %s6298_s14 = scalar_select %p4951_p3, 1, 0 }
   0xd   : > { %p4613_p4 = pneg %p4951_p3  ;;  %s394_s28 = sshll.u32 %s4844_s27, 4  ;;  %s4965_s28 = int_to_ptr.vmem [resolvable:$true] %s394_s28 }
   0xe   : > { %s4967_s30 = sshll.u32 %s4845_s29, 4  ;;  %s6300_s2 = sld [smem:[#allocation16_spill]]  ;;  %s416_s30 = int_to_ptr.vmem [resolvable:$true] %s4967_s30 }
   0xf   : > { %p4961_p5 = pnand %p6293_p2, %p4613_p4 }
  0x11   : > { %p4977_p7 = pneg %p4961_p5 }
  0x14   : > { %s4682_s18 = scalar_lea.hbm %s6300_s2, 16 }
  0x15   : > { %p4683_p6 = scmp.ne.s32.totalorder %s6300_s2, %s4682_s18  ;;  %p4689_p10 = scmp.lt.u32.totalorder %s4682_s18, %s6300_s2 }
  0x17   : > { %p4685_p8 = pnand %p4977_p7, %p4683_p6 }
  0x19   : > { %p4686_p9 = pneg %p4685_p8 }
  0x1b   : > { %p4691_p11 = pnand %p4689_p10, %p4686_p9 }
  0x1d   : > { %4694 = shalt.err (!%p4691_p11)
}
  0x1e   : > { %s4695_s16 = scalar_lea.vmem %s4949_s22, 16  ;;  %s4702_s17 = scalar_lea.vmem %s4949_s22, 32 }
  0x1f   : > { %p4696_p12 = scmp.ne.s32.totalorder %s4949_s22, %s4695_s16  ;;  %p4703_p1 = scmp.lt.s32.totalorder %s4949_s22, %s4949_s22 }
  0x20   : > { %p4704_p4 = scmp.lt.s32.totalorder %s4702_s17, %s4695_s16 }
  0x21   : > { %p4698_p13 = pnand %p4696_p12, %p4977_p7 }
  0x22   : > { %p4705_p6 = por %p4704_p4, %p4703_p1 }
  0x23   : > { %p4699_p0 = pneg %p4698_p13 }
  0x25   : > { %p4706_p8 = pnand %p4705_p6, %p4699_p0 }
  0x27   : > { %4709 = shalt.err (!%p4706_p8)
}
  0x28   : > { %4619 = dma.hbm_to_vmem [thread:$0]  (!%p4961_p5), %s6300_s2, 16, %s4949_s22, [#allocation7]  }
  0x29   : > { %s4710_s29 = scalar_lea.hbm %s6281_s5, 1536 }
  0x2a   : > { %p4711_p9 = scmp.ne.s32.totalorder %s6281_s5, %s4710_s29  ;;  %p4717_p12 = scmp.lt.u32.totalorder %s4710_s29, %s6281_s5 }
  0x2c   : > { %p4713_p10 = pnand %p4711_p9, %p4977_p7 }
  0x2e   : > { %p4714_p11 = pneg %p4713_p10 }
  0x30   : > { %p4719_p13 = pnand %p4717_p12, %p4714_p11 }
  0x32   : > { %4722 = shalt.err (!%p4719_p13)
}
  0x33   : > { %s4723_s22 = scalar_lea.vmem %s4957_s25, 1536  ;;  %p4731_p6 = scmp.lt.s32.totalorder %s4957_s25, %s4957_s25 }
  0x34   : > { %p4724_p0 = scmp.ne.s32.totalorder %s4957_s25, %s4723_s22  ;;  %p4732_p8 = scmp.lt.s32.totalorder %s4723_s22, %s4723_s22 }
  0x36   : > { %p4726_p1 = pnand %p4724_p0, %p4977_p7  ;;  %p4733_p9 = por %p4732_p8, %p4731_p6 }
  0x38   : > { %p4727_p4 = pneg %p4726_p1 }
  0x3a   : > { %p4734_p10 = pnand %p4733_p9, %p4727_p4 }
  0x3c   : > { %4737 = shalt.err (!%p4734_p10)
}
  0x3d   : > { %s4846_s15 = smov 128   ;;  %s4847_s20 = smov 8  }
  0x3e   : > { %4625 = dma.hbm_to_vmem [thread:$0]  (!%p4961_p5), %s6281_s5, 1536, %s4957_s25, [#allocation10], %s4846_s15, %s4846_s15, %s4847_s20  }
  0x3f   : > { %s4738_s29 = scalar_lea.hbm %s6277_s1, 64 }
  0x40   : > { %p4739_p11 = scmp.ne.s32.totalorder %s6277_s1, %s4738_s29  ;;  %p4745_p0 = scmp.lt.u32.totalorder %s4738_s29, %s6277_s1 }
  0x42   : > { %p4741_p12 = pnand %p4739_p11, %p4977_p7 }
  0x44   : > { %p4742_p13 = pneg %p4741_p12 }
  0x46   : > { %p4747_p1 = pnand %p4745_p0, %p4742_p13 }
  0x48   : > { %4750 = shalt.err (!%p4747_p1)
}
  0x49   : > { %s4751_s25 = scalar_lea.vmem %s4965_s28, 64  ;;  %p4759_p9 = scmp.lt.s32.totalorder %s4965_s28, %s4965_s28 }
  0x4a   : > { %p4752_p4 = scmp.ne.s32.totalorder %s4965_s28, %s4751_s25  ;;  %p4760_p10 = scmp.lt.s32.totalorder %s4751_s25, %s4751_s25 }
  0x4c   : > { %p4754_p6 = pnand %p4752_p4, %p4977_p7  ;;  %p4761_p11 = por %p4760_p10, %p4759_p9 }
  0x4e   : > { %p4755_p8 = pneg %p4754_p6 }
  0x50   : > { %p4762_p12 = pnand %p4761_p11, %p4755_p8 }
  0x52   : > { %4765 = shalt.err (!%p4762_p12)
}
  0x53   : > { %4616 = dma.hbm_to_vmem [thread:$0]  (!%p4961_p5), %s6277_s1, 64, %s4965_s28, [#allocation5]  }
  0x54   : > { %s4766_s27 = scalar_lea.hbm %s6279_s3, 1536 }
  0x55   : > { %p4767_p13 = scmp.ne.s32.totalorder %s6279_s3, %s4766_s27  ;;  %p4773_p4 = scmp.lt.u32.totalorder %s4766_s27, %s6279_s3 }
  0x57   : > { %p4769_p0 = pnand %p4767_p13, %p4977_p7 }
  0x59   : > { %p4770_p1 = pneg %p4769_p0 }
  0x5b   : > { %p4775_p6 = pnand %p4773_p4, %p4770_p1 }
  0x5d   : > { %4778 = shalt.err (!%p4775_p6)
}
  0x5e   : > { %s4779_s25 = scalar_lea.vmem %s416_s30, 1536  ;;  %p4787_p11 = scmp.lt.s32.totalorder %s416_s30, %s416_s30 }
  0x5f   : > { %p4780_p8 = scmp.ne.s32.totalorder %s416_s30, %s4779_s25  ;;  %p4788_p12 = scmp.lt.s32.totalorder %s4779_s25, %s4779_s25 }
  0x61   : > { %p4782_p9 = pnand %p4780_p8, %p4977_p7  ;;  %p4789_p2 = por %p4788_p12, %p4787_p11 }
  0x63   : > { %p4783_p10 = pneg %p4782_p9 }
  0x65   : > { %p4790_p3 = pnand %p4789_p2, %p4783_p10 }
  0x67   : > { %4793 = shalt.err (!%p4790_p3)
}
  0x68   : > { %4622 = dma.hbm_to_vmem [thread:$0]  (!%p4961_p5), %s6279_s3, 1536, %s416_s30, [#allocation7], %s4846_s15, %s4846_s15, %s4847_s20  }
  0x69   : > { %s4848_s18 = smov [#allocation11]   ;;  %s4794_s29 = scalar_lea.hbm %s6285_s9, 1024 }
  0x6a   : > { %s453_s19 = sshll.u32 %s4848_s18, 4  ;;  %p4795_p2 = scmp.ne.s32.totalorder %s6285_s9, %s4794_s29  ;;  %s454_s19 = int_to_ptr.vmem [resolvable:$true] %s453_s19 }
  0x6b   : > { %p4801_p0 = scmp.lt.u32.totalorder %s4794_s29, %s6285_s9 }
  0x6c   : > { %p4797_p3 = pnand %p4795_p2, %p4977_p7 }
  0x6e   : > { %p4798_p13 = pneg %p4797_p3 }
  0x70   : > { %p4803_p1 = pnand %p4801_p0, %p4798_p13 }
  0x72   : > { %4806 = shalt.err (!%p4803_p1)
}
  0x73   : > { %s4807_s30 = scalar_lea.vmem %s454_s19, 1024  ;;  %p4815_p9 = scmp.lt.s32.totalorder %s454_s19, %s454_s19 }
  0x74   : > { %p4808_p4 = scmp.ne.s32.totalorder %s454_s19, %s4807_s30  ;;  %p4816_p10 = scmp.lt.s32.totalorder %s4807_s30, %s4807_s30 }
  0x76   : > { %p4810_p6 = pnand %p4808_p4, %p4977_p7  ;;  %p4817_p11 = por %p4816_p10, %p4815_p9 }
  0x78   : > { %p4811_p8 = pneg %p4810_p6 }
  0x7a   : > { %p4818_p12 = pnand %p4817_p11, %p4811_p8 }
  0x7c   : > { %4821 = shalt.err (!%p4818_p12)
}
  0x7d   : > { %4628 = dma.hbm_to_vmem [thread:$0]  (!%p4961_p5), %s6285_s9, 1024, %s454_s19, [#allocation10], %s4846_s15, %s4846_s15, %s4847_s20  }
  0x7e   : > { %p6302_p2 = scmp.ne.s32.totalorder %s6298_s14, 0 }
  0x7f   : > { %p6303_p7 = scmp.eq.s32.totalorder (!%p6302_p2), %s4944_s23, 0 }
  0x80   : > { %493 = sbr.rel (%p6302_p2) target bundleno = 2336 (0x920), region = 80 }
  0x87   : > { %4827 = dma.done.wait (%p6303_p7), [#allocation5], 64   ;;  %p6304_p3 = pmov %p6303_p7 }
  0x89   : > { %4829 = vsyncadd (%p6304_p3), [#allocation5], 4294967232  ;;  %p6305_p13 = pmov %p6304_p3 }
  0x8a   : > { %p6306_p0 = pmov %p6304_p3 }
  0x8b   : > { %4831 = dma.done.wait (%p6305_p13), [#allocation7], 1552  }
  0x8c   : > { %4833 = vsyncadd (%p6306_p0), [#allocation7], 4294965744  ;;  %p6307_p1 = pmov %p6306_p0 }
  0x8d   : > { %p6308_p5 = pmov %p6306_p0 }
  0x8e   : > { %4835 = dma.done.wait (%p6307_p1), [#allocation10], 2560  }
  0x8f   : > { %4837 = vsyncadd (%p6308_p5), [#allocation10], 4294964736  ;;  %s4174_s14 = sshll.u32 %s4944_s23, 5  ;;  %v601_v1 = vlaneseq  ;;  %v4849_v2 = vmov 0   ;;  %vm2002_vm9 = vcmask 261120   ;;  %s4850_s18 = smov 32  }
  0x90   : > { %4661 = vset.pattern.permute.xlu1 %v4849_v2  ;;  %4660 = vset.pattern.permute.xlu0 %v4849_v2  ;;  %p558_p4 = scmp.lt.s32.totalorder %s4174_s14, 63  ;;  %s4851_s19 = smov 64  }
  0x91   : > { %v5107_v3 = vshrl.u32 %v601_v1, 7  ;;  %s4176_s24 = sshll.u32 %s4944_s23, 2 }
  0x92   : > { %s6326_s14 = smov (!%p558_p4, %s4174_s14), 63  ;;  %p564_p6 = scmp.lt.s32.totalorder %s4176_s24, 7 }
  0x93   : > { %s4175_s26 = sshll.u32 %s6326_s14, 3  ;;  %vm1082_vm0 = vcmp.lt.s32.totalorder %v5107_v3, 1  ;;  %v638_v14 = vand.u32 63, %v5107_v3  ;;  %vm1637_vm2 = vcmp.lt.s32.totalorder %v5107_v3, 7  ;;  %v5159_v39 = vadd.s32 64, %v5107_v3  ;;  %s4853_s14 = smov 119  }
  0x94   : > { %s5112_s20 = scalar_lea.vmem %s6276_s0, %s4175_s26  ;;  %v5177_v54 = vadd.s32 56, %v5107_v3  ;;  %s4854_s26 = smov 120  }
  0x95   : > { %v570_v4 = vld [vmem:[%s5112_s20 + $0x8] sm:$0xff]  ;;  %v5116_v5 = vld [vmem:[%s5112_s20] sm:$0xff]  ;;  %v571_v6 = vld [vmem:[%s5112_s20 + $0x10] sm:$0xff]  ;;  %vm1018_vm1 = vcmp.eq.s32.totalorder %v638_v14, 0  ;;  %v694_v47 = vand.u32 63, %v5159_v39  ;;  %s6328_s24 = smov (!%p564_p6, %s4176_s24), 7 }
  0x96   : > { %1352 = vperm.xlu1 %4661, %v570_v4   ;;  %v1051_v7 = vrot.slane %v570_v4, 7  ;;  %1347 = vperm.xlu0 %4660, %v5116_v5   ;;  %v1050_v8 = vrot.slane %v5116_v5, 7  ;;  %v572_v9 = vld [vmem:[%s5112_s20 + $0x18] sm:$0xff]  ;;  %v1052_v11 = vrot.slane %v571_v6, 7  ;;  %v573_v19 = vld [vmem:[%s5112_s20 + $0x20] sm:$0xff]  ;;  %v574_v20 = vld [vmem:[%s5112_s20 + $0x28] sm:$0xff] }
  0x97   : > { %v5124_v10 = vld [vmem:[%s5112_s20 + $0xf8] sm:$0xff]  ;;  %v1053_v12 = vrot.slane %v572_v9, 7  ;;  %v1054_v22 = vrot.slane %v573_v19, 7  ;;  %v1055_v23 = vrot.slane %v574_v20, 7  ;;  %v1606_v26 = vrot.slane %v570_v4, 1  ;;  %v575_v33 = vld [vmem:[%s5112_s20 + $0x30] sm:$0xff] }
  0x98   : > { %v1113_v13 = vsel %vm1082_vm0, %v1050_v8, %v1051_v7  ;;  %v1081_v15 = vrot.slane %v5124_v10, 7  ;;  %v1112_v16 = vsel %vm1082_vm0, %v1051_v7, %v1052_v11  ;;  %v1605_v27 = vrot.slane %v5116_v5, 1  ;;  %v576_v38 = vld [vmem:[%s5112_s20 + $0x38] sm:$0xff]  ;;  %v577_v40 = vld [vmem:[%s5112_s20 + $0x40] sm:$0xff]  ;;  %v578_v45 = vld [vmem:[%s5112_s20 + $0x48] sm:$0xff]  ;;  %s4177_s15 = sshll.u32 %s6328_s24, 3 }
  0x99   : > { %v1111_v17 = vsel %vm1082_vm0, %v1052_v11, %v1053_v12  ;;  %v1109_v24 = vsel %vm1082_vm0, %v1054_v22, %v1055_v23  ;;  %v1110_v25 = vsel %vm1082_vm0, %v1053_v12, %v1054_v22  ;;  %v1607_v28 = vrot.slane %v571_v6, 1  ;;  %v579_v59 = vld [vmem:[%s5112_s20 + $0x50] sm:$0xff]  ;;  %v580_v2 = vld [vmem:[%s5112_s20 + $0x58] sm:$0xff]  ;;  %v581_v14 = vld [vmem:[%s5112_s20 + $0x60] sm:$0xff] }
  0x9a   : > { %1160 = vperm.xlu1 %4661, %v1112_v16   ;;  %1155 = vperm.xlu0 %4660, %v1113_v13   ;;  %v1114_v18 = vsel %vm1082_vm0, %v1081_v15, %v1050_v8  ;;  %v1668_v30 = vsel %vm1637_vm2, %v1605_v27, %v1606_v26  ;;  %v1608_v31 = vrot.slane %v572_v9, 1  ;;  %v1609_v32 = vrot.slane %v573_v19, 1  ;;  %v5186_v0 = vld [vmem:[%s5112_s20 + $0xf0] sm:$0xff] }
  0x9b   : > { %v1115_v21 = vsel %vm1018_vm1, 0.0, %v1114_v18  ;;  %v1667_v29 = vsel %vm1637_vm2, %v1606_v26, %v1607_v28  ;;  %v1610_v36 = vrot.slane %v574_v20, 1  ;;  %v1611_v37 = vrot.slane %v575_v33, 1  ;;  %v583_v22 = vld [vmem:[%s5112_s20 + $0x70] sm:$0xff] }
  0x9c   : > { %v1665_v34 = vsel %vm1637_vm2, %v1608_v31, %v1609_v32  ;;  %v1666_v35 = vsel %vm1637_vm2, %v1607_v28, %v1608_v31  ;;  %v1056_v43 = vrot.slane %v575_v33, 7  ;;  %v1057_v44 = vrot.slane %v576_v38, 7  ;;  %v584_v28 = vld [vmem:[%s5112_s20 + $0x78] sm:$0xff] }
  0x9d   : > { %v1663_v41 = vsel %vm1637_vm2, %v1610_v36, %v1611_v37  ;;  %v1664_v42 = vsel %vm1637_vm2, %v1609_v32, %v1610_v36  ;;  %v1058_v46 = vrot.slane %v577_v40, 7  ;;  %v1059_v50 = vrot.slane %v578_v45, 7 }
  0x9e   : > { %1165 = vperm.xlu1 %4661, %v1111_v17   ;;  %1357 = vperm.xlu0 %4660, %v571_v6   ;;  %v1107_v48 = vsel %vm1082_vm0, %v1056_v43, %v1057_v44  ;;  %v1108_v49 = vsel %vm1082_vm0, %v1055_v23, %v1056_v43  ;;  %vm1026_vm3 = vcmp.eq.s32.totalorder %v694_v47, 0  ;;  %v687_v55 = vand.u32 63, %v5177_v54 }
  0x9f   : > { %v1106_v51 = vsel %vm1082_vm0, %v1057_v44, %v1058_v46  ;;  %v1105_v52 = vsel %vm1082_vm0, %v1058_v46, %v1059_v50  ;;  %v1612_v56 = vrot.slane %v576_v38, 1  ;;  %v1613_v57 = vrot.slane %v577_v40, 1 }
  0xa0   : > { %v1123_v53 = vsel %vm1026_vm3, 0.0, %v1106_v51  ;;  %vm1580_vm4 = vcmp.eq.s32.totalorder %v687_v55, 63  ;;  %v1614_v62 = vrot.slane %v578_v45, 1  ;;  %v1615_v63 = vrot.slane %v579_v59, 1 }
  0xa1   : > { %v1661_v58 = vsel %vm1637_vm2, %v1612_v56, %v1613_v57  ;;  %v1662_v61 = vsel %vm1637_vm2, %v1611_v37, %v1612_v56  ;;  %v1080_v4 = vrot.slane %v5186_v0, 7  ;;  %v1061_v11 = vrot.slane %v580_v2, 7  ;;  %v588_v56 = vld [vmem:[%s5112_s20 + $0x98] sm:$0xff] }
  0xa2   : > { %1362 = vperm.xlu1 %4661, %v572_v9   ;;  %1150 = vperm.xlu0 %4660, %v1115_v21   ;;  %v1677_v60 = vsel %vm1580_vm4, 0.0, %v1661_v58  ;;  %v1659_v7 = vsel %vm1637_vm2, %v1614_v62, %v1615_v63  ;;  %v1660_v8 = vsel %vm1637_vm2, %v1613_v57, %v1614_v62  ;;  %v1060_v9 = vrot.slane %v579_v59, 7 }
  0xa3   : > { %v5196_v6 = vsel %vm1082_vm0, %v1080_v4, %v1081_v15  ;;  %v582_v15 = vld [vmem:[%s5112_s20 + $0x68] sm:$0xff]  ;;  %v1062_v16 = vrot.slane %v581_v14, 7  ;;  %v1617_v21 = vrot.slane %v581_v14, 1  ;;  %v1619_v26 = vrot.slane %v583_v22, 1 }
  0xa4   : > { %v1103_v12 = vsel %vm1082_vm0, %v1060_v9, %v1061_v11  ;;  %v1104_v13 = vsel %vm1082_vm0, %v1059_v50, %v1060_v9  ;;  %v1063_v17 = vrot.slane %v582_v15, 7  ;;  %v1620_v47 = vrot.slane %v584_v28, 1  ;;  %v587_v50 = vld [vmem:[%s5112_s20 + $0x90] sm:$0xff] }
  0xa5   : > { %v1623_v55 = vrot.slane %v587_v50, 1  ;;  %vm2642_vm1 = vcmask 523264   ;;  %vm2678_vm3 = vcmask 785408  }
  0xa6   : > { %1175 = vperm.xlu1 %4661, %v1109_v24   ;;  %1170 = vperm.xlu0 %4660, %v1110_v25   ;;  %v1101_v18 = vsel %vm1082_vm0, %v1062_v16, %v1063_v17  ;;  %v1618_v25 = vrot.slane %v582_v15, 1 }
  0xa8   : > { %v1655_v31 = vsel %vm1637_vm2, %v1618_v25, %v1619_v26  ;;  %v1656_v32 = vsel %vm1637_vm2, %v1617_v21, %v1618_v25 }
  0xaa   : > { %1372 = vperm.xlu1 %4661, %v574_v20   ;;  %1367 = vperm.xlu0 %4660, %v573_v19   ;;  %v1102_v19 = vsel %vm1082_vm0, %v1061_v11, %v1062_v16  ;;  %v1616_v20 = vrot.slane %v580_v2, 1 }
  0xac   : > { %v1657_v23 = vsel %vm1637_vm2, %v1616_v20, %v1617_v21  ;;  %v1658_v24 = vsel %vm1637_vm2, %v1615_v63, %v1616_v20  ;;  %v589_v63 = vld [vmem:[%s5112_s20 + $0xa0] sm:$0xff]  ;;  %v626_v20 = vadd.s32 192, %v5107_v3 }
  0xad   : > { %v5265_v21 = vld [vmem:[%s5112_s20 + $0xc0] sm:$0xff] }
  0xae   : > { %1710 = vperm.xlu1 %4661, %v1667_v29   ;;  %1705 = vperm.xlu0 %4660, %v1668_v30   ;;  %v618_v29 = vadd.s32 128, %v5107_v3  ;;  %v585_v30 = vld [vmem:[%s5112_s20 + $0x80] sm:$0xff] }
  0xaf   : > { %v1066_v36 = vrot.slane %v585_v30, 7 }
  0xb0   : > { %v750_v37 = vand.u32 63, %v618_v29  ;;  %v806_v29 = vand.u32 63, %v626_v20 }
  0xb2   : > { %1720 = vperm.xlu1 %4661, %v1665_v34   ;;  %1715 = vperm.xlu0 %4660, %v1666_v35   ;;  %v1065_v34 = vrot.slane %v584_v28, 7  ;;  %v586_v35 = vld [vmem:[%s5112_s20 + $0x88] sm:$0xff]  ;;  %vm1034_vm5 = vcmp.eq.s32.totalorder %v750_v37, 0  ;;  %vm1042_vm7 = vcmp.eq.s32.totalorder %v806_v29, 0  ;;  %v5332_v29 = vld [vmem:[#allocation6] ss:$0 sm:$0xff] }
  0xb6   : > { %1730 = vperm.xlu1 %4661, %v1663_v41   ;;  %1725 = vperm.xlu0 %4660, %v1664_v42   ;;  %v1067_v41 = vrot.slane %v586_v35, 7  ;;  %v1098_v42 = vsel %vm1082_vm0, %v1065_v34, %v1066_v36 }
  0xb7   : > { %v1131_v44 = vsel %vm1034_vm5, 0.0, %v1098_v42 }
  0xb8   : > { %v1097_v43 = vsel %vm1082_vm0, %v1066_v36, %v1067_v41 }
  0xba   : > { %1185 = vperm.xlu1 %4661, %v1107_v48   ;;  %1180 = vperm.xlu0 %4660, %v1108_v49   ;;  %v1621_v48 = vrot.slane %v585_v30, 1 }
  0xbc   : > { %v1653_v49 = vsel %vm1637_vm2, %v1620_v47, %v1621_v48 }
  0xbe   : > { %1195 = vperm.xlu1 %4661, %v1105_v52   ;;  %1190 = vperm.xlu0 %4660, %v1123_v53   ;;  %v1654_v52 = vsel %vm1637_vm2, %v1619_v26, %v1620_v47  ;;  %v1622_v53 = vrot.slane %v586_v35, 1  ;;  %v5272_v26 = vld [vmem:[%s5112_s20 + $0xc8] sm:$0xff]  ;;  %v1629_v47 = vrot.slane %v5265_v21, 1 }
  0xc0   : > { %v1651_v57 = vsel %vm1637_vm2, %v1622_v53, %v1623_v55  ;;  %v1652_v58 = vsel %vm1637_vm2, %v1621_v48, %v1622_v53 }
  0xc2   : > { %1382 = vperm.xlu1 %4661, %v576_v38   ;;  %1377 = vperm.xlu0 %4660, %v575_v33   ;;  %v1064_v33 = vrot.slane %v583_v22, 7 }
  0xc4   : > { %v1099_v38 = vsel %vm1082_vm0, %v1064_v33, %v1065_v34  ;;  %v1075_v34 = vrot.slane %v5272_v26, 7 }
  0xc6   : > { %1392 = vperm.xlu1 %4661, %v578_v45   ;;  %1387 = vperm.xlu0 %4660, %v577_v40   ;;  %v1100_v40 = vsel %vm1082_vm0, %v1063_v17, %v1064_v33  ;;  %v5234_v45 = vadd.s32 120, %v5107_v3 }
  0xc8   : > { %v743_v46 = vand.u32 63, %v5234_v45 }
  0xca   : > { %1740 = vperm.xlu1 %4661, %v1677_v60   ;;  %1735 = vperm.xlu0 %4660, %v1662_v61   ;;  %vm1588_vm6 = vcmp.eq.s32.totalorder %v743_v46, 63  ;;  %v1069_v60 = vrot.slane %v588_v56, 7 }
  0xcb   : > { %v1685_v51 = vsel %vm1588_vm6, 0.0, %v1653_v49 }
  0xce   : > { %1750 = vperm.xlu1 %4661, %v1659_v7   ;;  %1745 = vperm.xlu0 %4660, %v1660_v8   ;;  %v1070_v7 = vrot.slane %v589_v63, 7 }
  0xd0   : > { %v1094_v11 = vsel %vm1082_vm0, %v1069_v60, %v1070_v7 }
  0xd2   : > { %1205 = vperm.xlu1 %4661, %v1103_v12   ;;  %1200 = vperm.xlu0 %4660, %v1104_v13   ;;  %v1624_v12 = vrot.slane %v588_v56, 1  ;;  %v1625_v13 = vrot.slane %v589_v63, 1 }
  0xd4   : > { %v1650_v16 = vsel %vm1637_vm2, %v1623_v55, %v1624_v12 }
  0xd6   : > { %1402 = vperm.xlu1 %4661, %v580_v2   ;;  %1397 = vperm.xlu0 %4660, %v579_v59   ;;  %v1068_v59 = vrot.slane %v587_v50, 7  ;;  %v590_v2 = vld [vmem:[%s5112_s20 + $0xa8] sm:$0xff] }
  0xd7   : > { %v1071_v8 = vrot.slane %v590_v2, 7  ;;  %v1626_v17 = vrot.slane %v590_v2, 1 }
  0xd8   : > { %v1095_v61 = vsel %vm1082_vm0, %v1068_v59, %v1069_v60  ;;  %v1096_v62 = vsel %vm1082_vm0, %v1067_v41, %v1068_v59  ;;  %v625_v41 = vadd.s32 184, %v5107_v3  ;;  %v1630_v59 = vrot.slane %v5272_v26, 1 }
  0xd9   : > { %v1093_v9 = vsel %vm1082_vm0, %v1070_v7, %v1071_v8 }
  0xda   : > { %1215 = vperm.xlu1 %4661, %v1101_v18   ;;  %1210 = vperm.xlu0 %4660, %v1102_v19   ;;  %v592_v19 = vld [vmem:[%s5112_s20 + $0xb8] sm:$0xff] }
  0xdb   : > { %v1073_v25 = vrot.slane %v592_v19, 7  ;;  %v1628_v46 = vrot.slane %v592_v19, 1 }
  0xde   : > { %1412 = vperm.xlu1 %4661, %v582_v15   ;;  %1407 = vperm.xlu0 %4660, %v581_v14   ;;  %v591_v14 = vld [vmem:[%s5112_s20 + $0xb0] sm:$0xff]  ;;  %v1649_v15 = vsel %vm1637_vm2, %v1624_v12, %v1625_v13  ;;  %v5316_v12 = vld [vmem:[#allocation4 + $0x2] ss:$0 sm:$0xff] }
  0xdf   : > { %v1627_v18 = vrot.slane %v591_v14, 1 }
  0xe2   : > { %1760 = vperm.xlu1 %4661, %v1657_v23   ;;  %1755 = vperm.xlu0 %4660, %v1658_v24   ;;  %v1648_v23 = vsel %vm1637_vm2, %v1625_v13, %v1626_v17  ;;  %v1072_v24 = vrot.slane %v591_v14, 7 }
  0xe4   : > { %v1092_v33 = vsel %vm1082_vm0, %v1071_v8, %v1072_v24 }
  0xe6   : > { %1770 = vperm.xlu1 %4661, %v1655_v31   ;;  %1765 = vperm.xlu0 %4660, %v1656_v32   ;;  %v1091_v32 = vsel %vm1082_vm0, %v1072_v24, %v1073_v25 }
  0xea   : > { %1225 = vperm.xlu1 %4661, %v1099_v38   ;;  %1220 = vperm.xlu0 %4660, %v1100_v40  }
  0xee   : > { %1235 = vperm.xlu1 %4661, %v1097_v43   ;;  %1230 = vperm.xlu0 %4660, %v1131_v44   ;;  %v799_v44 = vand.u32 63, %v625_v41 }
  0xf0   : > { %vm5288_vm8 = vcmp.eq.s32.totalorder %v799_v44, 63 }
  0xf2   : > { %1422 = vperm.xlu1 %4661, %v584_v28   ;;  %1417 = vperm.xlu0 %4660, %v583_v22   ;;  %v1647_v22 = vsel %vm1637_vm2, %v1626_v17, %v1627_v18  ;;  %v1074_v28 = vrot.slane %v5265_v21, 7 }
  0xf4   : > { %v1089_v38 = vsel %vm1082_vm0, %v1074_v28, %v1075_v34 }
  0xf6   : > { %1432 = vperm.xlu1 %4661, %v586_v35   ;;  %1427 = vperm.xlu0 %4660, %v585_v30   ;;  %v1090_v35 = vsel %vm1082_vm0, %v1073_v25, %v1074_v28 }
  0xf7   : > { %v1139_v40 = vsel %vm1042_vm7, 0.0, %v1090_v35  ;;  %v5341_v35 = vld [vmem:[%s5112_s20 + $0xe0] sm:$0xff] }
  0xfa   : > { %1780 = vperm.xlu1 %4661, %v1685_v51   ;;  %1775 = vperm.xlu0 %4660, %v1654_v52   ;;  %v1645_v51 = vsel %vm1637_vm2, %v1628_v46, %v1629_v47  ;;  %v5295_v52 = vld [vmem:[%s5112_s20 + $0xd0] sm:$0xff] }
  0xfb   : > { %v1631_v60 = vrot.slane %v5295_v52, 1 }
  0xfd   : > { %v1643_v13 = vsel %vm1637_vm2, %v1630_v59, %v1631_v60 }
  0xfe   : > { %1790 = vperm.xlu1 %4661, %v1651_v57   ;;  %1785 = vperm.xlu0 %4660, %v1652_v58   ;;  %v1693_v57 = vsel %vm5288_vm8, 0.0, %v1645_v51  ;;  %v1646_v58 = vsel %vm1637_vm2, %v1627_v18, %v1628_v46 }
 0x102   : > { %1245 = vperm.xlu1 %4661, %v1095_v61   ;;  %1240 = vperm.xlu0 %4660, %v1096_v62   ;;  %v5307_v61 = vld [vmem:[#allocation4 + $0x1] ss:$0 sm:$0xff]  ;;  %v5310_v62 = vld [vmem:[%s5112_s20 + $0xd8] sm:$0xff] }
 0x106   : > { %1442 = vperm.xlu1 %4661, %v588_v56   ;;  %1437 = vperm.xlu0 %4660, %v587_v50   ;;  %v5297_v56 = vld [vmem:[#allocation4] ss:$0 sm:$0xff] }
 0x10a   : > { %1255 = vperm.xlu1 %4661, %v1093_v9   ;;  %1250 = vperm.xlu0 %4660, %v1094_v11   ;;  %v1076_v9 = vrot.slane %v5295_v52, 7 }
 0x10e   : > { %1452 = vperm.xlu1 %4661, %v590_v2   ;;  %1447 = vperm.xlu0 %4660, %v589_v63  }
 0x112   : > { %1800 = vperm.xlu1 %4661, %v1649_v15   ;;  %1795 = vperm.xlu0 %4660, %v1650_v16   ;;  %v1077_v15 = vrot.slane %v5310_v62, 7 }
 0x115   : > { %v1353_v30 = vpop.permute.xlu1 %1352  ;;  %v1348_v31 = vpop.permute.xlu0 %1347 }
 0x116   : > { %1810 = vperm.xlu1 %4661, %v1647_v22   ;;  %1805 = vperm.xlu0 %4660, %v1648_v23   ;;  %v1510_v11 = vmul.f32 %v5307_v61, %v1353_v30  ;;  %v1509_v16 = vmul.f32 %v5307_v61, %v1348_v31  ;;  %v1087_v30 = vsel %vm1082_vm0, %v1076_v9, %v1077_v15 }
 0x119   : > { %v1161_v36 = vpop.permute.xlu1 %1160  ;;  %v1156_v37 = vpop.permute.xlu0 %1155 }
 0x11a   : > { %1265 = vperm.xlu1 %4661, %v1091_v32   ;;  %1260 = vperm.xlu0 %4660, %v1092_v33   ;;  %v1313_v63 = vmul.f32 %v5297_v56, %v1156_v37  ;;  %v1314_v25 = vmul.f32 %v5297_v56, %v1161_v36  ;;  %v1088_v33 = vsel %vm1082_vm0, %v1075_v34, %v1076_v9  ;;  %v5344_v37 = vld [vmem:[%s5112_s20 + $0xe8] sm:$0xff] }
 0x11b   : > { %v1079_v50 = vrot.slane %v5344_v37, 7 }
 0x11c   : > { %v1542_v17 = vadd.f32 %v1510_v11, %v1313_v63 }
 0x11d   : > { %v1166_v42 = vpop.permute.xlu1 %1165  ;;  %v1358_v43 = vpop.permute.xlu0 %1357 }
 0x11e   : > { %1275 = vperm.xlu1 %4661, %v1089_v38   ;;  %1270 = vperm.xlu0 %4660, %v1139_v40   ;;  %v1511_v18 = vmul.f32 %v5307_v61, %v1358_v43  ;;  %v1315_v28 = vmul.f32 %v5297_v56, %v1166_v42 }
 0x120   : > { %v1543_v36 = vadd.f32 %v1511_v18, %v1314_v25 }
 0x121   : > { %v1363_v48 = vpop.permute.xlu1 %1362  ;;  %v1151_v49 = vpop.permute.xlu0 %1150 }
 0x122   : > { %1462 = vperm.xlu1 %4661, %v592_v19   ;;  %1457 = vperm.xlu0 %4660, %v591_v14   ;;  %v1312_v8 = vmul.f32 %v5297_v56, %v1151_v49  ;;  %v1644_v14 = vsel %vm1637_vm2, %v1629_v47, %v1630_v59  ;;  %v1512_v19 = vmul.f32 %v5307_v61, %v1363_v48  ;;  %v1078_v49 = vrot.slane %v5341_v35, 7 }
 0x124   : > { %v1541_v22 = vadd.f32 %v1509_v16, %v1312_v8  ;;  %v1544_v38 = vadd.f32 %v1512_v19, %v1315_v28 }
 0x125   : > { %v1176_v53 = vpop.permute.xlu1 %1175  ;;  %v1171_v55 = vpop.permute.xlu0 %1170 }
 0x126   : > { %1472 = vperm.xlu1 %4661, %v5272_v26   ;;  %1467 = vperm.xlu0 %4660, %v5265_v21   ;;  %v1317_v47 = vmul.f32 %v5297_v56, %v1176_v53  ;;  %v1316_v48 = vmul.f32 %v5297_v56, %v1171_v55 }
 0x129   : > { %v1373_v2 = vpop.permute.xlu1 %1372  ;;  %v1368_v7 = vpop.permute.xlu0 %1367 }
 0x12a   : > { %1820 = vperm.xlu1 %4661, %v1693_v57   ;;  %1815 = vperm.xlu0 %4660, %v1646_v58   ;;  %v1514_v40 = vmul.f32 %v5307_v61, %v1373_v2  ;;  %v1513_v41 = vmul.f32 %v5307_v61, %v1368_v7 }
 0x12c   : > { %v1546_v63 = vadd.f32 %v1514_v40, %v1317_v47  ;;  %v1545_v2 = vadd.f32 %v1513_v41, %v1316_v48 }
 0x12d   : > { %v1711_v20 = vpop.permute.xlu1 %1710  ;;  %v1706_v21 = vpop.permute.xlu0 %1705 }
 0x12e   : > { %v1868_v23 = vmul.f32 %v5316_v12, %v1711_v20  ;;  %v1867_v24 = vmul.f32 %v5316_v12, %v1706_v21  ;;  %1830 = vperm.xlu1 %4661, %v1643_v13   ;;  %1825 = vperm.xlu0 %4660, %v1644_v14   ;;  %v1085_v13 = vsel %vm1082_vm0, %v1078_v49, %v1079_v50 }
 0x12f   : > { %v1086_v14 = vsel %vm1082_vm0, %v1077_v15, %v1078_v49  ;;  %v1633_v15 = vrot.slane %v5341_v35, 1 }
 0x130   : > { %v1900_v31 = vadd.f32 %v1868_v23, %v1542_v17  ;;  %v1899_v32 = vadd.f32 %v1867_v24, %v1541_v22  ;;  %v1632_v24 = vrot.slane %v5310_v62, 1 }
 0x131   : > { %v1721_v42 = vpop.permute.xlu1 %1720  ;;  %v1716_v43 = vpop.permute.xlu0 %1715 }
 0x132   : > { %v1939_v44 = vadd.f32 %v5332_v29, %v1900_v31  ;;  %v1938_v46 = vadd.f32 %v5332_v29, %v1899_v32  ;;  %v1870_v26 = vmul.f32 %v5316_v12, %v1721_v42  ;;  %v1869_v34 = vmul.f32 %v5316_v12, %v1716_v43  ;;  %1285 = vperm.xlu1 %4661, %v1087_v30  }
 0x133   : > { %1280 = vperm.xlu0 %4660, %v1088_v33   ;;  %v1642_v40 = vsel %vm1637_vm2, %v1631_v60, %v1632_v24 }
 0x134   : > { %v1971_v51 = vmax.f32 %v1939_v44, 0.0  ;;  %v1970_v57 = vmax.f32 %v1938_v46, 0.0  ;;  %v1902_v58 = vadd.f32 %v1870_v26, %v1544_v38  ;;  %v1901_v59 = vadd.f32 %v1869_v34, %v1543_v36 }
 0x135   : > { %v1731_v7 = vpop.permute.xlu1 %1730  ;;  %v1726_v8 = vpop.permute.xlu0 %1725  ;;  %v1641_v36 = vsel %vm1637_vm2, %v1632_v24, %v1633_v15  ;;  %v1635_v38 = vrot.slane %v5186_v0, 1 }
 0x136   : > { %2004 = vst.msk [vmem:[#allocation2 + $0x8] sm:$0xff] %vm2002_vm9, %v1971_v51  ;;  %2003 = vst.msk [vmem:[#allocation2] sm:$0xff] %vm2002_vm9, %v1970_v57  ;;  %v1941_v53 = vadd.f32 %v5332_v29, %v1902_v58  ;;  %v1940_v55 = vadd.f32 %v5332_v29, %v1901_v59  ;;  %v1872_v9 = vmul.f32 %v5316_v12, %v1731_v7  ;;  %1482 = vperm.xlu1 %4661, %v5310_v62  }
 0x137   : > { %v1871_v11 = vmul.f32 %v5316_v12, %v1726_v8  ;;  %1477 = vperm.xlu0 %4660, %v5295_v52   ;;  %v1634_v62 = vrot.slane %v5344_v37, 1  ;;  %v633_v52 = vadd.s32 248, %v5107_v3  ;;  %v1084_v7 = vsel %vm1082_vm0, %v1079_v50, %v1080_v4 }
 0x138   : > { %v1973_v16 = vmax.f32 %v1941_v53, 0.0  ;;  %v1972_v17 = vmax.f32 %v1940_v55, 0.0  ;;  %v1904_v18 = vadd.f32 %v1872_v9, %v1546_v63  ;;  %v1636_v9 = vrot.slane %v5124_v10, 1 }
 0x139   : > { %v1903_v19 = vadd.f32 %v1871_v11, %v1545_v2  ;;  %v1186_v20 = vpop.permute.xlu1 %1185  ;;  %v1181_v21 = vpop.permute.xlu0 %1180  ;;  %v1639_v26 = vsel %vm1637_vm2, %v1634_v62, %v1635_v38  ;;  %v1640_v34 = vsel %vm1637_vm2, %v1633_v15, %v1634_v62  ;;  %v855_v55 = vand.u32 63, %v633_v52 }
 0x13a   : > { %2006 = vst.msk [vmem:[#allocation2 + $0x18] sm:$0xff] %vm2002_vm9, %v1973_v16  ;;  %2005 = vst.msk [vmem:[#allocation2 + $0x10] sm:$0xff] %vm2002_vm9, %v1972_v17  ;;  %v1943_v22 = vadd.f32 %v5332_v29, %v1904_v18  ;;  %1295 = vperm.xlu1 %4661, %v1085_v13   ;;  %v1319_v2 = vmul.f32 %v5297_v56, %v1186_v20  ;;  %v1318_v53 = vmul.f32 %v5297_v56, %v1181_v21 }
 0x13b   : > { %v1942_v23 = vadd.f32 %v5332_v29, %v1903_v19  ;;  %1290 = vperm.xlu0 %4660, %v1086_v14   ;;  %vm5432_vm10 = vcmp.eq.s32.totalorder %v855_v55, 63 }
 0x13c   : > { %v1975_v25 = vmax.f32 %v1943_v22, 0.0 }
 0x13d   : > { %v1974_v28 = vmax.f32 %v1942_v23, 0.0  ;;  %v1196_v30 = vpop.permute.xlu1 %1195  ;;  %v1191_v31 = vpop.permute.xlu0 %1190  ;;  %v2035_v32 = vld [vmem:[#allocation2] ss:$2 sm:$0xff]  ;;  %v2067_v33 = vld [vmem:[#allocation2 + $0x1] ss:$2 sm:$0xff] }
 0x13e   : > { %2008 = vst.msk [vmem:[#allocation2 + $0x28] sm:$0xff] %vm2002_vm9, %v1975_v25  ;;  %1492 = vperm.xlu1 %4661, %v5344_v37   ;;  %v5388_v43 = vmax.f32 %v2035_v32, %v2067_v33  ;;  %v1321_v20 = vmul.f32 %v5297_v56, %v1196_v30  ;;  %v1320_v21 = vmul.f32 %v5297_v56, %v1191_v31 }
 0x13f   : > { %2007 = vst.msk [vmem:[#allocation2 + $0x20] sm:$0xff] %vm2002_vm9, %v1974_v28  ;;  %1487 = vperm.xlu0 %4660, %v5341_v35  }
 0x140   : > { %v2322_v58 = vrot.slane %v5388_v43, 7 }
 0x141   : > { %v1383_v41 = vpop.permute.xlu1 %1382  ;;  %v1378_v42 = vpop.permute.xlu0 %1377  ;;  %v2037_v44 = vld [vmem:[#allocation2 + $0x10] ss:$2 sm:$0xff]  ;;  %v2069_v46 = vld [vmem:[#allocation2 + $0x11] ss:$2 sm:$0xff] }
 0x142   : > { %1840 = vperm.xlu1 %4661, %v1641_v36   ;;  %v5390_v35 = vmax.f32 %v2037_v44, %v2069_v46  ;;  %v1516_v47 = vmul.f32 %v5307_v61, %v1383_v41  ;;  %v1515_v59 = vmul.f32 %v5307_v61, %v1378_v42 }
 0x143   : > { %1835 = vperm.xlu0 %4660, %v1642_v40  }
 0x144   : > { %v2323_v60 = vrot.slane %v5390_v35, 7  ;;  %v1548_v13 = vadd.f32 %v1516_v47, %v1319_v2  ;;  %v1547_v50 = vadd.f32 %v1515_v59, %v1318_v53  ;;  %v2419_v59 = vrot.slane %v5390_v35, 1 }
 0x145   : > { %v1393_v48 = vpop.permute.xlu1 %1392  ;;  %v1388_v49 = vpop.permute.xlu0 %1387  ;;  %v5464_v53 = vadd.s32 24, %v5107_v3 }
 0x146   : > { %v2039_v51 = vld [vmem:[#allocation2 + $0x20] ss:$2 sm:$0xff]  ;;  %v2071_v57 = vld [vmem:[#allocation2 + $0x21] ss:$2 sm:$0xff]  ;;  %1850 = vperm.xlu1 %4661, %v1639_v26   ;;  %v5414_v8 = vsel %vm1082_vm0, %v2322_v58, %v2323_v60  ;;  %v1518_v14 = vmul.f32 %v5307_v61, %v1393_v48  ;;  %v1517_v37 = vmul.f32 %v5307_v61, %v1388_v49 }
 0x147   : > { %v5401_v63 = vmax.f32 %v2039_v51, %v2071_v57  ;;  %1845 = vperm.xlu0 %4660, %v1640_v34   ;;  %v2659_v26 = vld [vmem:[#allocation8] sm:$0xff]  ;;  %v2660_v34 = vld [vmem:[#allocation8 + $0x8] sm:$0xff]  ;;  %v2661_v51 = vld [vmem:[#allocation8 + $0x10] sm:$0xff] }
 0x148   : > { %v1550_v15 = vadd.f32 %v1518_v14, %v1321_v20  ;;  %v1549_v25 = vadd.f32 %v1517_v37, %v1320_v21  ;;  %v4457_v52 = vpack.c.bf16 %v2660_v34, %v2659_v26  ;;  %v2662_v57 = vld [vmem:[#allocation8 + $0x18] sm:$0xff]  ;;  %v2139_v20 = vand.u32 31, %v5464_v53  ;;  %v2667_v34 = vld [vmem:[#allocation8 + $0x40] sm:$0xff] }
 0x149   : > { %v2324_v11 = vrot.slane %v5401_v63, 7  ;;  %v1741_v16 = vpop.permute.xlu1 %1740  ;;  %v1736_v4 = vpop.permute.xlu0 %1735  ;;  %v2420_v49 = vrot.slane %v5401_v63, 1  ;;  %v4461_v2 = vpack.c.bf16 %v2662_v57, %v2661_v51 }
 0x14a   : > { %v1874_v17 = vmul.f32 %v5316_v12, %v1741_v16  ;;  %v1873_v18 = vmul.f32 %v5316_v12, %v1736_v4  ;;  %1305 = vperm.xlu1 %4661, %v5196_v6   ;;  %v1669_v6 = vsel %vm1637_vm2, %v1636_v9, %v1605_v27  ;;  %v1638_v27 = vsel %vm1637_vm2, %v1635_v38, %v1636_v9  ;;  %v2663_v16 = vld [vmem:[#allocation8 + $0x20] sm:$0xff] }
 0x14b   : > { %v5428_v19 = vsel %vm1082_vm0, %v2323_v60, %v2324_v11  ;;  %1300 = vperm.xlu0 %4660, %v1084_v7   ;;  %v1701_v5 = vsel %vm5432_vm10, 0.0, %v1669_v6  ;;  %4458 = vmatprep.subr.bf16.mxu0 %v4457_v52  ;;  %v2418_v7 = vrot.slane %v5388_v43, 1  ;;  %vm5490_vm11 = vcmp.eq.s32.totalorder %v2139_v20, 31 }
 0x14c   : > { %v1906_v22 = vadd.f32 %v1874_v17, %v1548_v13  ;;  %v1905_v23 = vadd.f32 %v1873_v18, %v1547_v50  ;;  %4460 = vmatpush3.bf16.msra.mxu0 %v4457_v52  ;;  %v2447_v13 = vsel %vm1637_vm2, %v2419_v59, %v2420_v49  ;;  %v2664_v50 = vld [vmem:[#allocation8 + $0x28] sm:$0xff] }
 0x14d   : > { %v1751_v28 = vpop.permute.xlu1 %1750  ;;  %v1746_v32 = vpop.permute.xlu0 %1745  ;;  %4462 = vmatprep.subr.bf16.mxu0 %v4461_v2  ;;  %v4465_v17 = vpack.c.bf16 %v2664_v50, %v2663_v16 }
 0x14e   : > { %v1945_v30 = vadd.f32 %v5332_v29, %v1906_v22  ;;  %v1944_v31 = vadd.f32 %v5332_v29, %v1905_v23  ;;  %v1876_v33 = vmul.f32 %v5316_v12, %v1751_v28  ;;  %v1875_v36 = vmul.f32 %v5316_v12, %v1746_v32  ;;  %1502 = vperm.xlu1 %4661, %v5124_v10   ;;  %v2665_v28 = vld [vmem:[#allocation8 + $0x30] sm:$0xff] }
 0x14f   : > { %1497 = vperm.xlu0 %4660, %v5186_v0  }
 0x150   : > { %v1977_v62 = vmax.f32 %v1945_v30, 0.0  ;;  %v1976_v40 = vmax.f32 %v1944_v31, 0.0  ;;  %v1908_v41 = vadd.f32 %v1876_v33, %v1550_v15  ;;  %v1907_v42 = vadd.f32 %v1875_v36, %v1549_v25  ;;  %4464 = vmatpush3.bf16.msra.mxu0 %v4461_v2  ;;  %v2666_v31 = vld [vmem:[#allocation8 + $0x38] sm:$0xff] }
 0x151   : > { %v1206_v44 = vpop.permute.xlu1 %1205  ;;  %v1201_v46 = vpop.permute.xlu0 %1200  ;;  %4466 = vmatprep.subr.bf16.mxu0 %v4465_v17 }
 0x152   : > { %2010 = vst.msk [vmem:[#allocation2 + $0x38] sm:$0xff] %vm2002_vm9, %v1977_v62  ;;  %2009 = vst.msk [vmem:[#allocation2 + $0x30] sm:$0xff] %vm2002_vm9, %v1976_v40  ;;  %v1947_v10 = vadd.f32 %v5332_v29, %v1908_v41  ;;  %v1946_v0 = vadd.f32 %v5332_v29, %v1907_v42  ;;  %1860 = vperm.xlu1 %4661, %v1701_v5   ;;  %v1323_v32 = vmul.f32 %v5297_v56, %v1206_v44 }
 0x153   : > { %1855 = vperm.xlu0 %4660, %v1638_v27   ;;  %v1322_v33 = vmul.f32 %v5297_v56, %v1201_v46  ;;  %v4469_v5 = vpack.c.bf16 %v2666_v31, %v2665_v28 }
 0x154   : > { %v1979_v38 = vmax.f32 %v1947_v10, 0.0  ;;  %v1978_v60 = vmax.f32 %v1946_v0, 0.0  ;;  %4468 = vmatpush3.bf16.msra.mxu0 %v4465_v17  ;;  %v2668_v10 = vld [vmem:[#allocation8 + $0x48] sm:$0xff] }
 0x155   : > { %v1403_v47 = vpop.permute.xlu1 %1402  ;;  %v1398_v48 = vpop.permute.xlu0 %1397  ;;  %4470 = vmatprep.subr.bf16.mxu0 %v4469_v5 }
 0x156   : > { %2012 = vst.msk [vmem:[#allocation2 + $0x48] sm:$0xff] %vm2002_vm9, %v1979_v38  ;;  %2011 = vst.msk [vmem:[#allocation2 + $0x40] sm:$0xff] %vm2002_vm9, %v1978_v60  ;;  %2516 = vrot.lane.b32.xlu1 %v5390_v35, %s4850_s18  ;;  %v2448_v35 = vsel %vm1637_vm2, %v2418_v7, %v2419_v59  ;;  %v1520_v18 = vmul.f32 %v5307_v61, %v1403_v47  ;;  %v1519_v22 = vmul.f32 %v5307_v61, %v1398_v48 }
 0x157   : > { %2514 = vrot.lane.b32.xlu0 %v5388_v43, %s4850_s18  ;;  %v4473_v60 = vpack.c.bf16 %v2668_v10, %v2667_v34 }
 0x158   : > { %v1552_v27 = vadd.f32 %v1520_v18, %v1323_v32  ;;  %v1551_v42 = vadd.f32 %v1519_v22, %v1322_v33  ;;  %4472 = vmatpush3.bf16.msra.mxu0 %v4469_v5 }
 0x159   : > { %v1216_v55 = vpop.permute.xlu1 %1215  ;;  %v1211_v9 = vpop.permute.xlu0 %1210  ;;  %v2041_v14 = vld [vmem:[#allocation2 + $0x30] ss:$2 sm:$0xff]  ;;  %v2073_v37 = vld [vmem:[#allocation2 + $0x31] ss:$2 sm:$0xff]  ;;  %4474 = vmatprep.subr.bf16.mxu0 %v4473_v60 }
 0x15a   : > { %2580 = vrot.lane.b32.xlu1 %v2447_v13, %s4851_s19  ;;  %v2101_v4 = vmax.f32 %v2041_v14, %v2073_v37  ;;  %v1325_v47 = vmul.f32 %v5297_v56, %v1216_v55  ;;  %v1324_v48 = vmul.f32 %v5297_v56, %v1211_v9  ;;  %v2669_v14 = vld [vmem:[#allocation8 + $0x50] sm:$0xff]  ;;  %v2670_v37 = vld [vmem:[#allocation8 + $0x58] sm:$0xff] }
 0x15b   : > { %2578 = vrot.lane.b32.xlu0 %v2448_v35, %s4851_s19  ;;  %v4477_v17 = vpack.c.bf16 %v2670_v37, %v2669_v14 }
 0x15c   : > { %v2325_v21 = vrot.slane %v2101_v4, 7  ;;  %v2421_v6 = vrot.slane %v2101_v4, 1  ;;  %4476 = vmatpush3.bf16.msra.mxu0 %v4473_v60 }
 0x15d   : > { %v1413_v23 = vpop.permute.xlu1 %1412  ;;  %v1408_v24 = vpop.permute.xlu0 %1407  ;;  %v2043_v15 = vld [vmem:[#allocation2 + $0x40] ss:$2 sm:$0xff]  ;;  %v2075_v25 = vld [vmem:[#allocation2 + $0x41] ss:$2 sm:$0xff]  ;;  %4478 = vmatprep.subr.bf16.mxu0 %v4477_v17 }
 0x15e   : > { %2520 = vrot.lane.b32.xlu1 %v2101_v4, %s4850_s18  ;;  %v5479_v30 = vmax.f32 %v2043_v15, %v2075_v25  ;;  %v5488_v36 = vsel %vm1082_vm0, %v2324_v11, %v2325_v21  ;;  %v1522_v44 = vmul.f32 %v5307_v61, %v1413_v23  ;;  %v1521_v46 = vmul.f32 %v5307_v61, %v1408_v24 }
 0x15f   : > { %2518 = vrot.lane.b32.xlu0 %v5401_v63, %s4850_s18  ;;  %v2446_v11 = vsel %vm1637_vm2, %v2420_v49, %v2421_v6 }
 0x160   : > { %v2422_v40 = vrot.slane %v5479_v30, 1  ;;  %v2326_v41 = vrot.slane %v5479_v30, 7  ;;  %v1554_v2 = vadd.f32 %v1522_v44, %v1325_v47  ;;  %v1553_v55 = vadd.f32 %v1521_v46, %v1324_v48  ;;  %4480 = vmatpush3.bf16.msra.mxu0 %v4477_v17 }
 0x161   : > { %v1761_v63 = vpop.permute.xlu1 %1760  ;;  %v1756_v26 = vpop.permute.xlu0 %1755 }
 0x162   : > { %v1878_v0 = vmul.f32 %v5316_v12, %v1761_v63  ;;  %v1877_v52 = vmul.f32 %v5316_v12, %v1756_v26  ;;  %v2445_v38 = vsel %vm1637_vm2, %v2421_v6, %v2422_v40  ;;  %v5515_v51 = vsel %vm1082_vm0, %v2325_v21, %v2326_v41 }
 0x163   : > { %2582 = vrot.lane.b32.xlu0 %v2446_v11, %s4851_s19  ;;  %v2485_v49 = vsel %vm5490_vm11, 0.0, %v2445_v38 }
 0x164   : > { %v1910_v57 = vadd.f32 %v1878_v0, %v1552_v27  ;;  %v1909_v59 = vadd.f32 %v1877_v52, %v1551_v42  ;;  %2584 = vrot.lane.b32.xlu1 %v2485_v49, %s4851_s19 }
 0x165   : > { %v1771_v9 = vpop.permute.xlu1 %1770  ;;  %v1766_v13 = vpop.permute.xlu0 %1765 }
 0x166   : > { %v1949_v16 = vadd.f32 %v5332_v29, %v1910_v57  ;;  %v1948_v35 = vadd.f32 %v5332_v29, %v1909_v59  ;;  %v1880_v4 = vmul.f32 %v5316_v12, %v1771_v9  ;;  %v1879_v50 = vmul.f32 %v5316_v12, %v1766_v13 }
 0x167   : > { %2522 = vrot.lane.b32.xlu0 %v5479_v30, %s4850_s18 }
 0x168   : > { %v1981_v18 = vmax.f32 %v1949_v16, 0.0  ;;  %v1980_v20 = vmax.f32 %v1948_v35, 0.0  ;;  %v1912_v21 = vadd.f32 %v1880_v4, %v1554_v2  ;;  %v1911_v22 = vadd.f32 %v1879_v50, %v1553_v55 }
 0x169   : > { %v1226_v23 = vpop.permute.xlu1 %1225  ;;  %v1221_v24 = vpop.permute.xlu0 %1220 }
 0x16a   : > { %2014 = vst.msk [vmem:[#allocation2 + $0x58] sm:$0xff] %vm2002_vm9, %v1981_v18  ;;  %2013 = vst.msk [vmem:[#allocation2 + $0x50] sm:$0xff] %vm2002_vm9, %v1980_v20  ;;  %v1951_v6 = vadd.f32 %v5332_v29, %v1912_v21  ;;  %v1950_v15 = vadd.f32 %v5332_v29, %v1911_v22  ;;  %v1327_v60 = vmul.f32 %v5297_v56, %v1226_v23 }
 0x16b   : > { %v1326_v47 = vmul.f32 %v5297_v56, %v1221_v24 }
 0x16c   : > { %v1983_v25 = vmax.f32 %v1951_v6, 0.0  ;;  %v1982_v28 = vmax.f32 %v1950_v15, 0.0 }
 0x16d   : > { %v1236_v32 = vpop.permute.xlu1 %1235  ;;  %v1231_v31 = vpop.permute.xlu0 %1230 }
 0x16e   : > { %2016 = vst.msk [vmem:[#allocation2 + $0x68] sm:$0xff] %vm2002_vm9, %v1983_v25  ;;  %2015 = vst.msk [vmem:[#allocation2 + $0x60] sm:$0xff] %vm2002_vm9, %v1982_v28  ;;  %v1329_v16 = vmul.f32 %v5297_v56, %v1236_v32  ;;  %v1328_v35 = vmul.f32 %v5297_v56, %v1231_v31 }
 0x171   : > { %v1423_v33 = vpop.permute.xlu1 %1422  ;;  %v1418_v5 = vpop.permute.xlu0 %1417  ;;  %v2045_v27 = vld [vmem:[#allocation2 + $0x50] ss:$2 sm:$0xff]  ;;  %v2077_v62 = vld [vmem:[#allocation2 + $0x51] ss:$2 sm:$0xff] }
 0x172   : > { %v2103_v42 = vmax.f32 %v2045_v27, %v2077_v62  ;;  %v1524_v63 = vmul.f32 %v5307_v61, %v1423_v33  ;;  %v1523_v26 = vmul.f32 %v5307_v61, %v1418_v5 }
 0x174   : > { %2524 = vrot.lane.b32.xlu1 %v2103_v42, %s4850_s18  ;;  %v2423_v44 = vrot.slane %v2103_v42, 1  ;;  %v2327_v46 = vrot.slane %v2103_v42, 7  ;;  %v1556_v59 = vadd.f32 %v1524_v63, %v1327_v60 }
 0x175   : > { %v1433_v11 = vpop.permute.xlu1 %1432  ;;  %v1428_v34 = vpop.permute.xlu0 %1427  ;;  %v2047_v10 = vld [vmem:[#allocation2 + $0x60] ss:$2 sm:$0xff]  ;;  %v2079_v0 = vld [vmem:[#allocation2 + $0x61] ss:$2 sm:$0xff] }
 0x176   : > { %v2444_v52 = vsel %vm1637_vm2, %v2422_v40, %v2423_v44  ;;  %v5537_v38 = vmax.f32 %v2047_v10, %v2079_v0  ;;  %v5546_v48 = vsel %vm1082_vm0, %v2326_v41, %v2327_v46  ;;  %v1555_v40 = vadd.f32 %v1523_v26, %v1326_v47 }
 0x177   : > { %2586 = vrot.lane.b32.xlu0 %v2444_v52, %s4851_s19  ;;  %v1526_v2 = vmul.f32 %v5307_v61, %v1433_v11  ;;  %v1525_v55 = vmul.f32 %v5307_v61, %v1428_v34  ;;  %v2167_v52 = vand.u32 31, %v5177_v54 }
 0x178   : > { %v2424_v49 = vrot.slane %v5537_v38, 1  ;;  %v2328_v57 = vrot.slane %v5537_v38, 7 }
 0x179   : > { %v1781_v9 = vpop.permute.xlu1 %1780  ;;  %v1776_v13 = vpop.permute.xlu0 %1775  ;;  %v1558_v17 = vadd.f32 %v1526_v2, %v1329_v16  ;;  %v1557_v18 = vadd.f32 %v1525_v55, %v1328_v35  ;;  %vm5590_vm12 = vcmp.eq.s32.totalorder %v2167_v52, 31 }
 0x17a   : > { %v1882_v14 = vmul.f32 %v5316_v12, %v1781_v9  ;;  %v1881_v30 = vmul.f32 %v5316_v12, %v1776_v13  ;;  %v2443_v41 = vsel %vm1637_vm2, %v2423_v44, %v2424_v49  ;;  %v5558_v37 = vsel %vm1082_vm0, %v2327_v46, %v2328_v57 }
 0x17b   : > { %2526 = vrot.lane.b32.xlu0 %v5537_v38, %s4850_s18  ;;  %2588 = vrot.lane.b32.xlu1 %v2443_v41, %s4851_s19 }
 0x17c   : > { %v1914_v4 = vadd.f32 %v1882_v14, %v1556_v59  ;;  %v1913_v50 = vadd.f32 %v1881_v30, %v1555_v40 }
 0x17d   : > { %v1791_v20 = vpop.permute.xlu1 %1790  ;;  %v1786_v21 = vpop.permute.xlu0 %1785 }
 0x17e   : > { %v1953_v22 = vadd.f32 %v5332_v29, %v1914_v4  ;;  %v1952_v23 = vadd.f32 %v5332_v29, %v1913_v50  ;;  %v1884_v24 = vmul.f32 %v5316_v12, %v1791_v20  ;;  %v1883_v6 = vmul.f32 %v5316_v12, %v1786_v21 }
 0x180   : > { %v1985_v15 = vmax.f32 %v1953_v22, 0.0  ;;  %v1984_v25 = vmax.f32 %v1952_v23, 0.0  ;;  %v1916_v28 = vadd.f32 %v1884_v24, %v1558_v17  ;;  %v1915_v32 = vadd.f32 %v1883_v6, %v1557_v18 }
 0x181   : > { %v1246_v31 = vpop.permute.xlu1 %1245  ;;  %v1241_v33 = vpop.permute.xlu0 %1240 }
 0x182   : > { %2018 = vst.msk [vmem:[#allocation2 + $0x78] sm:$0xff] %vm2002_vm9, %v1985_v15  ;;  %2017 = vst.msk [vmem:[#allocation2 + $0x70] sm:$0xff] %vm2002_vm9, %v1984_v25  ;;  %v1955_v5 = vadd.f32 %v5332_v29, %v1916_v28  ;;  %v1954_v27 = vadd.f32 %v5332_v29, %v1915_v32  ;;  %v1331_v14 = vmul.f32 %v5297_v56, %v1246_v31 }
 0x183   : > { %v1330_v30 = vmul.f32 %v5297_v56, %v1241_v33 }
 0x184   : > { %v1987_v62 = vmax.f32 %v1955_v5, 0.0  ;;  %v1986_v42 = vmax.f32 %v1954_v27, 0.0 }
 0x185   : > { %v1443_v44 = vpop.permute.xlu1 %1442  ;;  %v1438_v46 = vpop.permute.xlu0 %1437 }
 0x186   : > { %2020 = vst.msk [vmem:[#allocation2 + $0x88] sm:$0xff] %vm2002_vm9, %v1987_v62  ;;  %2019 = vst.msk [vmem:[#allocation2 + $0x80] sm:$0xff] %vm2002_vm9, %v1986_v42  ;;  %v1528_v60 = vmul.f32 %v5307_v61, %v1443_v44  ;;  %v1527_v47 = vmul.f32 %v5307_v61, %v1438_v46 }
 0x188   : > { %v1560_v4 = vadd.f32 %v1528_v60, %v1331_v14  ;;  %v1559_v50 = vadd.f32 %v1527_v47, %v1330_v30 }
 0x189   : > { %v1256_v63 = vpop.permute.xlu1 %1255  ;;  %v1251_v26 = vpop.permute.xlu0 %1250  ;;  %v2049_v11 = vld [vmem:[#allocation2 + $0x70] ss:$2 sm:$0xff]  ;;  %v2081_v34 = vld [vmem:[#allocation2 + $0x71] ss:$2 sm:$0xff] }
 0x18a   : > { %v2105_v10 = vmax.f32 %v2049_v11, %v2081_v34  ;;  %v1333_v6 = vmul.f32 %v5297_v56, %v1256_v63  ;;  %v1332_v15 = vmul.f32 %v5297_v56, %v1251_v26 }
 0x18c   : > { %2528 = vrot.lane.b32.xlu1 %v2105_v10, %s4850_s18  ;;  %v2425_v0 = vrot.slane %v2105_v10, 1  ;;  %v2329_v38 = vrot.slane %v2105_v10, 7 }
 0x18d   : > { %v1453_v59 = vpop.permute.xlu1 %1452  ;;  %v1448_v40 = vpop.permute.xlu0 %1447  ;;  %v2051_v2 = vld [vmem:[#allocation2 + $0x80] ss:$2 sm:$0xff]  ;;  %v2083_v55 = vld [vmem:[#allocation2 + $0x81] ss:$2 sm:$0xff] }
 0x18e   : > { %v2442_v9 = vsel %vm1637_vm2, %v2424_v49, %v2425_v0  ;;  %v5581_v13 = vmax.f32 %v2051_v2, %v2083_v55  ;;  %v5588_v41 = vsel %vm1082_vm0, %v2328_v57, %v2329_v38  ;;  %v1530_v17 = vmul.f32 %v5307_v61, %v1453_v59 }
 0x18f   : > { %2590 = vrot.lane.b32.xlu0 %v2442_v9, %s4851_s19  ;;  %v1529_v18 = vmul.f32 %v5307_v61, %v1448_v40 }
 0x190   : > { %v2426_v35 = vrot.slane %v5581_v13, 1  ;;  %v2330_v49 = vrot.slane %v5581_v13, 7  ;;  %v1562_v31 = vadd.f32 %v1530_v17, %v1333_v6 }
 0x191   : > { %v1801_v20 = vpop.permute.xlu1 %1800  ;;  %v1796_v21 = vpop.permute.xlu0 %1795  ;;  %v1561_v33 = vadd.f32 %v1529_v18, %v1332_v15 }
 0x192   : > { %v1886_v22 = vmul.f32 %v5316_v12, %v1801_v20  ;;  %v1885_v57 = vmul.f32 %v5316_v12, %v1796_v21  ;;  %v2441_v23 = vsel %vm1637_vm2, %v2425_v0, %v2426_v35  ;;  %v5604_v24 = vsel %vm1082_vm0, %v2329_v38, %v2330_v49 }
 0x193   : > { %2530 = vrot.lane.b32.xlu0 %v5581_v13, %s4850_s18  ;;  %v2489_v25 = vsel %vm5590_vm12, 0.0, %v2441_v23 }
 0x194   : > { %v1918_v28 = vadd.f32 %v1886_v22, %v1560_v4  ;;  %v1917_v32 = vadd.f32 %v1885_v57, %v1559_v50  ;;  %2592 = vrot.lane.b32.xlu1 %v2489_v25, %s4851_s19 }
 0x195   : > { %v1811_v5 = vpop.permute.xlu1 %1810  ;;  %v1806_v27 = vpop.permute.xlu0 %1805 }
 0x196   : > { %v1957_v62 = vadd.f32 %v5332_v29, %v1918_v28  ;;  %v1956_v42 = vadd.f32 %v5332_v29, %v1917_v32  ;;  %v1888_v44 = vmul.f32 %v5316_v12, %v1811_v5  ;;  %v1887_v46 = vmul.f32 %v5316_v12, %v1806_v27 }
 0x198   : > { %v1989_v63 = vmax.f32 %v1957_v62, 0.0  ;;  %v1988_v26 = vmax.f32 %v1956_v42, 0.0  ;;  %v1920_v11 = vadd.f32 %v1888_v44, %v1562_v31  ;;  %v1919_v34 = vadd.f32 %v1887_v46, %v1561_v33 }
 0x199   : > { %v1266_v10 = vpop.permute.xlu1 %1265  ;;  %v1261_v0 = vpop.permute.xlu0 %1260 }
 0x19a   : > { %2022 = vst.msk [vmem:[#allocation2 + $0x98] sm:$0xff] %vm2002_vm9, %v1989_v63  ;;  %2021 = vst.msk [vmem:[#allocation2 + $0x90] sm:$0xff] %vm2002_vm9, %v1988_v26  ;;  %v1959_v52 = vadd.f32 %v5332_v29, %v1920_v11  ;;  %v1958_v38 = vadd.f32 %v5332_v29, %v1919_v34  ;;  %v1335_v23 = vmul.f32 %v5297_v56, %v1266_v10 }
 0x19b   : > { %v1334_v6 = vmul.f32 %v5297_v56, %v1261_v0 }
 0x19c   : > { %v1991_v60 = vmax.f32 %v1959_v52, 0.0  ;;  %v1990_v47 = vmax.f32 %v1958_v38, 0.0 }
 0x19d   : > { %v1276_v59 = vpop.permute.xlu1 %1275  ;;  %v1271_v40 = vpop.permute.xlu0 %1270 }
 0x19e   : > { %2024 = vst.msk [vmem:[#allocation2 + $0xa8] sm:$0xff] %vm2002_vm9, %v1991_v60  ;;  %2023 = vst.msk [vmem:[#allocation2 + $0xa0] sm:$0xff] %vm2002_vm9, %v1990_v47  ;;  %v1337_v46 = vmul.f32 %v5297_v56, %v1276_v59  ;;  %v1336_v63 = vmul.f32 %v5297_v56, %v1271_v40 }
 0x1a1   : > { %v1463_v2 = vpop.permute.xlu1 %1462  ;;  %v1458_v55 = vpop.permute.xlu0 %1457  ;;  %v2053_v9 = vld [vmem:[#allocation2 + $0x90] ss:$2 sm:$0xff]  ;;  %v2085_v13 = vld [vmem:[#allocation2 + $0x91] ss:$2 sm:$0xff] }
 0x1a2   : > { %v2107_v14 = vmax.f32 %v2053_v9, %v2085_v13  ;;  %v1532_v4 = vmul.f32 %v5307_v61, %v1463_v2  ;;  %v1531_v50 = vmul.f32 %v5307_v61, %v1458_v55 }
 0x1a4   : > { %2532 = vrot.lane.b32.xlu1 %v2107_v14, %s4850_s18  ;;  %v2427_v30 = vrot.slane %v2107_v14, 1  ;;  %v2331_v16 = vrot.slane %v2107_v14, 7  ;;  %v1564_v32 = vadd.f32 %v1532_v4, %v1335_v23  ;;  %v1563_v31 = vadd.f32 %v1531_v50, %v1334_v6 }
 0x1a5   : > { %v1473_v17 = vpop.permute.xlu1 %1472  ;;  %v1468_v18 = vpop.permute.xlu0 %1467  ;;  %v2055_v20 = vld [vmem:[#allocation2 + $0xa0] ss:$2 sm:$0xff]  ;;  %v2087_v21 = vld [vmem:[#allocation2 + $0xa1] ss:$2 sm:$0xff] }
 0x1a6   : > { %v2440_v22 = vsel %vm1637_vm2, %v2426_v35, %v2427_v30  ;;  %v5628_v57 = vmax.f32 %v2055_v20, %v2087_v21  ;;  %v5635_v15 = vsel %vm1082_vm0, %v2330_v49, %v2331_v16  ;;  %v1534_v35 = vmul.f32 %v5307_v61, %v1473_v17 }
 0x1a7   : > { %2594 = vrot.lane.b32.xlu0 %v2440_v22, %s4851_s19  ;;  %v1533_v33 = vmul.f32 %v5307_v61, %v1468_v18  ;;  %v613_v20 = vadd.s32 88, %v5107_v3 }
 0x1a8   : > { %v2428_v25 = vrot.slane %v5628_v57, 1  ;;  %v2332_v28 = vrot.slane %v5628_v57, 7  ;;  %v1566_v34 = vadd.f32 %v1534_v35, %v1337_v46 }
 0x1a9   : > { %v1821_v5 = vpop.permute.xlu1 %1820  ;;  %v1816_v27 = vpop.permute.xlu0 %1815  ;;  %v1565_v10 = vadd.f32 %v1533_v33, %v1336_v63 }
 0x1aa   : > { %v1890_v62 = vmul.f32 %v5316_v12, %v1821_v5  ;;  %v1889_v42 = vmul.f32 %v5316_v12, %v1816_v27  ;;  %v2439_v49 = vsel %vm1637_vm2, %v2427_v30, %v2428_v25  ;;  %v5647_v44 = vsel %vm1082_vm0, %v2331_v16, %v2332_v28 }
 0x1ab   : > { %2534 = vrot.lane.b32.xlu0 %v5628_v57, %s4850_s18  ;;  %2596 = vrot.lane.b32.xlu1 %v2439_v49, %s4851_s19 }
 0x1ac   : > { %v1922_v26 = vadd.f32 %v1890_v62, %v1564_v32  ;;  %v1921_v11 = vadd.f32 %v1889_v42, %v1563_v31  ;;  %v2195_v31 = vand.u32 31, %v613_v20 }
 0x1ad   : > { %v1831_v0 = vpop.permute.xlu1 %1830  ;;  %v1826_v52 = vpop.permute.xlu0 %1825 }
 0x1ae   : > { %v1961_v38 = vadd.f32 %v5332_v29, %v1922_v26  ;;  %v1960_v60 = vadd.f32 %v5332_v29, %v1921_v11  ;;  %v1892_v47 = vmul.f32 %v5316_v12, %v1831_v0  ;;  %v1891_v59 = vmul.f32 %v5316_v12, %v1826_v52 }
 0x1af   : > { %vm5678_vm13 = vcmp.eq.s32.totalorder %v2195_v31, 31 }
 0x1b0   : > { %v1993_v40 = vmax.f32 %v1961_v38, 0.0  ;;  %v1992_v2 = vmax.f32 %v1960_v60, 0.0  ;;  %v1924_v55 = vadd.f32 %v1892_v47, %v1566_v34  ;;  %v1923_v9 = vadd.f32 %v1891_v59, %v1565_v10 }
 0x1b1   : > { %v1286_v13 = vpop.permute.xlu1 %1285 }
 0x1b2   : > { %2026 = vst.msk [vmem:[#allocation2 + $0xb8] sm:$0xff] %vm2002_vm9, %v1993_v40  ;;  %2025 = vst.msk [vmem:[#allocation2 + $0xb0] sm:$0xff] %vm2002_vm9, %v1992_v2  ;;  %v1963_v14 = vadd.f32 %v5332_v29, %v1924_v55  ;;  %v1962_v30 = vadd.f32 %v5332_v29, %v1923_v9  ;;  %v1281_v16 = vpop.permute.xlu0 %1280  ;;  %v1339_v26 = vmul.f32 %v5297_v56, %v1286_v13  ;;  %v4678_v13 = vld [vmem:[#allocation4] ss:$0 sm:$0xff] }
 0x1b3   : > { %v1338_v0 = vmul.f32 %v5297_v56, %v1281_v16 }
 0x1b4   : > { %v1995_v4 = vmax.f32 %v1963_v14, 0.0  ;;  %v1994_v50 = vmax.f32 %v1962_v30, 0.0 }
 0x1b5   : > { %v1483_v17 = vpop.permute.xlu1 %1482 }
 0x1b6   : > { %2028 = vst.msk [vmem:[#allocation2 + $0xc8] sm:$0xff] %vm2002_vm9, %v1995_v4  ;;  %2027 = vst.msk [vmem:[#allocation2 + $0xc0] sm:$0xff] %vm2002_vm9, %v1994_v50  ;;  %v1478_v18 = vpop.permute.xlu0 %1477  ;;  %v1536_v33 = vmul.f32 %v5307_v61, %v1483_v17 }
 0x1b7   : > { %v1535_v11 = vmul.f32 %v5307_v61, %v1478_v18 }
 0x1b8   : > { %v1568_v52 = vadd.f32 %v1536_v33, %v1339_v26 }
 0x1b9   : > { %v1296_v21 = vpop.permute.xlu1 %1295  ;;  %v2057_v22 = vld [vmem:[#allocation2 + $0xb0] ss:$2 sm:$0xff]  ;;  %v2089_v57 = vld [vmem:[#allocation2 + $0xb1] ss:$2 sm:$0xff]  ;;  %v1567_v2 = vadd.f32 %v1535_v11, %v1338_v0 }
 0x1ba   : > { %v1291_v23 = vpop.permute.xlu0 %1290  ;;  %v2109_v6 = vmax.f32 %v2057_v22, %v2089_v57  ;;  %v1341_v14 = vmul.f32 %v4678_v13, %v1296_v21 }
 0x1bb   : > { %v1340_v16 = vmul.f32 %v4678_v13, %v1291_v23 }
 0x1bc   : > { %2536 = vrot.lane.b32.xlu1 %v2109_v6, %s4850_s18  ;;  %v2429_v32 = vrot.slane %v2109_v6, 1  ;;  %v2333_v35 = vrot.slane %v2109_v6, 7 }
 0x1bd   : > { %v1493_v5 = vpop.permute.xlu1 %1492  ;;  %v2059_v27 = vld [vmem:[#allocation2 + $0xc0] ss:$2 sm:$0xff]  ;;  %v2091_v62 = vld [vmem:[#allocation2 + $0xc1] ss:$2 sm:$0xff] }
 0x1be   : > { %v1488_v42 = vpop.permute.xlu0 %1487  ;;  %v2438_v49 = vsel %vm1637_vm2, %v2428_v25, %v2429_v32  ;;  %v5669_v46 = vmax.f32 %v2059_v27, %v2091_v62  ;;  %v5673_v63 = vsel %vm1082_vm0, %v2332_v28, %v2333_v35  ;;  %v1538_v28 = vmul.f32 %v5307_v61, %v1493_v5 }
 0x1bf   : > { %2598 = vrot.lane.b32.xlu0 %v2438_v49, %s4851_s19  ;;  %v1537_v56 = vmul.f32 %v5307_v61, %v1488_v42 }
 0x1c0   : > { %v2430_v10 = vrot.slane %v5669_v46, 1  ;;  %v2334_v25 = vrot.slane %v5669_v46, 7  ;;  %v1570_v17 = vadd.f32 %v1538_v28, %v1341_v14 }
 0x1c1   : > { %v1841_v38 = vpop.permute.xlu1 %1840  ;;  %v1569_v22 = vadd.f32 %v1537_v56, %v1340_v16 }
 0x1c2   : > { %v1894_v60 = vmul.f32 %v5316_v12, %v1841_v38  ;;  %v1836_v47 = vpop.permute.xlu0 %1835  ;;  %v2437_v59 = vsel %vm1637_vm2, %v2429_v32, %v2430_v10  ;;  %v5695_v40 = vsel %vm1082_vm0, %v2333_v35, %v2334_v25 }
 0x1c3   : > { %v1893_v55 = vmul.f32 %v5316_v12, %v1836_v47  ;;  %2538 = vrot.lane.b32.xlu0 %v5669_v46, %s4850_s18  ;;  %v2493_v9 = vsel %vm5678_vm13, 0.0, %v2437_v59 }
 0x1c4   : > { %v1926_v30 = vadd.f32 %v1894_v60, %v1568_v52  ;;  %2600 = vrot.lane.b32.xlu1 %v2493_v9, %s4851_s19  ;;  %v4680_v60 = vld [vmem:[#allocation4 + $0x2] ss:$0 sm:$0xff] }
 0x1c5   : > { %v1925_v4 = vadd.f32 %v1893_v55, %v1567_v2  ;;  %v1851_v50 = vpop.permute.xlu1 %1850 }
 0x1c6   : > { %v1965_v18 = vadd.f32 %v5332_v29, %v1926_v30  ;;  %v1896_v61 = vmul.f32 %v5316_v12, %v1851_v50  ;;  %v1846_v20 = vpop.permute.xlu0 %1845 }
 0x1c7   : > { %v1964_v57 = vadd.f32 %v5332_v29, %v1925_v4  ;;  %v1895_v6 = vmul.f32 %v5316_v12, %v1846_v20  ;;  %v4679_v12 = vld [vmem:[#allocation4 + $0x1] ss:$0 sm:$0xff] }
 0x1c8   : > { %v1997_v32 = vmax.f32 %v1965_v18, 0.0  ;;  %v1928_v31 = vadd.f32 %v1896_v61, %v1570_v17  ;;  %v4681_v17 = vld [vmem:[#allocation6] ss:$0 sm:$0xff] }
 0x1c9   : > { %v1996_v21 = vmax.f32 %v1964_v57, 0.0  ;;  %v1927_v35 = vadd.f32 %v1895_v6, %v1569_v22  ;;  %v1306_v33 = vpop.permute.xlu1 %1305 }
 0x1ca   : > { %2030 = vst.msk [vmem:[#allocation2 + $0xd8] sm:$0xff] %vm2002_vm9, %v1997_v32  ;;  %v1967_v23 = vadd.f32 %v5332_v29, %v1928_v31  ;;  %v1301_v5 = vpop.permute.xlu0 %1300  ;;  %v1343_v0 = vmul.f32 %v4678_v13, %v1306_v33 }
 0x1cb   : > { %2029 = vst.msk [vmem:[#allocation2 + $0xd0] sm:$0xff] %vm2002_vm9, %v1996_v21  ;;  %v1966_v27 = vadd.f32 %v5332_v29, %v1927_v35  ;;  %v1342_v52 = vmul.f32 %v4678_v13, %v1301_v5 }
 0x1cc   : > { %v1999_v62 = vmax.f32 %v1967_v23, 0.0 }
 0x1cd   : > { %v1998_v42 = vmax.f32 %v1966_v27, 0.0  ;;  %v1503_v49 = vpop.permute.xlu1 %1502 }
 0x1ce   : > { %2032 = vst.msk [vmem:[#allocation2 + $0xe8] sm:$0xff] %vm2002_vm9, %v1999_v62  ;;  %v1540_v26 = vmul.f32 %v4679_v12, %v1503_v49  ;;  %v1498_v11 = vpop.permute.xlu0 %1497  ;;  %v2118_v62 = vand.u32 31, %v5107_v3 }
 0x1cf   : > { %2031 = vst.msk [vmem:[#allocation2 + $0xe0] sm:$0xff] %vm2002_vm9, %v1998_v42  ;;  %v1539_v34 = vmul.f32 %v4679_v12, %v1498_v11 }
 0x1d0   : > { %v1572_v28 = vadd.f32 %v1540_v26, %v1343_v0  ;;  %v2223_v26 = vand.u32 31, %v5234_v45  ;;  %vm5741_vm14 = vcmp.eq.s32.totalorder %v2118_v62, 0  ;;  %v614_v0 = vadd.s32 96, %v5107_v3 }
 0x1d1   : > { %v1861_v38 = vpop.permute.xlu1 %1860  ;;  %v1571_v56 = vadd.f32 %v1539_v34, %v1342_v52  ;;  %v5739_v34 = vadd.s32 32, %v5107_v3 }
 0x1d2   : > { %v1898_v47 = vmul.f32 %v4680_v60, %v1861_v38  ;;  %v1856_v59 = vpop.permute.xlu0 %1855  ;;  %v2061_v2 = vld [vmem:[#allocation2 + $0xd0] ss:$2 sm:$0xff]  ;;  %v2093_v29 = vld [vmem:[#allocation2 + $0xd1] ss:$2 sm:$0xff]  ;;  %vm2417_vm15 = vcmp.eq.s32.totalorder %v2223_v26, 31 }
 0x1d3   : > { %v1897_v55 = vmul.f32 %v4680_v60, %v1856_v59  ;;  %v2111_v9 = vmax.f32 %v2061_v2, %v2093_v29  ;;  %v2146_v45 = vand.u32 31, %v5739_v34 }
 0x1d4   : > { %v1930_v14 = vadd.f32 %v1898_v47, %v1572_v28 }
 0x1d5   : > { %v1929_v30 = vadd.f32 %v1897_v55, %v1571_v56  ;;  %2540 = vrot.lane.b32.xlu1 %v2111_v9, %s4850_s18  ;;  %v2517_v16 = vpop.permute.xlu1 %2516  ;;  %v2431_v4 = vrot.slane %v2111_v9, 1  ;;  %v2335_v50 = vrot.slane %v2111_v9, 7  ;;  %vm2310_vm4 = vcmp.eq.s32.totalorder %v2146_v45, 0 }
 0x1d6   : > { %v1969_v18 = vadd.f32 %v4681_v17, %v1930_v14  ;;  %v2515_v13 = vpop.permute.xlu0 %2514  ;;  %v2063_v61 = vld [vmem:[#allocation2 + $0xe0] ss:$2 sm:$0xff]  ;;  %v2095_v20 = vld [vmem:[#allocation2 + $0xe1] ss:$2 sm:$0xff]  ;;  %v2627_v9 = vsel %vm2002_vm9, %v5414_v8, %v2517_v16  ;;  %v2390_v16 = vsel %vm2310_vm4, 0.0, %v5515_v51 }
 0x1d7   : > { %v1968_v22 = vadd.f32 %v4681_v17, %v1929_v30  ;;  %v2436_v57 = vsel %vm1637_vm2, %v2430_v10, %v2431_v4  ;;  %v2112_v6 = vmax.f32 %v2063_v61, %v2095_v20  ;;  %v5723_v32 = vsel %vm1082_vm0, %v2334_v25, %v2335_v50 }
 0x1d8   : > { %v2001_v31 = vmax.f32 %v1969_v18, 0.0  ;;  %2602 = vrot.lane.b32.xlu0 %v2436_v57, %s4851_s19 }
 0x1d9   : > { %v2000_v21 = vmax.f32 %v1968_v22, 0.0  ;;  %v2432_v35 = vrot.slane %v2112_v6, 1  ;;  %v2336_v33 = vrot.slane %v2112_v6, 7  ;;  %v2581_v23 = vpop.permute.xlu1 %2580 }
 0x1da   : > { %2034 = vst.msk [vmem:[#allocation2 + $0xf8] sm:$0xff] %vm2002_vm9, %v2001_v31  ;;  %v2579_v5 = vpop.permute.xlu0 %2578  ;;  %v2644_v43 = vsel %vm2642_vm1, %v2627_v9, %v2581_v23 }
 0x1db   : > { %2033 = vst.msk [vmem:[#allocation2 + $0xf0] sm:$0xff] %vm2002_vm9, %v2000_v21  ;;  %v2435_v10 = vsel %vm1637_vm2, %v2431_v4, %v2432_v35  ;;  %v5732_v46 = vsel %vm1082_vm0, %v2335_v50, %v2336_v33 }
 0x1dc   : > { %2542 = vrot.lane.b32.xlu0 %v2112_v6, %s4850_s18  ;;  %2604 = vrot.lane.b32.xlu1 %v2435_v10, %s4851_s19 }
 0x1dd   : > { %v2521_v27 = vpop.permute.xlu1 %2520 }
 0x1de   : > { %v2519_v25 = vpop.permute.xlu0 %2518  ;;  %v2629_v8 = vsel %vm2002_vm9, %v5488_v36, %v2521_v27 }
 0x1e1   : > { %v2585_v28 = vpop.permute.xlu1 %2584 }
 0x1e2   : > { %v2065_v42 = vld [vmem:[#allocation2 + $0xf0] ss:$2 sm:$0xff]  ;;  %v2097_v49 = vld [vmem:[#allocation2 + $0xf1] ss:$2 sm:$0xff]  ;;  %v2583_v12 = vpop.permute.xlu0 %2582  ;;  %v2646_v17 = vsel %vm2642_vm1, %v2629_v8, %v2585_v28 }
 0x1e3   : > { %v2113_v11 = vmax.f32 %v2065_v42, %v2097_v49  ;;  %v3203_v8 = vld [vmem:[#allocation9 + $0x18] sm:$0xff] }
 0x1e5   : > { %v2337_v52 = vrot.slane %v2113_v11, 7  ;;  %2544 = vrot.lane.b32.xlu1 %v2113_v11, %s4850_s18  ;;  %v2433_v38 = vrot.slane %v2113_v11, 1 }
 0x1e6   : > { %v2523_v47 = vpop.permute.xlu0 %2522  ;;  %v2525_v4 = vpop.permute.xlu1 %2524 }
 0x1e7   : > { %v2353_v60 = vsel %vm1082_vm0, %v2337_v52, %v2322_v58  ;;  %v2434_v59 = vsel %vm1637_vm2, %v2432_v35, %v2433_v38  ;;  %v2449_v29 = vsel %vm1637_vm2, %v2433_v38, %v2418_v7  ;;  %v5762_v58 = vsel %vm1082_vm0, %v2336_v33, %v2337_v52 }
 0x1e8   : > { %v2386_v2 = vsel %vm5741_vm14, 0.0, %v2353_v60  ;;  %2606 = vrot.lane.b32.xlu0 %v2434_v59, %s4851_s19  ;;  %v2497_v55 = vsel %vm2417_vm15, 0.0, %v2449_v29  ;;  %v2628_v7 = vsel %vm2002_vm9, %v5428_v19, %v2519_v25  ;;  %v2630_v19 = vsel %vm2002_vm9, %v2390_v16, %v2523_v47  ;;  %v3204_v16 = vld [vmem:[#allocation9 + $0x20] sm:$0xff] }
 0x1e9   : > { %v2626_v56 = vsel %vm2002_vm9, %v2386_v2, %v2515_v13  ;;  %2608 = vrot.lane.b32.xlu1 %v2497_v55, %s4851_s19  ;;  %v2645_v30 = vsel %vm2642_vm1, %v2628_v7, %v2583_v12  ;;  %v2631_v61 = vsel %vm2002_vm9, %v5546_v48, %v2525_v4  ;;  %v2174_v35 = vand.u32 31, %v5159_v39  ;;  %v3200_v7 = vld [vmem:[#allocation9] sm:$0xff] }
 0x1ea   : > { %v2643_v14 = vsel %vm2642_vm1, %v2626_v56, %v2579_v5  ;;  %v2587_v50 = vpop.permute.xlu0 %2586  ;;  %v2202_v52 = vand.u32 31, %v614_v0  ;;  %v5850_v0 = vadd.s32 8, %v5107_v3 }
 0x1eb   : > { %4361 = vmatprep.mubr.msk.f32.mxu0 %vm2678_vm3, %v2643_v14  ;;  %v2647_v18 = vsel %vm2642_vm1, %v2630_v19, %v2587_v50  ;;  %vm2314_vm5 = vcmp.eq.s32.totalorder %v2174_v35, 0  ;;  %v3202_v50 = vld [vmem:[#allocation9 + $0x10] sm:$0xff] }
 0x1ec   : > { %4362 = vmatmul.mubr.msk.f32.vlgmr.msra.gmra.mrb[0].mxu0 %vm2678_vm3, %v2644_v43  ;;  %vm2318_vm6 = vcmp.eq.s32.totalorder %v2202_v52, 0 }
 0x1ed   : > { %4364 = vmatprep.mubr.msk.f32.mxu0 %vm2678_vm3, %v2645_v30  ;;  %v2589_v13 = vpop.permute.xlu1 %2588  ;;  %v3201_v30 = vld [vmem:[#allocation9 + $0x8] sm:$0xff] }
 0x1ee   : > { %v2648_v20 = vsel %vm2642_vm1, %v2631_v61, %v2589_v13  ;;  %v2527_v36 = vpop.permute.xlu0 %2526  ;;  %v4481_v4 = vpack.c.bf16 %v3201_v30, %v3200_v7 }
 0x1ef   : > { %v2632_v51 = vsel %vm2002_vm9, %v5558_v37, %v2527_v36  ;;  %v2394_v37 = vsel %vm2314_vm5, 0.0, %v5604_v24  ;;  %v3206_v36 = vld [vmem:[#allocation9 + $0x30] sm:$0xff] }
 0x1f0   : > { %4365 = vmatmul.mubr.msk.f32.gmra.mrb[2].mxu0 %vm2678_vm3, %v2646_v17  ;;  %4482 = vmatprep.subr.bf16.mxu1 %v4481_v4  ;;  %v3205_v17 = vld [vmem:[#allocation9 + $0x28] sm:$0xff] }
 0x1f1   : > { %4367 = vmatprep.mubr.msk.f32.mxu0 %vm2678_vm3, %v2647_v18  ;;  %4484 = vmatpush3.bf16.msra.mxu1 %v4481_v4  ;;  %v4489_v19 = vpack.c.bf16 %v3205_v17, %v3204_v16 }
 0x1f4   : > { %4368 = vmatmul.mubr.msk.f32.gmra.mrb[4].mxu0 %vm2678_vm3, %v2648_v20 }
 0x1fe   : > { %v2529_v57 = vpop.permute.xlu1 %2528 }
 0x1ff   : > { %v2633_v31 = vsel %vm2002_vm9, %v5588_v41, %v2529_v57 }
 0x201   : > { %v2591_v22 = vpop.permute.xlu0 %2590 }
 0x202   : > { %v2649_v6 = vsel %vm2642_vm1, %v2632_v51, %v2591_v22  ;;  %v3207_v51 = vld [vmem:[#allocation9 + $0x38] sm:$0xff] }
 0x203   : > { %4370 = vmatprep.mubr.msk.f32.mxu0 %vm2678_vm3, %v2649_v6  ;;  %v4493_v57 = vpack.c.bf16 %v3207_v51, %v3206_v36 }
 0x205   : > { %v2531_v33 = vpop.permute.xlu0 %2530 }
 0x206   : > { %v2593_v21 = vpop.permute.xlu1 %2592  ;;  %v2634_v23 = vsel %vm2002_vm9, %v2394_v37, %v2531_v33  ;;  %v3208_v33 = vld [vmem:[#allocation9 + $0x40] sm:$0xff]  ;;  %v3209_v37 = vld [vmem:[#allocation9 + $0x48] sm:$0xff] }
 0x207   : > { %v2650_v48 = vsel %vm2642_vm1, %v2633_v31, %v2593_v21 }
 0x208   : > { %4371 = vmatmul.mubr.msk.f32.gmra.mrb[6].mxu0 %vm2678_vm3, %v2650_v48 }
 0x216   : > { %v2533_v5 = vpop.permute.xlu1 %2532 }
 0x217   : > { %v2635_v41 = vsel %vm2002_vm9, %v5635_v15, %v2533_v5  ;;  %v4497_v5 = vpack.c.bf16 %v3209_v37, %v3208_v33 }
 0x219   : > { %v2595_v10 = vpop.permute.xlu0 %2594 }
 0x21a   : > { %v2651_v25 = vsel %vm2642_vm1, %v2634_v23, %v2595_v10 }
 0x21b   : > { %4373 = vmatprep.mubr.msk.f32.mxu0 %vm2678_vm3, %v2651_v25 }
 0x21d   : > { %v2597_v27 = vpop.permute.xlu1 %2596  ;;  %v2535_v39 = vpop.permute.xlu0 %2534 }
 0x21e   : > { %v2652_v62 = vsel %vm2642_vm1, %v2635_v41, %v2597_v27  ;;  %v2636_v24 = vsel %vm2002_vm9, %v5647_v44, %v2535_v39  ;;  %v2398_v44 = vsel %vm2318_vm6, 0.0, %v5695_v40  ;;  %v3210_v39 = vld [vmem:[#allocation9 + $0x50] sm:$0xff] }
 0x21f   : > { %4374 = vmatmul.mubr.msk.f32.gmra.mrb[8].mxu0 %vm2678_vm3, %v2652_v62 }
 0x22e   : > { %v2537_v49 = vpop.permute.xlu1 %2536 }
 0x22f   : > { %v2637_v26 = vsel %vm2002_vm9, %v5673_v63, %v2537_v49 }
 0x231   : > { %v2599_v42 = vpop.permute.xlu0 %2598 }
 0x232   : > { %v2653_v12 = vsel %vm2642_vm1, %v2636_v24, %v2599_v42  ;;  %v3211_v24 = vld [vmem:[#allocation9 + $0x58] sm:$0xff] }
 0x233   : > { %4376 = vmatprep.mubr.msk.f32.mxu0 %vm2678_vm3, %v2653_v12  ;;  %v4501_v49 = vpack.c.bf16 %v3211_v24, %v3210_v39 }
 0x235   : > { %v2539_v38 = vpop.permute.xlu0 %2538 }
 0x236   : > { %v2601_v11 = vpop.permute.xlu1 %2600  ;;  %v2638_v28 = vsel %vm2002_vm9, %v2398_v44, %v2539_v38 }
 0x237   : > { %v2654_v15 = vsel %vm2642_vm1, %v2637_v26, %v2601_v11 }
 0x238   : > { %4377 = vmatmul.mubr.msk.f32.gmra.mrb[10].mxu0 %vm2678_vm3, %v2654_v15 }
 0x247   : > { %v2541_v60 = vpop.permute.xlu1 %2540 }
 0x248   : > { %v2639_v63 = vsel %vm2002_vm9, %v5723_v32, %v2541_v60 }
 0x24a   : > { %v2603_v45 = vpop.permute.xlu0 %2602 }
 0x24b   : > { %v2655_v47 = vsel %vm2642_vm1, %v2638_v28, %v2603_v45  ;;  %v2939_v28 = vand.u32 15, %v5850_v0 }
 0x24c   : > { %4379 = vmatprep.mubr.msk.f32.mxu0 %vm2678_vm3, %v2655_v47 }
 0x24d   : > { %vm3073_vm7 = vcmp.eq.s32.totalorder %v2939_v28, 15 }
 0x24e   : > { %v2605_v59 = vpop.permute.xlu1 %2604  ;;  %v2543_v29 = vpop.permute.xlu0 %2542 }
 0x24f   : > { %v2656_v2 = vsel %vm2642_vm1, %v2639_v63, %v2605_v59  ;;  %v2640_v40 = vsel %vm2002_vm9, %v5732_v46, %v2543_v29  ;;  %v4485_v46 = vpack.c.bf16 %v3203_v8, %v3202_v50 }
 0x250   : > { %4380 = vmatmul.mubr.msk.f32.gmra.mrb[12].mxu0 %vm2678_vm3, %v2656_v2 }
 0x251   : > { %4486 = vmatprep.subr.bf16.mxu1 %v4485_v46 }
 0x252   : > { %4488 = vmatpush3.bf16.msra.mxu1 %v4485_v46 }
 0x253   : > { %4490 = vmatprep.subr.bf16.mxu1 %v4489_v19 }
 0x256   : > { %4492 = vmatpush3.bf16.msra.mxu1 %v4489_v19 }
 0x257   : > { %v2545_v56 = vpop.permute.xlu1 %2544  ;;  %4494 = vmatprep.subr.bf16.mxu1 %v4493_v57 }
 0x258   : > { %v2641_v14 = vsel %vm2002_vm9, %v5762_v58, %v2545_v56  ;;  %v5833_v58 = vld [vmem:[%s6280_s4] ss:$0 sm:$0xff] }
 0x25a   : > { %v2607_v55 = vpop.permute.xlu0 %2606  ;;  %4496 = vmatpush3.bf16.msra.mxu1 %v4493_v57 }
 0x25b   : > { %v2657_v9 = vsel %vm2642_vm1, %v2640_v40, %v2607_v55  ;;  %v2609_v43 = vpop.permute.xlu1 %2608  ;;  %4498 = vmatprep.subr.bf16.mxu1 %v4497_v5 }
 0x25c   : > { %4382 = vmatprep.mubr.msk.f32.mxu0 %vm2678_vm3, %v2657_v9  ;;  %v2658_v32 = vsel %vm2642_vm1, %v2641_v14, %v2609_v43 }
 0x25d   : > { %4383 = vmatmul.mubr.msk.f32.gmra.mrb[14].mxu0 %vm2678_vm3, %v2658_v32 }
 0x25e   : > { %4500 = vmatpush3.bf16.msra.mxu1 %v4497_v5 }
 0x25f   : > { %4502 = vmatprep.subr.bf16.mxu1 %v4501_v49 }
 0x262   : > { %4504 = vmatpush3.bf16.msra.mxu1 %v4501_v49 }
 0x2bf   : > { %v4363_v18 = vpop.f32.mrb[0].mxu0 }
 0x2c0   : > { %v2799_v13 = vadd.f32 %v4363_v18, %v5833_v58  ;;  %v2793_v61 = vpop.f32.mrb[1].mxu0 }
 0x2c1   : > { %v2794_v20 = vadd.f32 %v5833_v58, %v2793_v61 }
 0x2c2   : > { %v2873_v22 = vmax.f32 %v2799_v13, 0.0 }
 0x2c3   : > { %v2872_v6 = vmax.f32 %v2794_v20, 0.0  ;;  %v4366_v31 = vpop.f32.mrb[2].mxu0 }
 0x2c4   : > { %2889 = vst.msk [vmem:[#allocation2 + $0x8] sm:$0xff] %vm2002_vm9, %v2873_v22  ;;  %v2809_v21 = vadd.f32 %v4366_v31, %v5833_v58  ;;  %v2803_v48 = vpop.f32.mrb[3].mxu0 }
 0x2c5   : > { %2888 = vst.msk [vmem:[#allocation2] sm:$0xff] %vm2002_vm9, %v2872_v6  ;;  %v2804_v35 = vadd.f32 %v5833_v58, %v2803_v48 }
 0x2c6   : > { %v2875_v23 = vmax.f32 %v2809_v21, 0.0  ;;  %v2953_v21 = vand.u32 15, %v5464_v53 }
 0x2c7   : > { %v2874_v10 = vmax.f32 %v2804_v35, 0.0  ;;  %v4369_v25 = vpop.f32.mrb[4].mxu0 }
 0x2c8   : > { %2891 = vst.msk [vmem:[#allocation2 + $0x18] sm:$0xff] %vm2002_vm9, %v2875_v23  ;;  %v2819_v41 = vadd.f32 %v4369_v25, %v5833_v58  ;;  %v2813_v27 = vpop.f32.mrb[5].mxu0  ;;  %vm3075_vm8 = vcmp.eq.s32.totalorder %v2953_v21, 15 }
 0x2c9   : > { %2890 = vst.msk [vmem:[#allocation2 + $0x10] sm:$0xff] %vm2002_vm9, %v2874_v10  ;;  %v2814_v62 = vadd.f32 %v5833_v58, %v2813_v27 }
 0x2ca   : > { %v2877_v42 = vmax.f32 %v2819_v41, 0.0 }
 0x2cb   : > { %v2876_v12 = vmax.f32 %v2814_v62, 0.0 }
 0x2cc   : > { %2893 = vst.msk [vmem:[#allocation2 + $0x28] sm:$0xff] %vm2002_vm9, %v2877_v42  ;;  %v2904_v26 = vld [vmem:[#allocation2] ss:$2 sm:$0xff]  ;;  %v2912_v11 = vld [vmem:[#allocation2 + $0x1] ss:$2 sm:$0xff] }
 0x2cd   : > { %2892 = vst.msk [vmem:[#allocation2 + $0x20] sm:$0xff] %vm2002_vm9, %v2876_v12  ;;  %v5847_v15 = vmax.f32 %v2904_v26, %v2912_v11 }
 0x2cf   : > { %3128 = vrot.lane.b32.xlu0 %v5847_v15, %s4850_s18  ;;  %v3080_v60 = vrot.slane %v5847_v15, 1  ;;  %v3032_v47 = vrot.slane %v5847_v15, 7 }
 0x2d0   : > { %v2905_v52 = vld [vmem:[#allocation2 + $0x10] ss:$2 sm:$0xff]  ;;  %v2913_v38 = vld [vmem:[#allocation2 + $0x11] ss:$2 sm:$0xff] }
 0x2d1   : > { %v2921_v44 = vmax.f32 %v2905_v52, %v2913_v38 }
 0x2d3   : > { %3130 = vrot.lane.b32.xlu1 %v2921_v44, %s4850_s18  ;;  %v3081_v45 = vrot.slane %v2921_v44, 1  ;;  %v3033_v63 = vrot.slane %v2921_v44, 7 }
 0x2d4   : > { %v2906_v59 = vld [vmem:[#allocation2 + $0x20] ss:$2 sm:$0xff]  ;;  %v2914_v2 = vld [vmem:[#allocation2 + $0x21] ss:$2 sm:$0xff] }
 0x2d5   : > { %v3094_v29 = vsel %vm1637_vm2, %v3080_v60, %v3081_v45  ;;  %v2922_v56 = vmax.f32 %v2906_v59, %v2914_v2  ;;  %v5866_v40 = vsel %vm1082_vm0, %v3032_v47, %v3033_v63 }
 0x2d6   : > { %3160 = vrot.lane.b32.xlu0 %v3094_v29, %s4851_s19 }
 0x2d7   : > { %v3082_v55 = vrot.slane %v2922_v56, 1  ;;  %v3034_v9 = vrot.slane %v2922_v56, 7 }
 0x2d9   : > { %v3093_v14 = vsel %vm1637_vm2, %v3081_v45, %v3082_v55  ;;  %v5873_v43 = vsel %vm1082_vm0, %v3033_v63, %v3034_v9 }
 0x2da   : > { %3132 = vrot.lane.b32.xlu0 %v2922_v56, %s4850_s18  ;;  %v3113_v32 = vsel %vm3073_vm7, 0.0, %v3093_v14  ;;  %v607_v56 = vadd.s32 40, %v5107_v3 }
 0x2db   : > { %3162 = vrot.lane.b32.xlu1 %v3113_v32, %s4851_s19  ;;  %v4372_v7 = vpop.f32.mrb[6].mxu0 }
 0x2dc   : > { %v2829_v30 = vadd.f32 %v4372_v7, %v5833_v58  ;;  %v2823_v4 = vpop.f32.mrb[7].mxu0 }
 0x2dd   : > { %v2824_v50 = vadd.f32 %v5833_v58, %v2823_v4 }
 0x2de   : > { %v2879_v8 = vmax.f32 %v2829_v30, 0.0 }
 0x2df   : > { %v2878_v16 = vmax.f32 %v2824_v50, 0.0 }
 0x2e0   : > { %2895 = vst.msk [vmem:[#allocation2 + $0x38] sm:$0xff] %vm2002_vm9, %v2879_v8 }
 0x2e1   : > { %2894 = vst.msk [vmem:[#allocation2 + $0x30] sm:$0xff] %vm2002_vm9, %v2878_v16 }
 0x2e8   : > { %v2907_v46 = vld [vmem:[#allocation2 + $0x30] ss:$2 sm:$0xff]  ;;  %v2915_v17 = vld [vmem:[#allocation2 + $0x31] ss:$2 sm:$0xff] }
 0x2e9   : > { %v2923_v19 = vmax.f32 %v2907_v46, %v2915_v17 }
 0x2eb   : > { %3134 = vrot.lane.b32.xlu1 %v2923_v19, %s4850_s18  ;;  %v3083_v18 = vrot.slane %v2923_v19, 1  ;;  %v3035_v13 = vrot.slane %v2923_v19, 7 }
 0x2ed   : > { %v3092_v61 = vsel %vm1637_vm2, %v3082_v55, %v3083_v18  ;;  %v5886_v20 = vsel %vm1082_vm0, %v3034_v9, %v3035_v13  ;;  %v2967_v55 = vand.u32 15, %v607_v56  ;;  %v608_v56 = vadd.s32 48, %v5107_v3 }
 0x2ee   : > { %3164 = vrot.lane.b32.xlu0 %v3092_v61, %s4851_s19 }
 0x2ef   : > { %vm3077_vm10 = vcmp.eq.s32.totalorder %v2967_v55, 15  ;;  %v2974_v55 = vand.u32 15, %v608_v56 }
 0x2f1   : > { %vm3030_vm15 = vcmp.eq.s32.totalorder %v2974_v55, 0 }
 0x2f2   : > { %v4375_v36 = vpop.f32.mrb[8].mxu0 }
 0x2f3   : > { %v2839_v51 = vadd.f32 %v4375_v36, %v5833_v58  ;;  %v2833_v22 = vpop.f32.mrb[9].mxu0 }
 0x2f4   : > { %v2834_v57 = vadd.f32 %v5833_v58, %v2833_v22 }
 0x2f5   : > { %v2881_v6 = vmax.f32 %v2839_v51, 0.0  ;;  %v2932_v51 = vand.u32 15, %v5107_v3 }
 0x2f6   : > { %v2880_v31 = vmax.f32 %v2834_v57, 0.0 }
 0x2f7   : > { %2897 = vst.msk [vmem:[#allocation2 + $0x48] sm:$0xff] %vm2002_vm9, %v2881_v6  ;;  %vm3024_vm12 = vcmp.eq.s32.totalorder %v2932_v51, 0  ;;  %v3487_v51 = vld [vmem:[#allocation11 + $0x18] sm:$0xff] }
 0x2f8   : > { %2896 = vst.msk [vmem:[#allocation2 + $0x40] sm:$0xff] %vm2002_vm9, %v2880_v31 }
 0x2ff   : > { %v2908_v48 = vld [vmem:[#allocation2 + $0x40] ss:$2 sm:$0xff]  ;;  %v2916_v35 = vld [vmem:[#allocation2 + $0x41] ss:$2 sm:$0xff] }
 0x300   : > { %v2924_v33 = vmax.f32 %v2908_v48, %v2916_v35 }
 0x302   : > { %3136 = vrot.lane.b32.xlu0 %v2924_v33, %s4850_s18  ;;  %v3084_v37 = vrot.slane %v2924_v33, 1  ;;  %v3036_v23 = vrot.slane %v2924_v33, 7 }
 0x304   : > { %v3091_v5 = vsel %vm1637_vm2, %v3083_v18, %v3084_v37  ;;  %v5899_v10 = vsel %vm1082_vm0, %v3035_v13, %v3036_v23 }
 0x305   : > { %v3115_v25 = vsel %vm3075_vm8, 0.0, %v3091_v5 }
 0x306   : > { %3166 = vrot.lane.b32.xlu1 %v3115_v25, %s4851_s19 }
 0x30b   : > { %v4378_v41 = vpop.f32.mrb[10].mxu0 }
 0x30c   : > { %v2849_v27 = vadd.f32 %v4378_v41, %v5833_v58  ;;  %v2843_v62 = vpop.f32.mrb[11].mxu0 }
 0x30d   : > { %v2844_v39 = vadd.f32 %v5833_v58, %v2843_v62 }
 0x30e   : > { %v2883_v24 = vmax.f32 %v2849_v27, 0.0  ;;  %v5956_v27 = vadd.s32 16, %v5107_v3 }
 0x30f   : > { %v2882_v42 = vmax.f32 %v2844_v39, 0.0 }
 0x310   : > { %2899 = vst.msk [vmem:[#allocation2 + $0x58] sm:$0xff] %vm2002_vm9, %v2883_v24  ;;  %v2946_v62 = vand.u32 15, %v5956_v27 }
 0x311   : > { %2898 = vst.msk [vmem:[#allocation2 + $0x50] sm:$0xff] %vm2002_vm9, %v2882_v42 }
 0x312   : > { %vm3026_vm13 = vcmp.eq.s32.totalorder %v2946_v62, 0 }
 0x313   : > { %v3066_v24 = vsel %vm3026_vm13, 0.0, %v5873_v43 }
 0x318   : > { %v2909_v49 = vld [vmem:[#allocation2 + $0x50] ss:$2 sm:$0xff]  ;;  %v2917_v12 = vld [vmem:[#allocation2 + $0x51] ss:$2 sm:$0xff] }
 0x319   : > { %v2925_v26 = vmax.f32 %v2909_v49, %v2917_v12 }
 0x31b   : > { %3138 = vrot.lane.b32.xlu1 %v2925_v26, %s4850_s18  ;;  %v3085_v11 = vrot.slane %v2925_v26, 1  ;;  %v3037_v52 = vrot.slane %v2925_v26, 7 }
 0x31d   : > { %v3090_v38 = vsel %vm1637_vm2, %v3084_v37, %v3085_v11  ;;  %v5911_v44 = vsel %vm1082_vm0, %v3036_v23, %v3037_v52 }
 0x31e   : > { %3168 = vrot.lane.b32.xlu0 %v3090_v38, %s4851_s19  ;;  %v2960_v38 = vand.u32 15, %v5739_v34 }
 0x320   : > { %vm3028_vm14 = vcmp.eq.s32.totalorder %v2960_v38, 0 }
 0x323   : > { %v4381_v28 = vpop.f32.mrb[12].mxu0 }
 0x324   : > { %v2859_v45 = vadd.f32 %v4381_v28, %v5833_v58  ;;  %v2853_v63 = vpop.f32.mrb[13].mxu0  ;;  %v3068_v28 = vsel %vm3028_vm14, 0.0, %v5899_v10 }
 0x325   : > { %v2854_v59 = vadd.f32 %v5833_v58, %v2853_v63 }
 0x326   : > { %v2885_v2 = vmax.f32 %v2859_v45, 0.0 }
 0x327   : > { %v2884_v29 = vmax.f32 %v2854_v59, 0.0 }
 0x328   : > { %2901 = vst.msk [vmem:[#allocation2 + $0x68] sm:$0xff] %vm2002_vm9, %v2885_v2 }
 0x329   : > { %2900 = vst.msk [vmem:[#allocation2 + $0x60] sm:$0xff] %vm2002_vm9, %v2884_v29 }
 0x330   : > { %v2910_v9 = vld [vmem:[#allocation2 + $0x60] ss:$2 sm:$0xff]  ;;  %v2918_v14 = vld [vmem:[#allocation2 + $0x61] ss:$2 sm:$0xff]  ;;  %v4384_v32 = vpop.f32.mrb[14].mxu0 }
 0x331   : > { %v2926_v7 = vmax.f32 %v2910_v9, %v2918_v14  ;;  %v2869_v30 = vadd.f32 %v4384_v32, %v5833_v58  ;;  %v2863_v4 = vpop.f32.mrb[15].mxu0 }
 0x332   : > { %v2864_v50 = vadd.f32 %v5833_v58, %v2863_v4  ;;  %v2981_v58 = vand.u32 15, %v5177_v54 }
 0x333   : > { %3140 = vrot.lane.b32.xlu0 %v2926_v7, %s4850_s18  ;;  %v3086_v8 = vrot.slane %v2926_v7, 1  ;;  %v3038_v16 = vrot.slane %v2926_v7, 7  ;;  %v2887_v46 = vmax.f32 %v2869_v30, 0.0 }
 0x334   : > { %v2886_v17 = vmax.f32 %v2864_v50, 0.0  ;;  %vm3079_vm11 = vcmp.eq.s32.totalorder %v2981_v58, 15  ;;  %v3485_v58 = vld [vmem:[#allocation11 + $0x8] sm:$0xff] }
 0x335   : > { %v3089_v19 = vsel %vm1637_vm2, %v3085_v11, %v3086_v8  ;;  %v5926_v18 = vsel %vm1082_vm0, %v3037_v52, %v3038_v16  ;;  %2903 = vst.msk [vmem:[#allocation2 + $0x78] sm:$0xff] %vm2002_vm9, %v2887_v46  ;;  %v3378_v46 = vld [vmem:[%s6283_s7 + $0x10] sm:$0xff] }
 0x336   : > { %v3117_v13 = vsel %vm3077_vm10, 0.0, %v3089_v19  ;;  %2902 = vst.msk [vmem:[#allocation2 + $0x70] sm:$0xff] %vm2002_vm9, %v2886_v17  ;;  %v3070_v14 = vsel %vm3030_vm15, 0.0, %v5926_v18  ;;  %v3379_v19 = vld [vmem:[%s6283_s7 + $0x18] sm:$0xff] }
 0x337   : > { %3170 = vrot.lane.b32.xlu1 %v3117_v13, %s4851_s19  ;;  %v4509_v18 = vpack.c.bf16 %v3379_v19, %v3378_v46  ;;  %v3484_v13 = vld [vmem:[#allocation11] sm:$0xff]  ;;  %v3603_v46 = vld [vmem:[%s6287_s11 + $0x38] sm:$0xff] }
 0x33d   : > { %v2911_v61 = vld [vmem:[#allocation2 + $0x70] ss:$2 sm:$0xff]  ;;  %v2919_v36 = vld [vmem:[#allocation2 + $0x71] ss:$2 sm:$0xff] }
 0x33e   : > { %v2927_v22 = vmax.f32 %v2911_v61, %v2919_v36  ;;  %v3486_v61 = vld [vmem:[#allocation11 + $0x10] sm:$0xff]  ;;  %v4513_v36 = vpack.c.bf16 %v3485_v58, %v3484_v13  ;;  %v3605_v58 = vld [vmem:[%s6287_s11 + $0x48] sm:$0xff] }
 0x33f   : > { %v3602_v13 = vld [vmem:[%s6287_s11 + $0x30] sm:$0xff] }
 0x340   : > { %3142 = vrot.lane.b32.xlu1 %v2927_v22, %s4850_s18  ;;  %v3039_v57 = vrot.slane %v2927_v22, 7  ;;  %v3087_v6 = vrot.slane %v2927_v22, 1  ;;  %v4517_v22 = vpack.c.bf16 %v3487_v51, %v3486_v61  ;;  %4514 = vmatprep.subr.bf16.mxu0 %v4513_v36  ;;  %v3607_v61 = vld [vmem:[%s6287_s11 + $0x58] sm:$0xff] }
 0x341   : > { %v3129_v35 = vpop.permute.xlu0 %3128  ;;  %4516 = vmatpush3.bf16.msra.mxu0 %v4513_v36  ;;  %v4537_v51 = vpack.c.bf16 %v3607_v61, %v3605_v58  ;;  %v3750_v58 = vld [vmem:[%s6289_s13 + $0xa8] sm:$0xff] }
 0x342   : > { %v3047_v31 = vsel %vm1082_vm0, %v3039_v57, %v3032_v47  ;;  %v3088_v21 = vsel %vm1637_vm2, %v3086_v8, %v3087_v6  ;;  %v3095_v54 = vsel %vm1637_vm2, %v3087_v6, %v3080_v60  ;;  %v3040_v48 = vsel %vm1082_vm0, %v3038_v16, %v3039_v57  ;;  %v3376_v8 = vld [vmem:[%s6283_s7] sm:$0xff]  ;;  %v3377_v16 = vld [vmem:[%s6283_s7 + $0x8] sm:$0xff]  ;;  %4518 = vmatprep.subr.bf16.mxu0 %v4517_v22 }
 0x343   : > { %3172 = vrot.lane.b32.xlu0 %v3088_v21, %s4851_s19  ;;  %v3119_v33 = vsel %vm3079_vm11, 0.0, %v3095_v54  ;;  %v3064_v37 = vsel %vm3024_vm12, 0.0, %v3047_v31  ;;  %v4505_v17 = vpack.c.bf16 %v3377_v16, %v3376_v8  ;;  %v3488_v57 = vld [vmem:[#allocation11 + $0x20] sm:$0xff]  ;;  %v3489_v6 = vld [vmem:[#allocation11 + $0x28] sm:$0xff]  ;;  %v4199_v31 = vld [vmem:[%s6282_s6] ss:$0 sm:$0xff] }
 0x344   : > { %3174 = vrot.lane.b32.xlu1 %v3119_v33, %s4851_s19  ;;  %v3184_v47 = vsel %vm2002_vm9, %v3064_v37, %v3129_v35  ;;  %v4521_v21 = vpack.c.bf16 %v3489_v6, %v3488_v57  ;;  %v3598_v8 = vld [vmem:[%s6287_s11 + $0x10] sm:$0xff]  ;;  %v3601_v16 = vld [vmem:[%s6287_s11 + $0x28] sm:$0xff]  ;;  %s6323_s19 = sld [smem:[#allocation17_spill]] }
 0x345   : > { %v3131_v5 = vpop.permute.xlu1 %3130  ;;  %4506 = vmatprep.subr.bf16.mxu1 %v4505_v17  ;;  %4520 = vmatpush3.bf16.msra.mxu0 %v4517_v22  ;;  %v4533_v19 = vpack.c.bf16 %v3603_v46, %v3601_v16  ;;  %v3604_v22 = vld [vmem:[%s6287_s11 + $0x40] sm:$0xff]  ;;  %v3606_v57 = vld [vmem:[%s6287_s11 + $0x50] sm:$0xff]  ;;  %v3609_v6 = vld [vmem:[%s6287_s11 + $0x68] sm:$0xff] }
 0x346   : > { %v3185_v15 = vsel %vm2002_vm9, %v5866_v40, %v3131_v5  ;;  %4522 = vmatprep.subr.bf16.mxu0 %v4521_v21  ;;  %v3748_v16 = vld [vmem:[%s6289_s13 + $0x98] sm:$0xff] }
 0x348   : > { %v3161_v23 = vpop.permute.xlu0 %3160 }
 0x349   : > { %v3192_v25 = vsel %vm2642_vm1, %v3184_v47, %v3161_v23  ;;  %4524 = vmatpush3.bf16.msra.mxu0 %v4521_v21  ;;  %v4539_v21 = vpack.c.bf16 %v3606_v57, %v3604_v22  ;;  %v3734_v22 = vld [vmem:[%s6289_s13 + $0x28] sm:$0xff]  ;;  %v3751_v57 = vld [vmem:[%s6289_s13 + $0xb0] sm:$0xff] }
 0x34a   : > { %4409 = vmatprep.mubr.msk.f32.mxu1 %vm2678_vm3, %v3192_v25  ;;  %s567_s21 = scalar_lea.vmem %s6323_s19, %s4177_s15 }
 0x34c   : > { %v3133_v39 = vpop.permute.xlu0 %3132 }
 0x34d   : > { %v3163_v60 = vpop.permute.xlu1 %3162  ;;  %v3186_v42 = vsel %vm2002_vm9, %v3066_v24, %v3133_v39 }
 0x34e   : > { %v3193_v41 = vsel %vm2642_vm1, %v3185_v15, %v3163_v60 }
 0x34f   : > { %4410 = vmatmul.mubr.msk.f32.vlgmr.msra.gmra.mrb[0].mxu1 %vm2678_vm3, %v3193_v41 }
 0x350   : > { %4508 = vmatpush3.bf16.msra.mxu1 %v4505_v17 }
 0x351   : > { %4510 = vmatprep.subr.bf16.mxu1 %v4509_v18 }
 0x354   : > { %4512 = vmatpush3.bf16.msra.mxu1 %v4509_v18  ;;  %v3600_v18 = vld [vmem:[%s6287_s11 + $0x20] sm:$0xff] }
 0x355   : > { %v4535_v36 = vpack.c.bf16 %v3602_v13, %v3600_v18  ;;  %v3732_v18 = vld [vmem:[%s6289_s13 + $0x18] sm:$0xff]  ;;  %v3749_v13 = vld [vmem:[%s6289_s13 + $0xa0] sm:$0xff] }
 0x35d   : > { %v3135_v40 = vpop.permute.xlu1 %3134 }
 0x35e   : > { %v3187_v26 = vsel %vm2002_vm9, %v5886_v20, %v3135_v40 }
 0x360   : > { %v3165_v49 = vpop.permute.xlu0 %3164 }
 0x361   : > { %v3194_v12 = vsel %vm2642_vm1, %v3186_v42, %v3165_v49 }
 0x362   : > { %4412 = vmatprep.mubr.msk.f32.mxu1 %vm2678_vm3, %v3194_v12 }
 0x374   : > { %v3137_v43 = vpop.permute.xlu0 %3136 }
 0x375   : > { %v3188_v45 = vsel %vm2002_vm9, %v3068_v28, %v3137_v43 }
 0x378   : > { %v3167_v11 = vpop.permute.xlu1 %3166 }
 0x379   : > { %v3195_v52 = vsel %vm2642_vm1, %v3187_v26, %v3167_v11 }
 0x37a   : > { %4413 = vmatmul.mubr.msk.f32.gmra.mrb[2].mxu1 %vm2678_vm3, %v3195_v52 }
 0x38d   : > { %v3139_v2 = vpop.permute.xlu1 %3138 }
 0x38e   : > { %v3189_v20 = vsel %vm2002_vm9, %v5911_v44, %v3139_v2 }
 0x390   : > { %v3169_v63 = vpop.permute.xlu0 %3168 }
 0x391   : > { %v3196_v59 = vsel %vm2642_vm1, %v3188_v45, %v3169_v63 }
 0x392   : > { %4415 = vmatprep.mubr.msk.f32.mxu1 %vm2678_vm3, %v3196_v59 }
 0x3a5   : > { %v3141_v10 = vpop.permute.xlu0 %3140 }
 0x3a6   : > { %v3190_v32 = vsel %vm2002_vm9, %v3070_v14, %v3141_v10  ;;  %v3490_v14 = vld [vmem:[#allocation11 + $0x30] sm:$0xff] }
 0x3a9   : > { %v3171_v29 = vpop.permute.xlu1 %3170 }
 0x3aa   : > { %v3197_v34 = vsel %vm2642_vm1, %v3189_v20, %v3171_v29 }
 0x3ab   : > { %4416 = vmatmul.mubr.msk.f32.gmra.mrb[4].mxu1 %vm2678_vm3, %v3197_v34 }
 0x3b2   : > { %v3143_v9 = vpop.permute.xlu1 %3142 }
 0x3b3   : > { %v3191_v30 = vsel %vm2002_vm9, %v3040_v48, %v3143_v9 }
 0x3b5   : > { %v3173_v7 = vpop.permute.xlu0 %3172 }
 0x3b6   : > { %v3198_v44 = vsel %vm2642_vm1, %v3190_v32, %v3173_v7  ;;  %v3175_v4 = vpop.permute.xlu1 %3174  ;;  %v3491_v32 = vld [vmem:[#allocation11 + $0x38] sm:$0xff] }
 0x3b7   : > { %v3199_v50 = vsel %vm2642_vm1, %v3191_v30, %v3175_v4  ;;  %4418 = vmatprep.mubr.msk.f32.mxu1 %vm2678_vm3, %v3198_v44  ;;  %v4525_v7 = vpack.c.bf16 %v3491_v32, %v3490_v14  ;;  %v3597_v30 = vld [vmem:[%s6287_s11 + $0x8] sm:$0xff]  ;;  %v3599_v44 = vld [vmem:[%s6287_s11 + $0x18] sm:$0xff]  ;;  %v3596_v4 = vld [vmem:[%s6287_s11] sm:$0xff]  ;;  %v4852_v32 = vmov 0.0  }
 0x3b8   : > { %4419 = vmatmul.mubr.msk.f32.gmra.mrb[6].mxu1 %vm2678_vm3, %v3199_v50  ;;  %v4529_v50 = vpack.c.bf16 %v3599_v44, %v3597_v30  ;;  %v4531_v17 = vpack.c.bf16 %v3598_v8, %v3596_v4  ;;  %v3746_v30 = vld [vmem:[%s6289_s13 + $0x88] sm:$0xff]  ;;  %v3729_v44 = vld [vmem:[%s6289_s13] sm:$0xff]  ;;  %v3747_v8 = vld [vmem:[%s6289_s13 + $0x90] sm:$0xff] }
 0x3b9   : > { %4526 = vmatprep.subr.bf16.mxu0 %v4525_v7 }
 0x3ba   : > { %4528 = vmatpush3.bf16.msra.mxu0 %v4525_v7  ;;  %4530 = vmatprep.subr.bf16.mxu1 %v4529_v50  ;;  %v3745_v7 = vld [vmem:[%s6289_s13 + $0x80] sm:$0xff]  ;;  %v3730_v50 = vld [vmem:[%s6289_s13 + $0x8] sm:$0xff] }
 0x3bb   : > { %v4561_v4 = vpack.c.bf16 %v3746_v30, %v3745_v7  ;;  %v4563_v46 = vpack.c.bf16 %v3730_v50, %v3729_v44  ;;  %v3632_v7 = vsub.s32 0, %v5107_v3 }
 0x3bd   : > { %4562 = vmatprep.subr.bf16.mxu0 %v4561_v4 }
 0x422   : > { %v4411_v54 = vpop.f32.mrb[0].mxu1 }
 0x423   : > { %v3315_v48 = vadd.f32 %v4411_v54, %v4199_v31  ;;  %v3309_v35 = vpop.f32.mrb[1].mxu1 }
 0x424   : > { %v3310_v33 = vadd.f32 %v4199_v31, %v3309_v35  ;;  %v3610_v35 = vld [vmem:[%s6287_s11 + $0x70] sm:$0xff] }
 0x425   : > { %v3349_v37 = vmax.f32 %v3315_v48, 0.0  ;;  %v3608_v48 = vld [vmem:[%s6287_s11 + $0x60] sm:$0xff] }
 0x426   : > { %v3348_v47 = vmax.f32 %v3310_v33, 0.0  ;;  %v3613_v33 = vld [vmem:[%s6287_s11 + $0x88] sm:$0xff] }
 0x427   : > { %3357 = vst.msk [vmem:[#allocation2 + $0x8] sm:$0xff] %vm2002_vm9, %v3349_v37  ;;  %v3615_v37 = vld [vmem:[%s6287_s11 + $0x98] sm:$0xff] }
 0x428   : > { %3356 = vst.msk [vmem:[#allocation2] sm:$0xff] %vm2002_vm9, %v3348_v47  ;;  %v4543_v47 = vpack.c.bf16 %v3610_v35, %v3608_v48  ;;  %v3736_v48 = vld [vmem:[%s6289_s13 + $0x38] sm:$0xff]  ;;  %v3753_v35 = vld [vmem:[%s6289_s13 + $0xc0] sm:$0xff] }
 0x42f   : > { %v3364_v23 = vld [vmem:[#allocation2] ss:$2 sm:$0xff]  ;;  %v3368_v5 = vld [vmem:[#allocation2 + $0x1] ss:$2 sm:$0xff] }
 0x430   : > { %v3372_v25 = vmax.f32 %v3364_v23, %v3368_v5  ;;  %v4545_v23 = vpack.c.bf16 %v3615_v37, %v3613_v33  ;;  %v3612_v5 = vld [vmem:[%s6287_s11 + $0x80] sm:$0xff]  ;;  %v3754_v33 = vld [vmem:[%s6289_s13 + $0xc8] sm:$0xff] }
 0x432   : > { %4429 = vmatprep.mubr.msk.f32.mxu1 %vm2002_vm9, %v3372_v25  ;;  %v3614_v25 = vld [vmem:[%s6287_s11 + $0x90] sm:$0xff] }
 0x44d   : > { %v4414_v15 = vpop.f32.mrb[2].mxu1 }
 0x44e   : > { %v3325_v60 = vadd.f32 %v4414_v15, %v4199_v31  ;;  %v3319_v41 = vpop.f32.mrb[3].mxu1  ;;  %v3617_v15 = vld [vmem:[%s6287_s11 + $0xa8] sm:$0xff] }
 0x44f   : > { %v3320_v62 = vadd.f32 %v4199_v31, %v3319_v41  ;;  %v4547_v41 = vpack.c.bf16 %v3614_v25, %v3612_v5  ;;  %v3738_v5 = vld [vmem:[%s6289_s13 + $0x48] sm:$0xff]  ;;  %v3755_v25 = vld [vmem:[%s6289_s13 + $0xd0] sm:$0xff] }
 0x450   : > { %v3351_v39 = vmax.f32 %v3325_v60, 0.0  ;;  %v3619_v60 = vld [vmem:[%s6287_s11 + $0xb8] sm:$0xff] }
 0x451   : > { %v3350_v24 = vmax.f32 %v3320_v62, 0.0  ;;  %v4549_v62 = vpack.c.bf16 %v3619_v60, %v3617_v15  ;;  %v3756_v15 = vld [vmem:[%s6289_s13 + $0xd8] sm:$0xff] }
 0x452   : > { %3359 = vst.msk [vmem:[#allocation2 + $0x18] sm:$0xff] %vm2002_vm9, %v3351_v39  ;;  %v3616_v39 = vld [vmem:[%s6287_s11 + $0xa0] sm:$0xff] }
 0x453   : > { %3358 = vst.msk [vmem:[#allocation2 + $0x10] sm:$0xff] %vm2002_vm9, %v3350_v24  ;;  %v3618_v24 = vld [vmem:[%s6287_s11 + $0xb0] sm:$0xff] }
 0x45a   : > { %v3365_v42 = vld [vmem:[#allocation2 + $0x10] ss:$2 sm:$0xff]  ;;  %v3369_v49 = vld [vmem:[#allocation2 + $0x11] ss:$2 sm:$0xff] }
 0x45b   : > { %v3373_v12 = vmax.f32 %v3365_v42, %v3369_v49  ;;  %v3621_v42 = vld [vmem:[%s6287_s11 + $0xc8] sm:$0xff]  ;;  %v3623_v49 = vld [vmem:[%s6287_s11 + $0xd8] sm:$0xff] }
 0x45d   : > { %4430 = vmatmul.mubr.msk.f32.vlgmr.msra.gmra.mrb[8].mxu1 %vm2002_vm9, %v3373_v12  ;;  %v4551_v12 = vpack.c.bf16 %v3618_v24, %v3616_v39  ;;  %v3740_v39 = vld [vmem:[%s6289_s13 + $0x58] sm:$0xff]  ;;  %v3757_v24 = vld [vmem:[%s6289_s13 + $0xe0] sm:$0xff] }
 0x45e   : > { %4532 = vmatpush1.bf16.msra.mxu1 %v4531_v17  ;;  %v4565_v17 = vpack.c.bf16 %v3748_v16, %v3747_v8 }
 0x45f   : > { %4534 = vmatprep.subr.bf16.mxu1 %v4533_v19  ;;  %v3731_v19 = vld [vmem:[%s6289_s13 + $0x10] sm:$0xff] }
 0x460   : > { %v4567_v61 = vpack.c.bf16 %v3732_v18, %v3731_v19 }
 0x462   : > { %4536 = vmatpush1.bf16.msra.mxu1 %v4535_v36  ;;  %v4569_v36 = vpack.c.bf16 %v3750_v58, %v3749_v13 }
 0x463   : > { %4538 = vmatprep.subr.bf16.mxu1 %v4537_v51  ;;  %v3733_v51 = vld [vmem:[%s6289_s13 + $0x20] sm:$0xff] }
 0x466   : > { %4540 = vmatpush1.bf16.msra.mxu1 %v4539_v21 }
 0x47e   : > { %v4417_v40 = vpop.f32.mrb[4].mxu1 }
 0x47f   : > { %v3335_v26 = vadd.f32 %v4417_v40, %v4199_v31  ;;  %v3329_v11 = vpop.f32.mrb[5].mxu1  ;;  %v4553_v40 = vpack.c.bf16 %v3623_v49, %v3621_v42  ;;  %v3758_v42 = vld [vmem:[%s6289_s13 + $0xe8] sm:$0xff] }
 0x480   : > { %v3330_v52 = vadd.f32 %v4199_v31, %v3329_v11  ;;  %v3622_v11 = vld [vmem:[%s6287_s11 + $0xd0] sm:$0xff] }
 0x481   : > { %v3353_v38 = vmax.f32 %v3335_v26, 0.0  ;;  %v3620_v26 = vld [vmem:[%s6287_s11 + $0xc0] sm:$0xff] }
 0x482   : > { %v3352_v43 = vmax.f32 %v3330_v52, 0.0  ;;  %v4555_v52 = vpack.c.bf16 %v3622_v11, %v3620_v26  ;;  %v3742_v26 = vld [vmem:[%s6289_s13 + $0x68] sm:$0xff] }
 0x483   : > { %3361 = vst.msk [vmem:[#allocation2 + $0x28] sm:$0xff] %vm2002_vm9, %v3353_v38  ;;  %v4208_v38 = vld [vmem:[%s6284_s8] ss:$0 sm:$0xff] }
 0x484   : > { %3360 = vst.msk [vmem:[#allocation2 + $0x20] sm:$0xff] %vm2002_vm9, %v3352_v43 }
 0x48b   : > { %v3366_v28 = vld [vmem:[#allocation2 + $0x20] ss:$2 sm:$0xff]  ;;  %v3370_v45 = vld [vmem:[#allocation2 + $0x21] ss:$2 sm:$0xff]  ;;  %v4420_v63 = vpop.f32.mrb[6].mxu1 }
 0x48c   : > { %v3374_v59 = vmax.f32 %v3366_v28, %v3370_v45  ;;  %v3345_v2 = vadd.f32 %v4420_v63, %v4199_v31  ;;  %v3339_v20 = vpop.f32.mrb[7].mxu1 }
 0x48d   : > { %v3340_v29 = vadd.f32 %v4199_v31, %v3339_v20  ;;  %v3611_v31 = vld [vmem:[%s6287_s11 + $0x78] sm:$0xff] }
 0x48e   : > { %4432 = vmatprep.mubr.msk.f32.mxu1 %vm2002_vm9, %v3374_v59  ;;  %v3355_v56 = vmax.f32 %v3345_v2, 0.0  ;;  %v4541_v54 = vpack.c.bf16 %v3611_v31, %v3609_v6  ;;  %v3752_v6 = vld [vmem:[%s6289_s13 + $0xb8] sm:$0xff]  ;;  %v4571_v31 = vpack.c.bf16 %v3734_v22, %v3733_v51 }
 0x48f   : > { %v3354_v34 = vmax.f32 %v3340_v29, 0.0  ;;  %v4573_v21 = vpack.c.bf16 %v3752_v6, %v3751_v57 }
 0x490   : > { %3363 = vst.msk [vmem:[#allocation2 + $0x38] sm:$0xff] %vm2002_vm9, %v3355_v56  ;;  %4542 = vmatprep.subr.bf16.mxu1 %v4541_v54  ;;  %v3625_v56 = vld [vmem:[%s6287_s11 + $0xe8] sm:$0xff]  ;;  %v3735_v54 = vld [vmem:[%s6289_s13 + $0x30] sm:$0xff] }
 0x491   : > { %3362 = vst.msk [vmem:[#allocation2 + $0x30] sm:$0xff] %vm2002_vm9, %v3354_v34  ;;  %4544 = vmatpush1.bf16.msra.mxu1 %v4543_v47  ;;  %v3627_v34 = vld [vmem:[%s6287_s11 + $0xf8] sm:$0xff]  ;;  %v4575_v37 = vpack.c.bf16 %v3736_v48, %v3735_v54  ;;  %v4577_v47 = vpack.c.bf16 %v3754_v33, %v3753_v35 }
 0x492   : > { %4546 = vmatprep.subr.bf16.mxu1 %v4545_v23  ;;  %v3737_v23 = vld [vmem:[%s6289_s13 + $0x40] sm:$0xff] }
 0x493   : > { %v4579_v60 = vpack.c.bf16 %v3738_v5, %v3737_v23 }
 0x495   : > { %4548 = vmatpush1.bf16.msra.mxu1 %v4547_v41  ;;  %v4581_v41 = vpack.c.bf16 %v3756_v15, %v3755_v25 }
 0x496   : > { %4550 = vmatprep.subr.bf16.mxu1 %v4549_v62  ;;  %v3739_v62 = vld [vmem:[%s6289_s13 + $0x50] sm:$0xff] }
 0x497   : > { %v4583_v49 = vpack.c.bf16 %v3740_v39, %v3739_v62 }
 0x498   : > { %v3367_v55 = vld [vmem:[#allocation2 + $0x30] ss:$2 sm:$0xff]  ;;  %v3371_v10 = vld [vmem:[#allocation2 + $0x31] ss:$2 sm:$0xff] }
 0x499   : > { %v3375_v9 = vmax.f32 %v3367_v55, %v3371_v10  ;;  %4552 = vmatpush1.bf16.msra.mxu1 %v4551_v12  ;;  %v4557_v55 = vpack.c.bf16 %v3627_v34, %v3625_v56  ;;  %v3624_v10 = vld [vmem:[%s6287_s11 + $0xe0] sm:$0xff]  ;;  %v4585_v12 = vpack.c.bf16 %v3758_v42, %v3757_v24  ;;  %v3760_v56 = vld [vmem:[%s6289_s13 + $0xf8] sm:$0xff]  ;;  %v3857_v42 = vand.u32 7, %v5850_v0 }
 0x49a   : > { %4554 = vmatprep.subr.bf16.mxu1 %v4553_v40  ;;  %v3741_v40 = vld [vmem:[%s6289_s13 + $0x60] sm:$0xff]  ;;  %v3864_v0 = vand.u32 7, %v5956_v27 }
 0x49b   : > { %4433 = vmatmul.mubr.msk.f32.gmra.mrb[10].mxu1 %vm2002_vm9, %v3375_v9  ;;  %v3626_v9 = vld [vmem:[%s6287_s11 + $0xf0] sm:$0xff]  ;;  %v4587_v11 = vpack.c.bf16 %v3742_v26, %v3741_v40  ;;  %vm3927_vm3 = vcmp.eq.s32.totalorder %v3857_v42, 7 }
 0x49c   : > { %v4559_v14 = vpack.c.bf16 %v3626_v9, %v3624_v10  ;;  %3704 = vmatprep.mubr.f32.mxu1 %v4852_v32  ;;  %v3744_v10 = vld [vmem:[%s6289_s13 + $0x78] sm:$0xff]  ;;  %vm3928_vm4 = vcmp.eq.s32.totalorder %v3864_v0, 7  ;;  %vm3896_vm6 = vcmp.eq.s32.totalorder %v3864_v0, 0 }
 0x49d   : > { %4556 = vmatpush1.bf16.msra.mxu1 %v4555_v52  ;;  %v4213_v52 = vld [vmem:[%s6286_s10] ss:$0 sm:$0xff] }
 0x49e   : > { %4558 = vmatprep.subr.bf16.mxu1 %v4557_v55  ;;  %v3743_v55 = vld [vmem:[%s6289_s13 + $0x70] sm:$0xff] }
 0x49f   : > { %v4591_v9 = vpack.c.bf16 %v3744_v10, %v3743_v55 }
 0x4a1   : > { %4560 = vmatpush1.bf16.msra.mxu1 %v4559_v14  ;;  %v3636_v14 = vsub.s32 1, %v5107_v3 }
 0x530   : > { %v4431_v43 = vpop.f32.mrb[8].mxu1 }
 0x531   : > { %v3465_v28 = vpop.f32.mrb[9].mxu1  ;;  %v3471_v63 = vadd.f32 %v4431_v43, %v4208_v38 }
 0x532   : > { %v3466_v45 = vadd.f32 %v4208_v38, %v3465_v28 }
 0x534   : > { %4451 = vmatprep.mubr.msk.f32.mxu0 %vm2642_vm1, %v3466_v45 }
 0x535   : > { %4452 = vmatmul.mubr.msk.f32.vlgmr.msra.gmra.mrb[16].mxu0 %vm2642_vm1, %v3471_v63 }
 0x536   : > { %4564 = vmatpush3.bf16.msra.mxu0 %v4563_v46 }
 0x537   : > { %4566 = vmatprep.subr.bf16.mxu0 %v4565_v17 }
 0x53a   : > { %4568 = vmatpush3.bf16.msra.mxu0 %v4567_v61 }
 0x53b   : > { %4570 = vmatprep.subr.bf16.mxu0 %v4569_v36 }
 0x53e   : > { %4572 = vmatpush3.bf16.msra.mxu0 %v4571_v31 }
 0x53f   : > { %4574 = vmatprep.subr.bf16.mxu0 %v4573_v21 }
 0x542   : > { %4576 = vmatpush3.bf16.msra.mxu0 %v4575_v37 }
 0x543   : > { %4578 = vmatprep.subr.bf16.mxu0 %v4577_v47 }
 0x546   : > { %4580 = vmatpush3.bf16.msra.mxu0 %v4579_v60 }
 0x547   : > { %4582 = vmatprep.subr.bf16.mxu0 %v4581_v41  ;;  %v3850_v41 = vand.u32 7, %v5107_v3 }
 0x549   : > { %vm3926_vm9 = vcmp.eq.s32.totalorder %v3850_v41, 7  ;;  %vm6248_vm5 = vcmp.eq.s32.totalorder %v3850_v41, 0 }
 0x54a   : > { %4584 = vmatpush3.bf16.msra.mxu0 %v4583_v49 }
 0x54b   : > { %4586 = vmatprep.subr.bf16.mxu0 %v4585_v12 }
 0x54e   : > { %4588 = vmatpush3.bf16.msra.mxu0 %v4587_v11 }
 0x56e   : > { %v4434_v59 = vpop.f32.mrb[10].mxu1 }
 0x56f   : > { %v3481_v2 = vadd.f32 %v4434_v59, %v4208_v38  ;;  %v3475_v20 = vpop.f32.mrb[11].mxu1 }
 0x570   : > { %v3476_v29 = vadd.f32 %v4208_v38, %v3475_v20 }
 0x572   : > { %4454 = vmatprep.mubr.msk.f32.mxu0 %vm2642_vm1, %v3476_v29  ;;  %v3759_v29 = vld [vmem:[%s6289_s13 + $0xf0] sm:$0xff] }
 0x573   : > { %4455 = vmatmul.mubr.msk.f32.gmra.mrb[18].mxu0 %vm2642_vm1, %v3481_v2  ;;  %v4589_v34 = vpack.c.bf16 %v3760_v56, %v3759_v29  ;;  %vm3895_vm1 = vcmp.eq.s32.totalorder %v3857_v42, 0  ;;  %v3871_v29 = vand.u32 7, %v5464_v53 }
 0x575   : > { %4590 = vmatprep.subr.bf16.mxu0 %v4589_v34  ;;  %vm3929_vm7 = vcmp.eq.s32.totalorder %v3871_v29, 7  ;;  %vm3897_vm8 = vcmp.eq.s32.totalorder %v3871_v29, 0 }
 0x576   : > { %4592 = vmatpush3.bf16.msra.mxu0 %v4591_v9 }
 0x608   : > { %v4453_v38 = vpop.f32.mrb[16].mxu0 }
 0x609   : > { %v3577_v43 = vpop.f32.mrb[17].mxu0  ;;  %v3583_v45 = vadd.f32 %v4453_v38, %v4213_v52 }
 0x60a   : > { %v3578_v28 = vadd.f32 %v4213_v52, %v3577_v43 }
 0x60c   : > { %3705 = vmatmul.mubr.f32.vlgmr.msra.gmra.mrb[12].mxu1 %v3578_v28 }
 0x60d   : > { %3710 = vmatprep.mubr.f32.mxu1 %v4852_v32 }
 0x610   : > { %3711 = vmatmul.mubr.f32.gmra.mrb[14].mxu1 %v3583_v45 }
 0x611   : > { %3716 = vmatprep.mubr.f32.mxu1 %v4852_v32 }
 0x646   : > { %v4456_v63 = vpop.f32.mrb[18].mxu0 }
 0x647   : > { %v3593_v59 = vadd.f32 %v4456_v63, %v4213_v52  ;;  %v3587_v2 = vpop.f32.mrb[19].mxu0 }
 0x648   : > { %v3588_v20 = vadd.f32 %v4213_v52, %v3587_v2 }
 0x64a   : > { %3717 = vmatmul.mubr.f32.gmra.mrb[16].mxu1 %v3588_v20 }
 0x64b   : > { %3722 = vmatprep.mubr.f32.mxu1 %v4852_v32  ;;  %v3628_v32 = vld [vmem:[%s6288_s12] sm:$0x3] }
 0x64c   : > { %v3637_v30 = vrot.slane %v3628_v32, %v3636_v14  ;;  %v3633_v44 = vrot.slane %v3628_v32, %v3632_v7 }
 0x64e   : > { %3723 = vmatmul.mubr.f32.gmra.mrb[18].mxu1 %v3593_v59 }
 0x6df   : > { %v3706_v4 = vpop.f32.mrb[12].mxu1 }
 0x6e0   : > { %v3708_v50 = vpop.f32.mrb[13].mxu1  ;;  %v3707_v16 = vadd.f32 %v3706_v4, %v3633_v44 }
 0x6e1   : > { %v3709_v8 = vadd.f32 %v3708_v50, %v3637_v30 }
 0x6e3   : > { %v3712_v46 = vpop.f32.mrb[14].mxu1  ;;  %3825 = vmatprep.mubr.f32.mxu0 %v3709_v8 }
 0x6e4   : > { %v3714_v17 = vpop.f32.mrb[15].mxu1  ;;  %3826 = vmatmul.mubr.f32.vlgmr.msra.gmra.mrb[20].mxu0 %v3707_v16  ;;  %v3713_v18 = vadd.f32 %v3712_v46, %v3633_v44  ;;  %v4218_v16 = vld [vmem:[#allocation3] ss:$0 sm:$0xff] }
 0x6e5   : > { %v3715_v19 = vadd.f32 %v3714_v17, %v3637_v30 }
 0x6e7   : > { %3830 = vmatprep.mubr.f32.mxu0 %v3715_v19  ;;  %v3955_v19 = vand.u32 127, %v601_v1 }
 0x6e8   : > { %3831 = vmatmul.mubr.f32.gmra.mrb[22].mxu0 %v3713_v18 }
 0x6e9   : > { %vm3956_vm10 = vcmp.eq.s32.totalorder %v3955_v19, 0 }
 0x71d   : > { %v3718_v13 = vpop.f32.mrb[16].mxu1 }
 0x71e   : > { %v3720_v58 = vpop.f32.mrb[17].mxu1  ;;  %v3719_v36 = vadd.f32 %v3718_v13, %v3633_v44 }
 0x71f   : > { %v3721_v61 = vadd.f32 %v3720_v58, %v3637_v30 }
 0x721   : > { %v3724_v51 = vpop.f32.mrb[18].mxu1  ;;  %3835 = vmatprep.mubr.f32.mxu0 %v3721_v61 }
 0x722   : > { %v3726_v22 = vpop.f32.mrb[19].mxu1  ;;  %3836 = vmatmul.mubr.f32.gmra.mrb[24].mxu0 %v3719_v36  ;;  %v3725_v6 = vadd.f32 %v3724_v51, %v3633_v44 }
 0x723   : > { %v3727_v57 = vadd.f32 %v3726_v22, %v3637_v30 }
 0x725   : > { %3840 = vmatprep.mubr.f32.mxu0 %v3727_v57 }
 0x726   : > { %3841 = vmatmul.mubr.f32.gmra.mrb[26].mxu0 %v3725_v6 }
 0x7b7   : > { %v4325_v31 = vpop.f32.mrb[20].mxu0 }
 0x7b8   : > { %v4326_v21 = vpop.f32.mrb[21].mxu0 }
 0x7b9   : > { %v6222_v54 = vadd.f32 %v4326_v21, %v4325_v31 }
 0x7bb   : > { %v4328_v48 = vpop.f32.mrb[22].mxu0  ;;  %3930 = vrot.lane.b32.xlu0 %v6222_v54, %s4853_s14 }
 0x7bc   : > { %v4329_v35 = vpop.f32.mrb[23].mxu0 }
 0x7bd   : > { %v6225_v33 = vadd.f32 %v4329_v35, %v4328_v48 }
 0x7bf   : > { %3932 = vrot.lane.b32.xlu1 %v6225_v33, %s4853_s14  ;;  %3902 = vrot.lane.b32.xlu0 %v6222_v54, %s4854_s26 }
 0x7c3   : > { %3904 = vrot.lane.b32.xlu1 %v6225_v33, %s4854_s26 }
 0x7f5   : > { %v4331_v37 = vpop.f32.mrb[24].mxu0 }
 0x7f6   : > { %v4332_v47 = vpop.f32.mrb[25].mxu0 }
 0x7f7   : > { %v6230_v23 = vadd.f32 %v4332_v47, %v4331_v37 }
 0x7f9   : > { %v4334_v5 = vpop.f32.mrb[26].mxu0  ;;  %3934 = vrot.lane.b32.xlu0 %v6230_v23, %s4853_s14 }
 0x7fa   : > { %v4335_v25 = vpop.f32.mrb[27].mxu0 }
 0x7fb   : > { %v6233_v15 = vadd.f32 %v4335_v25, %v4334_v5 }
 0x7fd   : > { %3908 = vrot.lane.b32.xlu1 %v6233_v15, %s4854_s26  ;;  %3936 = vrot.lane.b32.xlu0 %v6233_v15, %s4853_s14 }
 0x801   : > { %3906 = vrot.lane.b32.xlu1 %v6230_v23, %s4854_s26 }
 0x82d   : > { %v3931_v60 = vpop.permute.xlu0 %3930 }
 0x82e   : > { %v3942_v39 = vrot.slane %v3931_v60, 1 }
 0x831   : > { %v3933_v62 = vpop.permute.xlu1 %3932  ;;  %v3903_v49 = vpop.permute.xlu0 %3902 }
 0x832   : > { %v3943_v24 = vrot.slane %v3933_v62, 1  ;;  %v3914_v11 = vrot.slane %v3903_v49, 7 }
 0x834   : > { %v3948_v12 = vsel %vm1637_vm2, %v3942_v39, %v3943_v24 }
 0x835   : > { %v3905_v40 = vpop.permute.xlu1 %3904  ;;  %v3950_v26 = vsel %vm3926_vm9, 0.0, %v3948_v12 }
 0x836   : > { %v3915_v52 = vrot.slane %v3905_v40, 7  ;;  %3960 = vperm.xlu0 %4660, %v3950_v26  }
 0x838   : > { %v3920_v38 = vsel %vm1082_vm0, %v3914_v11, %v3915_v52 }
 0x839   : > { %v3923_v43 = vsel %vm3895_vm1, 0.0, %v3920_v38 }
 0x83a   : > { %3989 = vperm.xlu0 %4660, %v3923_v43  }
 0x86b   : > { %v3935_v28 = vpop.permute.xlu0 %3934 }
 0x86c   : > { %v3944_v45 = vrot.slane %v3935_v28, 1 }
 0x86e   : > { %v3947_v63 = vsel %vm1637_vm2, %v3943_v24, %v3944_v45 }
 0x86f   : > { %v3909_v59 = vpop.permute.xlu1 %3908  ;;  %v3937_v2 = vpop.permute.xlu0 %3936  ;;  %v3951_v20 = vsel %vm3927_vm3, 0.0, %v3947_v63 }
 0x870   : > { %v3917_v56 = vrot.slane %v3909_v59, 7  ;;  %v3945_v34 = vrot.slane %v3937_v2, 1  ;;  %3965 = vperm.xlu1 %4661, %v3951_v20  }
 0x872   : > { %v3946_v10 = vsel %vm1637_vm2, %v3944_v45, %v3945_v34  ;;  %v3921_v27 = vsel %vm1082_vm0, %v3917_v56, %v3914_v11  ;;  %v3949_v7 = vsel %vm1637_vm2, %v3945_v34, %v3942_v39  ;;  %vm3957_vm2 = vcmp.eq.s32.totalorder %v3955_v19, 7 }
 0x873   : > { %v3907_v9 = vpop.permute.xlu1 %3906  ;;  %v3952_v14 = vsel %vm3928_vm4, 0.0, %v3946_v10  ;;  %v3922_v32 = vsel %vm6248_vm5, 0.0, %v3921_v27  ;;  %v3953_v4 = vsel %vm3929_vm7, 0.0, %v3949_v7 }
 0x874   : > { %v3916_v53 = vrot.slane %v3907_v9, 7  ;;  %3970 = vperm.xlu1 %4661, %v3952_v14  }
 0x876   : > { %v3919_v30 = vsel %vm1082_vm0, %v3915_v52, %v3916_v53  ;;  %v3918_v50 = vsel %vm1082_vm0, %v3916_v53, %v3917_v56  ;;  %vm4048_vm0 = vcmask 64512  }
 0x877   : > { %v3924_v44 = vsel %vm3896_vm6, 0.0, %v3919_v30  ;;  %v3925_v8 = vsel %vm3897_vm8, 0.0, %v3918_v50 }
 0x878   : > { %3994 = vperm.xlu0 %4660, %v3924_v44   ;;  %3975 = vperm.xlu1 %4661, %v3953_v4  }
 0x87c   : > { %3984 = vperm.xlu0 %4660, %v3922_v32   ;;  %3999 = vperm.xlu1 %4661, %v3925_v8  }
 0x880   : > { %4017 = vperm.xlu0 %4660, %v4218_v16  }
 0x8b5   : > { %v3961_v46 = vpop.permute.xlu0 %3960 }
 0x8b6   : > { %v3978_v22 = vsel %vm3957_vm2, %v3961_v46, 0.0 }
 0x8b9   : > { %v3990_v18 = vpop.permute.xlu0 %3989 }
 0x8ef   : > { %v3966_v17 = vpop.permute.xlu1 %3965 }
 0x8f0   : > { %v3979_v36 = vsel %vm3957_vm2, %v3966_v17, 0.0 }
 0x8f1   : > { %v4003_v3 = vsel %vm3956_vm10, %v3990_v18, %v3979_v36 }
 0x8f2   : > { %v4007_v47 = vadd.f32 %v6225_v33, %v4003_v3 }
 0x8f3   : > { %v3971_v13 = vpop.permute.xlu1 %3970 }
 0x8f4   : > { %v3980_v51 = vsel %vm3957_vm2, %v3971_v13, 0.0 }
 0x8f7   : > { %v3976_v58 = vpop.permute.xlu1 %3975  ;;  %v3995_v61 = vpop.permute.xlu0 %3994 }
 0x8f8   : > { %v3981_v57 = vsel %vm3957_vm2, %v3976_v58, 0.0  ;;  %v4004_v6 = vsel %vm3956_vm10, %v3995_v61, %v3980_v51 }
 0x8f9   : > { %v4008_v5 = vadd.f32 %v6230_v23, %v4004_v6 }
 0x8fb   : > { %v4000_v31 = vpop.permute.xlu1 %3999  ;;  %v3985_v21 = vpop.permute.xlu0 %3984 }
 0x8fc   : > { %v4005_v48 = vsel %vm3956_vm10, %v4000_v31, %v3981_v57  ;;  %v4002_v35 = vsel %vm3956_vm10, %v3985_v21, %v3978_v22 }
 0x8fd   : > { %v4009_v37 = vadd.f32 %v6233_v15, %v4005_v48  ;;  %v4006_v1 = vadd.f32 %v6222_v54, %v4002_v35 }
 0x8ff   : > { %v4018_v25 = vpop.permute.xlu0 %4017 }
 0x900   : > { %v4020_v60 = vadd.f32 %v4018_v25, %v4006_v1  ;;  %v4021_v41 = vadd.f32 %v4018_v25, %v4007_v47  ;;  %v4022_v62 = vadd.f32 %v4018_v25, %v4008_v5  ;;  %v4023_v39 = vadd.f32 %v4018_v25, %v4009_v37 }
 0x902   : > { %v4219_v24 = vmul.f32 -1.442695, %v4020_v60  ;;  %v4220_v42 = vmul.f32 -1.442695, %v4021_v41  ;;  %v4221_v49 = vmul.f32 -1.442695, %v4022_v62 }
 0x903   : > { %v4222_v12 = vmul.f32 -1.442695, %v4023_v39 }
 0x904   : > { %4662 = vpow2.f32 %v4219_v24 }
 0x905   : > { %4664 = vpow2.f32 %v4220_v42 }
 0x906   : > { %4666 = vpow2.f32 %v4221_v49 }
 0x907   : > { %4668 = vpow2.f32 %v4222_v12 }
 0x90e   : > { %v4663_v54 = vpop.eup %4662 }
 0x90f   : > { %v4665_v15 = vpop.eup %4664  ;;  %v4036_v33 = vadd.f32 1.0, %v4663_v54 }
 0x910   : > { %v4667_v40 = vpop.eup %4666  ;;  %v4037_v23 = vadd.f32 1.0, %v4665_v15 }
 0x911   : > { %v4669_v26 = vpop.eup %4668  ;;  %v4038_v11 = vadd.f32 1.0, %v4667_v40  ;;  %4670 = vrcp.f32 %v4036_v33 }
 0x912   : > { %v4039_v52 = vadd.f32 1.0, %v4669_v26  ;;  %4672 = vrcp.f32 %v4037_v23 }
 0x913   : > { %4674 = vrcp.f32 %v4038_v11 }
 0x914   : > { %4676 = vrcp.f32 %v4039_v52 }
 0x91b   : > { %v4671_v38 = vpop.eup %4670 }
 0x91c   : > { %v4673_v43 = vpop.eup %4672  ;;  %4049 = vst.msk [vmem:[%s567_s21] sm:$0xff] %vm4048_vm0, %v4671_v38 }
 0x91d   : > { %v4675_v28 = vpop.eup %4674  ;;  %4050 = vst.msk [vmem:[%s567_s21 + $0x8] sm:$0xff] %vm4048_vm0, %v4673_v43 }
 0x91e   : > { %v4677_v45 = vpop.eup %4676  ;;  %4051 = vst.msk [vmem:[%s567_s21 + $0x10] sm:$0xff] %vm4048_vm0, %v4675_v28 }
 0x91f   : > { %4052 = vst.msk [vmem:[%s567_s21 + $0x18] sm:$0xff] %vm4048_vm0, %v4677_v45 }
 0x920 PF: > { %s6324_s23 = sld [smem:[#allocation15_spill]] }
 0x926   : > { %s30_s20 = sadd.s32 1, %s6324_s23  }
 0x927   : > { %p27_p8 = scmp.ge.s32.totalorder %s30_s20, 4  }
 0x929   :  { %29 = sbr.rel (!%p27_p8) target bundleno = 6 (0x6), region = 162 }
 0x930   :  { %4075 = vsyncpa [#allocation5], 1 }
 0x931   :  { %4077 = vsyncpa [#allocation5 + $0x1], 1 }
 0x932   :  { %4078 = vsyncpa [#allocation7], 1 }
 0x933   :  { %4079 = vsyncpa [#allocation10], 1 }

</bundles_post_ra>
